<compile_context>
chip_gen: v5e
topology: v5e:2x2
jax: 0.10.0
libtpu: 0.0.40
codegen_flags: <defaults>
</compile_context>

<pallas_src>
import functools

import jax
import jax.numpy as jnp
from jax import lax
from jax.experimental import pallas as pl
from jax.experimental.pallas import tpu as pltpu


# ------------------------------------------------------------------ fused block kernel
def _block_kernel(xp_ref, w_ref, b0_ref, p_ref, o_ref, *, H, W):
    """move0 + binact + conv3x3 + BN + residual + move1 + PReLU + move2, one batch elem.

    xp_ref : (1, H+2, W+2, C)  f32   zero-padded NHWC input x
    w_ref  : (9, C, Cout)      bf16  conv weights, tap-major (dy*3+dx)
    b0_ref : (1, C)            f32   move0 bias
    p_ref  : (4, Cout)         f32   [bn_scale, bn_shift(+bias1), prelu_alpha, bias2]
    o_ref  : (1, H, W, Cout)   f32
    """
    Hp, Wp, C = xp_ref.shape[1], xp_ref.shape[2], xp_ref.shape[3]
    Cout = o_ref.shape[3]

    xp = xp_ref[0]                                        # (Hp, Wp, C) f32

    # ---- move0 + binary activation (forward value == sign) --------------------------
    v = xp + b0_ref[...]                                  # (Hp,Wp,C) + (1,C) broadcast
    a = jnp.where(v > 0.0, 1.0, jnp.where(v < 0.0, -1.0, 0.0))
    # conv zero-padding applies AFTER the activation -> force the 1-pixel border to 0.
    row = lax.broadcasted_iota(jnp.int32, (Hp, Wp, C), 0)
    col = lax.broadcasted_iota(jnp.int32, (Hp, Wp, C), 1)
    interior = (row >= 1) & (row < Hp - 1) & (col >= 1) & (col < Wp - 1)
    a = jnp.where(interior, a, 0.0).astype(jnp.bfloat16)  # exactly {-1,0,+1}

    # ---- conv3x3 as 9 shifted-tap bf16 matmuls with f32 accumulation ----------------
    w = w_ref[...]                                        # (9, C, Cout) bf16
    acc = jnp.zeros((H * W, Cout), jnp.float32)
    for dy in range(3):
        for dx in range(3):
            lhs = a[dy:dy + H, dx:dx + W, :].reshape(H * W, C)
            acc = acc + jnp.dot(lhs, w[dy * 3 + dx],
                                preferred_element_type=jnp.float32)

    # ---- epilogue: BN (inference) + residual + move1 (folded) + PReLU + move2 -------
    p = p_ref[...]
    scale, shift, alpha, b2 = p[0], p[1], p[2], p[3]      # each (Cout,)
    res = xp[1:H + 1, 1:W + 1, :].reshape(H * W, C)       # residual (stride=1, Cout==C)
    y = acc * scale + shift + res
    y = jnp.where(y > 0.0, y, alpha * y)                  # PReLU
    y = y + b2
    o_ref[0] = y.reshape(H, W, Cout).astype(o_ref.dtype)


# ------------------------------------------------------------------------ forward pass
@jax.jit
def basic_block1_forward(x, params):
    """BasicBlock1 forward (stride=1, downsample=None, inference-mode BatchNorm)."""
    N, C, H, W = x.shape
    x = x.astype(jnp.float32)
    conv_w = params["conv_w"].astype(jnp.float32)          # (Cout, Cin, 3, 3)
    Cout = conv_w.shape[0]
    Hp, Wp = H + 2, W + 2

    # Boundary layout plumbing only: NCHW -> zero-padded NHWC.
    x_nhwc = jnp.transpose(x, (0, 2, 3, 1))                 # (N, H, W, C)
    xp = jnp.pad(x_nhwc, ((0, 0), (1, 1), (1, 1), (0, 0)))  # (N, Hp, Wp, C)

    # Weights as (tap, Cin, Cout) in bf16 (lossless: conv_w is bf16-representable).
    w_taps = jnp.transpose(conv_w, (2, 3, 1, 0)).reshape(9, C, Cout).astype(jnp.bfloat16)

    b0 = params["bias0"].astype(jnp.float32).reshape(1, C)

    # Fold BN (running stats) and move1 into scale/shift; pack epilogue params.
    inv_std = lax.rsqrt(params["bn_var"].astype(jnp.float32) + params["bn_eps"])
    scale = params["bn_gamma"].astype(jnp.float32) * inv_std
    shift = (params["bn_beta"].astype(jnp.float32)
             - params["bn_mean"].astype(jnp.float32) * scale
             + params["bias1"].astype(jnp.float32))
    pack = jnp.stack([scale, shift,
                      params["prelu_alpha"].astype(jnp.float32),
                      params["bias2"].astype(jnp.float32)], axis=0)   # (4, Cout)

    kernel = functools.partial(_block_kernel, H=H, W=W)
    out_nhwc = pl.pallas_call(
        kernel,
        out_shape=jax.ShapeDtypeStruct((N, H, W, Cout), jnp.float32),
        grid=(N,),
        in_specs=[
            pl.BlockSpec((1, Hp, Wp, C), lambda n: (n, 0, 0, 0)),   # padded x tile
            pl.BlockSpec((9, C, Cout), lambda n: (0, 0, 0)),        # weights (resident)
            pl.BlockSpec((1, C), lambda n: (0, 0)),                 # move0 bias
            pl.BlockSpec((4, Cout), lambda n: (0, 0)),              # packed epilogue
        ],
        out_specs=pl.BlockSpec((1, H, W, Cout), lambda n: (n, 0, 0, 0)),
        compiler_params=pltpu.CompilerParams(dimension_semantics=("parallel",)),
    )(xp, w_taps, b0, pack)

    return jnp.transpose(out_nhwc, (0, 3, 1, 2))             # back to NCHW


# ---------------------------------------------------------------------------- reference
def _reference_block(x, params):
    """Pure-JAX mirror of the PyTorch BasicBlock1 forward (for sanity checking)."""
    N, C, H, W = x.shape
    f32 = jnp.float32
    xm = x + params["bias0"].reshape(1, C, 1, 1)
    out_forward = jnp.sign(xm)
    m1 = (xm < -1.0).astype(f32)
    m2 = (xm < 0.0).astype(f32)
    m3 = (xm < 1.0).astype(f32)
    out1 = -1.0 * m1 + (xm * xm + 2.0 * xm) * (1.0 - m1)
    out2 = out1 * m2 + (-xm * xm + 2.0 * xm) * (1.0 - m2)
    out3 = out2 * m3 + 1.0 * (1.0 - m3)
    a = out_forward - out3 + out3
    y = lax.conv_general_dilated(
        a, params["conv_w"], window_strides=(1, 1), padding=((1, 1), (1, 1)),
        dimension_numbers=("NCHW", "OIHW", "NCHW"))
    inv_std = (1.0 / jnp.sqrt(params["bn_var"] + params["bn_eps"])).reshape(1, -1, 1, 1)
    y = (y - params["bn_mean"].reshape(1, -1, 1, 1)) * inv_std \
        * params["bn_gamma"].reshape(1, -1, 1, 1) + params["bn_beta"].reshape(1, -1, 1, 1)
    y = y + x                                               # residual (downsample is None)
    y = y + params["bias1"].reshape(1, -1, 1, 1)
    alpha = params["prelu_alpha"].reshape(1, -1, 1, 1)
    y = jnp.where(y > 0, y, alpha * y)                      # PReLU
    y = y + params["bias2"].reshape(1, -1, 1, 1)
    return y


if __name__ == "__main__":
    key = jax.random.PRNGKey(0)
    N, C, H, W = 2, 4, 16, 16            # inplanes = planes = 4, stride = 1
    planes = C
    ks = jax.random.split(key, 9)

    x = jax.random.normal(ks[0], (N, C, H, W), dtype=jnp.float32) * 1.5

    # Round conv weights to bf16-representable f32 so the Pallas bf16 matmul and the XLA
    # reference conv see bit-identical operands; remaining diff is accumulation order only.
    conv_w = jax.random.normal(ks[1], (planes, C, 3, 3), dtype=jnp.float32) * 0.1
    conv_w = conv_w.astype(jnp.bfloat16).astype(jnp.float32)

    params = dict(
        bias0=0.1 * jax.random.normal(ks[2], (C,), dtype=jnp.float32),
        conv_w=conv_w,
        bn_gamma=1.0 + 0.1 * jax.random.normal(ks[3], (planes,), dtype=jnp.float32),
        bn_beta=0.1 * jax.random.normal(ks[4], (planes,), dtype=jnp.float32),
        bn_mean=0.1 * jax.random.normal(ks[5], (planes,), dtype=jnp.float32),
        bn_var=jnp.abs(jax.random.normal(ks[6], (planes,), dtype=jnp.float32)) + 0.5,
        bn_eps=1e-5,
        bias1=0.1 * jax.random.normal(ks[7], (planes,), dtype=jnp.float32),
        prelu_alpha=jnp.full((planes,), 0.25, dtype=jnp.float32),
        bias2=0.1 * jax.random.normal(ks[8], (planes,), dtype=jnp.float32),
    )

    y = basic_block1_forward(x, params)
    y = jax.block_until_ready(y)

    y_ref = _reference_block(x, params)
    assert y.shape == x.shape and y.dtype == jnp.float32
    max_diff = float(jnp.max(jnp.abs(y - y_ref)))
    assert jnp.allclose(y, y_ref, atol=1e-4, rtol=1e-4), (
        "mismatch vs reference, max abs diff = %g" % max_diff)

    print("KERNEL_OK")
</pallas_src>

<mosaic_0001>
module attributes {stable_mosaic.version = 11 : i64} {
  func.func @_block_kernel(%arg0: i32, %arg1: memref<1x18x18x4xf32, #tpu.memory_space<vmem>>, %arg2: memref<9x4x4xbf16, #tpu.memory_space<vmem>>, %arg3: memref<1x4xf32, #tpu.memory_space<vmem>>, %arg4: memref<4x4xf32, #tpu.memory_space<vmem>>, %arg5: memref<1x16x16x4xf32, #tpu.memory_space<vmem>>) attributes {dimension_semantics = [#tpu.dimension_semantics<parallel>], iteration_bounds = array<i64: 2>, scalar_prefetch = 0 : i64, scratch_operands = 0 : i64, tpu.core_type = #tpu.core_type<tc>, window_params = [{transform_indices = @transform_0, window_bounds = array<i64: 1, 18, 18, 4>}, {pipeline_mode = #tpu.pipeline_mode<synchronous>, transform_indices = @transform_1, window_bounds = array<i64: 9, 4, 4>}, {pipeline_mode = #tpu.pipeline_mode<synchronous>, transform_indices = @transform_2, window_bounds = array<i64: 1, 4>}, {pipeline_mode = #tpu.pipeline_mode<synchronous>, transform_indices = @transform_3, window_bounds = array<i64: 4, 4>}, {transform_indices = @transform_4, window_bounds = array<i64: 1, 16, 16, 4>}]} {
    %c0 = arith.constant 0 : index
    %c0_0 = arith.constant 0 : index
    %c0_1 = arith.constant 0 : index
    %c0_2 = arith.constant 0 : index
    %0 = vector.load %arg1[%c0, %c0_0, %c0_1, %c0_2] : memref<1x18x18x4xf32, #tpu.memory_space<vmem>>, vector<1x18x18x4xf32>
    %1 = vector.shape_cast %0 : vector<1x18x18x4xf32> to vector<18x18x4xf32>
    %c0_3 = arith.constant 0 : index
    %c0_4 = arith.constant 0 : index
    %2 = vector.load %arg3[%c0_3, %c0_4] : memref<1x4xf32, #tpu.memory_space<vmem>>, vector<1x4xf32>
    %3 = vector.shape_cast %2 : vector<1x4xf32> to vector<1x1x4xf32>
    %4 = vector.broadcast %3 : vector<1x1x4xf32> to vector<18x18x4xf32>
    %5 = arith.addf %1, %4 : vector<18x18x4xf32>
    %cst = arith.constant 0.000000e+00 : f32
    %6 = vector.broadcast %cst : f32 to vector<18x18x4xf32>
    %7 = arith.cmpf ogt, %5, %6 : vector<18x18x4xf32>
    %cst_5 = arith.constant 0.000000e+00 : f32
    %8 = vector.broadcast %cst_5 : f32 to vector<18x18x4xf32>
    %9 = arith.cmpf olt, %5, %8 : vector<18x18x4xf32>
    %cst_6 = arith.constant -1.000000e+00 : f32
    %cst_7 = arith.constant 0.000000e+00 : f32
    %10 = vector.broadcast %cst_6 : f32 to vector<18x18x4xf32>
    %11 = vector.broadcast %cst_7 : f32 to vector<18x18x4xf32>
    %12 = arith.select %9, %10, %11 : vector<18x18x4xi1>, vector<18x18x4xf32>
    %cst_8 = arith.constant 1.000000e+00 : f32
    %13 = vector.broadcast %cst_8 : f32 to vector<18x18x4xf32>
    %14 = arith.select %7, %13, %12 : vector<18x18x4xi1>, vector<18x18x4xf32>
    %15 = tpu.iota {dimensions = array<i32: 0>} : vector<18x18x4xi32>
    %16 = tpu.iota {dimensions = array<i32: 1>} : vector<18x18x4xi32>
    %c1_i32 = arith.constant 1 : i32
    %17 = vector.broadcast %c1_i32 : i32 to vector<18x18x4xi32>
    %18 = arith.cmpi sge, %15, %17 : vector<18x18x4xi32>
    %c17_i32 = arith.constant 17 : i32
    %19 = vector.broadcast %c17_i32 : i32 to vector<18x18x4xi32>
    %20 = arith.cmpi slt, %15, %19 : vector<18x18x4xi32>
    %21 = arith.andi %18, %20 : vector<18x18x4xi1>
    %c1_i32_9 = arith.constant 1 : i32
    %22 = vector.broadcast %c1_i32_9 : i32 to vector<18x18x4xi32>
    %23 = arith.cmpi sge, %16, %22 : vector<18x18x4xi32>
    %24 = arith.andi %21, %23 : vector<18x18x4xi1>
    %c17_i32_10 = arith.constant 17 : i32
    %25 = vector.broadcast %c17_i32_10 : i32 to vector<18x18x4xi32>
    %26 = arith.cmpi slt, %16, %25 : vector<18x18x4xi32>
    %27 = arith.andi %24, %26 : vector<18x18x4xi1>
    %cst_11 = arith.constant 0.000000e+00 : f32
    %28 = vector.broadcast %cst_11 : f32 to vector<18x18x4xf32>
    %29 = arith.select %27, %14, %28 : vector<18x18x4xi1>, vector<18x18x4xf32>
    %30 = arith.truncf %29 : vector<18x18x4xf32> to vector<18x18x4xbf16>
    %c0_12 = arith.constant 0 : index
    %c0_13 = arith.constant 0 : index
    %c0_14 = arith.constant 0 : index
    %31 = vector.load %arg2[%c0_12, %c0_13, %c0_14] : memref<9x4x4xbf16, #tpu.memory_space<vmem>>, vector<9x4x4xbf16>
    %cst_15 = arith.constant 0.000000e+00 : f32
    %32 = vector.broadcast %cst_15 : f32 to vector<256x4xf32>
    %33 = vector.extract_strided_slice %30 {offsets = [0, 0, 0], sizes = [16, 16, 4], strides = [1, 1, 1]} : vector<18x18x4xbf16> to vector<16x16x4xbf16>
    %34 = vector.shape_cast %33 : vector<16x16x4xbf16> to vector<256x4xbf16>
    %35 = vector.extract_strided_slice %31 {offsets = [0, 0, 0], sizes = [1, 4, 4], strides = [1, 1, 1]} : vector<9x4x4xbf16> to vector<1x4x4xbf16>
    %36 = vector.shape_cast %35 : vector<1x4x4xbf16> to vector<4x4xbf16>
    %cst_16 = arith.constant dense<0.000000e+00> : vector<256x4xf32>
    %37 = tpu.matmul %34, %36, %cst_16 {dimension_numbers = #tpu.dot_dimension_numbers<[1], [0], [0], [1], [0, 0, 1, 1], [], []>} : vector<256x4xbf16>, vector<4x4xbf16>, vector<256x4xf32> -> vector<256x4xf32>
    %38 = arith.addf %32, %37 : vector<256x4xf32>
    %39 = vector.extract_strided_slice %30 {offsets = [0, 1, 0], sizes = [16, 16, 4], strides = [1, 1, 1]} : vector<18x18x4xbf16> to vector<16x16x4xbf16>
    %40 = vector.shape_cast %39 : vector<16x16x4xbf16> to vector<256x4xbf16>
    %41 = vector.extract_strided_slice %31 {offsets = [1, 0, 0], sizes = [1, 4, 4], strides = [1, 1, 1]} : vector<9x4x4xbf16> to vector<1x4x4xbf16>
    %42 = vector.shape_cast %41 : vector<1x4x4xbf16> to vector<4x4xbf16>
    %cst_17 = arith.constant dense<0.000000e+00> : vector<256x4xf32>
    %43 = tpu.matmul %40, %42, %cst_17 {dimension_numbers = #tpu.dot_dimension_numbers<[1], [0], [0], [1], [0, 0, 1, 1], [], []>} : vector<256x4xbf16>, vector<4x4xbf16>, vector<256x4xf32> -> vector<256x4xf32>
    %44 = arith.addf %38, %43 : vector<256x4xf32>
    %45 = vector.extract_strided_slice %30 {offsets = [0, 2, 0], sizes = [16, 16, 4], strides = [1, 1, 1]} : vector<18x18x4xbf16> to vector<16x16x4xbf16>
    %46 = vector.shape_cast %45 : vector<16x16x4xbf16> to vector<256x4xbf16>
    %47 = vector.extract_strided_slice %31 {offsets = [2, 0, 0], sizes = [1, 4, 4], strides = [1, 1, 1]} : vector<9x4x4xbf16> to vector<1x4x4xbf16>
    %48 = vector.shape_cast %47 : vector<1x4x4xbf16> to vector<4x4xbf16>
    %cst_18 = arith.constant dense<0.000000e+00> : vector<256x4xf32>
    %49 = tpu.matmul %46, %48, %cst_18 {dimension_numbers = #tpu.dot_dimension_numbers<[1], [0], [0], [1], [0, 0, 1, 1], [], []>} : vector<256x4xbf16>, vector<4x4xbf16>, vector<256x4xf32> -> vector<256x4xf32>
    %50 = arith.addf %44, %49 : vector<256x4xf32>
    %51 = vector.extract_strided_slice %30 {offsets = [1, 0, 0], sizes = [16, 16, 4], strides = [1, 1, 1]} : vector<18x18x4xbf16> to vector<16x16x4xbf16>
    %52 = vector.shape_cast %51 : vector<16x16x4xbf16> to vector<256x4xbf16>
    %53 = vector.extract_strided_slice %31 {offsets = [3, 0, 0], sizes = [1, 4, 4], strides = [1, 1, 1]} : vector<9x4x4xbf16> to vector<1x4x4xbf16>
    %54 = vector.shape_cast %53 : vector<1x4x4xbf16> to vector<4x4xbf16>
    %cst_19 = arith.constant dense<0.000000e+00> : vector<256x4xf32>
    %55 = tpu.matmul %52, %54, %cst_19 {dimension_numbers = #tpu.dot_dimension_numbers<[1], [0], [0], [1], [0, 0, 1, 1], [], []>} : vector<256x4xbf16>, vector<4x4xbf16>, vector<256x4xf32> -> vector<256x4xf32>
    %56 = arith.addf %50, %55 : vector<256x4xf32>
    %57 = vector.extract_strided_slice %30 {offsets = [1, 1, 0], sizes = [16, 16, 4], strides = [1, 1, 1]} : vector<18x18x4xbf16> to vector<16x16x4xbf16>
    %58 = vector.shape_cast %57 : vector<16x16x4xbf16> to vector<256x4xbf16>
    %59 = vector.extract_strided_slice %31 {offsets = [4, 0, 0], sizes = [1, 4, 4], strides = [1, 1, 1]} : vector<9x4x4xbf16> to vector<1x4x4xbf16>
    %60 = vector.shape_cast %59 : vector<1x4x4xbf16> to vector<4x4xbf16>
    %cst_20 = arith.constant dense<0.000000e+00> : vector<256x4xf32>
    %61 = tpu.matmul %58, %60, %cst_20 {dimension_numbers = #tpu.dot_dimension_numbers<[1], [0], [0], [1], [0, 0, 1, 1], [], []>} : vector<256x4xbf16>, vector<4x4xbf16>, vector<256x4xf32> -> vector<256x4xf32>
    %62 = arith.addf %56, %61 : vector<256x4xf32>
    %63 = vector.extract_strided_slice %30 {offsets = [1, 2, 0], sizes = [16, 16, 4], strides = [1, 1, 1]} : vector<18x18x4xbf16> to vector<16x16x4xbf16>
    %64 = vector.shape_cast %63 : vector<16x16x4xbf16> to vector<256x4xbf16>
    %65 = vector.extract_strided_slice %31 {offsets = [5, 0, 0], sizes = [1, 4, 4], strides = [1, 1, 1]} : vector<9x4x4xbf16> to vector<1x4x4xbf16>
    %66 = vector.shape_cast %65 : vector<1x4x4xbf16> to vector<4x4xbf16>
    %cst_21 = arith.constant dense<0.000000e+00> : vector<256x4xf32>
    %67 = tpu.matmul %64, %66, %cst_21 {dimension_numbers = #tpu.dot_dimension_numbers<[1], [0], [0], [1], [0, 0, 1, 1], [], []>} : vector<256x4xbf16>, vector<4x4xbf16>, vector<256x4xf32> -> vector<256x4xf32>
    %68 = arith.addf %62, %67 : vector<256x4xf32>
    %69 = vector.extract_strided_slice %30 {offsets = [2, 0, 0], sizes = [16, 16, 4], strides = [1, 1, 1]} : vector<18x18x4xbf16> to vector<16x16x4xbf16>
    %70 = vector.shape_cast %69 : vector<16x16x4xbf16> to vector<256x4xbf16>
    %71 = vector.extract_strided_slice %31 {offsets = [6, 0, 0], sizes = [1, 4, 4], strides = [1, 1, 1]} : vector<9x4x4xbf16> to vector<1x4x4xbf16>
    %72 = vector.shape_cast %71 : vector<1x4x4xbf16> to vector<4x4xbf16>
    %cst_22 = arith.constant dense<0.000000e+00> : vector<256x4xf32>
    %73 = tpu.matmul %70, %72, %cst_22 {dimension_numbers = #tpu.dot_dimension_numbers<[1], [0], [0], [1], [0, 0, 1, 1], [], []>} : vector<256x4xbf16>, vector<4x4xbf16>, vector<256x4xf32> -> vector<256x4xf32>
    %74 = arith.addf %68, %73 : vector<256x4xf32>
    %75 = vector.extract_strided_slice %30 {offsets = [2, 1, 0], sizes = [16, 16, 4], strides = [1, 1, 1]} : vector<18x18x4xbf16> to vector<16x16x4xbf16>
    %76 = vector.shape_cast %75 : vector<16x16x4xbf16> to vector<256x4xbf16>
    %77 = vector.extract_strided_slice %31 {offsets = [7, 0, 0], sizes = [1, 4, 4], strides = [1, 1, 1]} : vector<9x4x4xbf16> to vector<1x4x4xbf16>
    %78 = vector.shape_cast %77 : vector<1x4x4xbf16> to vector<4x4xbf16>
    %cst_23 = arith.constant dense<0.000000e+00> : vector<256x4xf32>
    %79 = tpu.matmul %76, %78, %cst_23 {dimension_numbers = #tpu.dot_dimension_numbers<[1], [0], [0], [1], [0, 0, 1, 1], [], []>} : vector<256x4xbf16>, vector<4x4xbf16>, vector<256x4xf32> -> vector<256x4xf32>
    %80 = arith.addf %74, %79 : vector<256x4xf32>
    %81 = vector.extract_strided_slice %30 {offsets = [2, 2, 0], sizes = [16, 16, 4], strides = [1, 1, 1]} : vector<18x18x4xbf16> to vector<16x16x4xbf16>
    %82 = vector.shape_cast %81 : vector<16x16x4xbf16> to vector<256x4xbf16>
    %83 = vector.extract_strided_slice %31 {offsets = [8, 0, 0], sizes = [1, 4, 4], strides = [1, 1, 1]} : vector<9x4x4xbf16> to vector<1x4x4xbf16>
    %84 = vector.shape_cast %83 : vector<1x4x4xbf16> to vector<4x4xbf16>
    %cst_24 = arith.constant dense<0.000000e+00> : vector<256x4xf32>
    %85 = tpu.matmul %82, %84, %cst_24 {dimension_numbers = #tpu.dot_dimension_numbers<[1], [0], [0], [1], [0, 0, 1, 1], [], []>} : vector<256x4xbf16>, vector<4x4xbf16>, vector<256x4xf32> -> vector<256x4xf32>
    %86 = arith.addf %80, %85 : vector<256x4xf32>
    %c0_25 = arith.constant 0 : index
    %c0_26 = arith.constant 0 : index
    %87 = vector.load %arg4[%c0_25, %c0_26] : memref<4x4xf32, #tpu.memory_space<vmem>>, vector<4x4xf32>
    %88 = vector.extract_strided_slice %87 {offsets = [0, 0], sizes = [1, 4], strides = [1, 1]} : vector<4x4xf32> to vector<1x4xf32>
    %89 = vector.shape_cast %88 : vector<1x4xf32> to vector<4xf32>
    %90 = vector.extract_strided_slice %87 {offsets = [1, 0], sizes = [1, 4], strides = [1, 1]} : vector<4x4xf32> to vector<1x4xf32>
    %91 = vector.shape_cast %90 : vector<1x4xf32> to vector<4xf32>
    %92 = vector.extract_strided_slice %87 {offsets = [2, 0], sizes = [1, 4], strides = [1, 1]} : vector<4x4xf32> to vector<1x4xf32>
    %93 = vector.shape_cast %92 : vector<1x4xf32> to vector<4xf32>
    %94 = vector.extract_strided_slice %87 {offsets = [3, 0], sizes = [1, 4], strides = [1, 1]} : vector<4x4xf32> to vector<1x4xf32>
    %95 = vector.shape_cast %94 : vector<1x4xf32> to vector<4xf32>
    %96 = vector.extract_strided_slice %1 {offsets = [1, 1, 0], sizes = [16, 16, 4], strides = [1, 1, 1]} : vector<18x18x4xf32> to vector<16x16x4xf32>
    %97 = vector.shape_cast %96 : vector<16x16x4xf32> to vector<256x4xf32>
    %98 = vector.shape_cast %89 : vector<4xf32> to vector<1x4xf32>
    %99 = vector.broadcast %98 : vector<1x4xf32> to vector<256x4xf32>
    %100 = arith.mulf %86, %99 : vector<256x4xf32>
    %101 = vector.shape_cast %91 : vector<4xf32> to vector<1x4xf32>
    %102 = vector.broadcast %101 : vector<1x4xf32> to vector<256x4xf32>
    %103 = arith.addf %100, %102 : vector<256x4xf32>
    %104 = arith.addf %103, %97 : vector<256x4xf32>
    %cst_27 = arith.constant 0.000000e+00 : f32
    %105 = vector.broadcast %cst_27 : f32 to vector<256x4xf32>
    %106 = arith.cmpf ogt, %104, %105 : vector<256x4xf32>
    %107 = vector.shape_cast %93 : vector<4xf32> to vector<1x4xf32>
    %108 = vector.broadcast %107 : vector<1x4xf32> to vector<256x4xf32>
    %109 = arith.mulf %108, %104 : vector<256x4xf32>
    %110 = arith.select %106, %104, %109 : vector<256x4xi1>, vector<256x4xf32>
    %111 = vector.shape_cast %95 : vector<4xf32> to vector<1x4xf32>
    %112 = vector.broadcast %111 : vector<1x4xf32> to vector<256x4xf32>
    %113 = arith.addf %110, %112 : vector<256x4xf32>
    %114 = vector.shape_cast %113 : vector<256x4xf32> to vector<16x16x4xf32>
    %c0_28 = arith.constant 0 : index
    %c0_29 = arith.constant 0 : index
    %c0_30 = arith.constant 0 : index
    %c0_31 = arith.constant 0 : index
    %115 = vector.load %arg5[%c0_28, %c0_29, %c0_30, %c0_31] : memref<1x16x16x4xf32, #tpu.memory_space<vmem>>, vector<1x16x16x4xf32>
    %116 = vector.shape_cast %115 : vector<1x16x16x4xf32> to vector<16x16x4xf32>
    %117 = vector.shape_cast %114 : vector<16x16x4xf32> to vector<1x16x16x4xf32>
    tpu.vector_store %arg5[%c0_28, %c0_29, %c0_30, %c0_31], %117 {strides = array<i32>} : memref<1x16x16x4xf32, #tpu.memory_space<vmem>>, vector<1x16x16x4xf32>,
    return
  }
  func.func @transform_0(%arg0: i32) -> (i32, i32, i32, i32) {
    %c0_i32 = arith.constant 0 : i32
    %c0_i32_0 = arith.constant 0 : i32
    %c0_i32_1 = arith.constant 0 : i32
    %c0_i32_2 = arith.constant 0 : i32
    return %arg0, %c0_i32, %c0_i32_0, %c0_i32_1 : i32, i32, i32, i32
  }
  func.func @transform_1(%arg0: i32) -> (i32, i32, i32) {
    %c0_i32 = arith.constant 0 : i32
    %c0_i32_0 = arith.constant 0 : i32
    %c0_i32_1 = arith.constant 0 : i32
    %c0_i32_2 = arith.constant 0 : i32
    return %c0_i32, %c0_i32_0, %c0_i32_1 : i32, i32, i32
  }
  func.func @transform_2(%arg0: i32) -> (i32, i32) {
    %c0_i32 = arith.constant 0 : i32
    %c0_i32_0 = arith.constant 0 : i32
    %c0_i32_1 = arith.constant 0 : i32
    return %c0_i32, %c0_i32_0 : i32, i32
  }
  func.func @transform_3(%arg0: i32) -> (i32, i32) {
    %c0_i32 = arith.constant 0 : i32
    %c0_i32_0 = arith.constant 0 : i32
    %c0_i32_1 = arith.constant 0 : i32
    return %c0_i32, %c0_i32_0 : i32, i32
  }
  func.func @transform_4(%arg0: i32) -> (i32, i32, i32, i32) {
    %c0_i32 = arith.constant 0 : i32
    %c0_i32_0 = arith.constant 0 : i32
    %c0_i32_1 = arith.constant 0 : i32
    %c0_i32_2 = arith.constant 0 : i32
    return %arg0, %c0_i32, %c0_i32_0, %c0_i32_1 : i32, i32, i32, i32
  }
}

</mosaic_0001>

<bundles_post_ra>
// kernel: basic_block1_forward.1
= control target key start
LH: loop header
LB: loop body
LE: loop exit
PB: predicated region body
PF: predicated region fallthrough
CT: control target
= control target key end

     0   :  { %s3414_s15 = smov 0   ;;  %s4991_s0 = inlined_call_operand.vmem [shape: f32[2,18,18,4], index: 0, kind: input, shape index: {}]   ;;  %s4992_s1 = inlined_call_operand.vmem [shape: bf16[9,4,4], index: 1, kind: input, shape index: {}]   ;;  %s4993_s2 = inlined_call_operand.vmem [shape: f32[1,4], index: 2, kind: input, shape index: {}]   ;;  %s4994_s3 = inlined_call_operand.vmem [shape: f32[4,4], index: 3, kind: input, shape index: {}]   ;;  %s4995_s4 = inlined_call_operand.vmem [shape: f32[2,16,16,4], index: 4, kind: output, shape index: {}]  }
   0x1 LB: > { %s3139_s16 = sadd.s32 4294967295, %s3384_s15   ;;  %p3143_p0 = scmp.ge.s32.totalorder %s3384_s15, 1  ;;  %s3384_s15 = sphi %s3414_s15, %s14_s15  }
   0x2   : > { %p162_p1 = scmp.lt.s32.totalorder %s3384_s15, 3 }
   0x4   : > { %p163_p2 = pnand %p3143_p0, %p162_p1 }
   0x6   : > { %166 = sbr.rel (%p163_p2) target bundleno = 836 (0x344), region = 36 }
   0xb   : > { %v658_v0 = vld [vmem:[%s4992_s1 + $0x2] sm:$0x3]  ;;  %vm1150_vm0 = vcmask 1041408   ;;  %p188_p3 = scmp.lt.s32.totalorder %s3139_s16, 1  ;;  %v527_v1 = vlaneseq  ;;  %v3434_v4 = vld [vmem:[%s4993_s2] ss:$0 sm:$0xff] }
   0xc   : > { %v1152_v2 = vsel %vm1150_vm0, %v658_v0, 0  ;;  %v3386_v6 = vmov 0   ;;  %vm666_vm7 = vsmask.f32 3328  ;;  %vm667_vm8 = vsmask.f32 7440 }
   0xd   : > { %3312 = vmatpush.bf16.msra.mxu1 %v1152_v2  ;;  %3313 = vmatpush.bf16.msra.mxu2 %v1152_v2  ;;  %s5185_s16 = smov (!%p188_p3, %s3139_s16), 1  ;;  %v3428_v3 = vshrl.u32 %v527_v1, 7  ;;  %v3444_v7 = vrot.slane %v3386_v6, 4  ;;  %v3446_v8 = vrot.slane %v3386_v6, 5  ;;  %v4996_v22 = vmov 0.0  }
   0xe   : > { %3314 = vmatpush.bf16.msra.mxu3 %v1152_v2  ;;  %1161 = vmatpush.bf16.msra.mxu0 %v1152_v2  ;;  %s3315_s19 = smul.u32 432, %s5185_s16  ;;  %s3311_s23 = sshll.u32 %s5185_s16, 8 }
   0xf   : > { %5060 = vst [vmem:[#allocation2_spill] sm:$0xff] %v3428_v3  ;;  %v3437_v5 = vadd.s32 16, %v3428_v3  ;;  %vm531_vm1 = vcmp.ge.s32.totalorder %v3428_v3, 1  ;;  %v676_v21 = vor.u32 %v3446_v8, %v3444_v7  ;;  %v662_v3 = vld [vmem:[%s4992_s1 + $0xa] sm:$0x3]  ;;  %s4637_s16 = scalar_lea.vmem %s4995_s4, %s3311_s23 }
  0x10   : > { %s3442_s24 = scalar_lea.vmem %s4991_s0, %s3315_s19 }
  0x11   : > { %5061 = vst [vmem:[#allocation3_spill] sm:$0xff] %v3437_v5  ;;  %v211_v9 = vld [vmem:[%s3442_s24 + $0x60] sm:$0xff]  ;;  %v212_v10 = vld [vmem:[%s3442_s24 + $0x68] sm:$0xff]  ;;  %v213_v11 = vld [vmem:[%s3442_s24 + $0x70] sm:$0x3]  ;;  %vm542_vm2 = vcmp.lt.s32.totalorder %v3437_v5, 17 }
  0x12   : > { %v269_v12 = vadd.f32 %v3434_v4, %v211_v9  ;;  %v270_v13 = vadd.f32 %v3434_v4, %v212_v10  ;;  %v271_v14 = vadd.f32 %v3434_v4, %v213_v11  ;;  %v223_v15 = vld [vmem:[%s3442_s24 + $0xc0] sm:$0xff]  ;;  %v224_v16 = vld [vmem:[%s3442_s24 + $0xc8] sm:$0xff]  ;;  %v225_v17 = vld [vmem:[%s3442_s24 + $0xd0] sm:$0x3] }
  0x13   : > { %v281_v18 = vadd.f32 %v3434_v4, %v223_v15  ;;  %v282_v19 = vadd.f32 %v3434_v4, %v224_v16  ;;  %v283_v20 = vadd.f32 %v3434_v4, %v225_v17  ;;  %v235_v47 = vld [vmem:[%s3442_s24 + $0x120] sm:$0xff]  ;;  %v236_v48 = vld [vmem:[%s3442_s24 + $0x128] sm:$0xff]  ;;  %v237_v57 = vld [vmem:[%s3442_s24 + $0x130] sm:$0x3] }
  0x14   : > { %vm323_vm3 = vcmp.gt.f32.partialorder %v269_v12, 0.0  ;;  %vm324_vm4 = vcmp.gt.f32.partialorder %v270_v13, 0.0  ;;  %vm325_vm5 = vcmp.gt.f32.partialorder %v271_v14, 0.0  ;;  %vm377_vm6 = vcmp.lt.f32.partialorder %v269_v12, 0.0 }
  0x15   : > { %vm378_vm9 = vcmp.lt.f32.partialorder %v270_v13, 0.0  ;;  %vm379_vm10 = vcmp.lt.f32.partialorder %v271_v14, 0.0  ;;  %v431_v23 = vsel %vm377_vm6, -1.0, %v4996_v22  ;;  %vm335_vm11 = vcmp.gt.f32.partialorder %v281_v18, 0.0 }
  0x16   : > { %v432_v24 = vsel %vm378_vm9, -1.0, %v4996_v22  ;;  %v433_v25 = vsel %vm379_vm10, -1.0, %v4996_v22  ;;  %v485_v26 = vsel %vm323_vm3, 1.0, %v431_v23  ;;  %vm336_vm12 = vcmp.gt.f32.partialorder %v282_v19, 0.0 }
  0x17   : > { %v486_v27 = vsel %vm324_vm4, 1.0, %v432_v24  ;;  %v487_v28 = vsel %vm325_vm5, 1.0, %v433_v25  ;;  %v561_v29 = vsel %vm531_vm1, %v485_v26, 0.0  ;;  %vm337_vm13 = vcmp.gt.f32.partialorder %v283_v20, 0.0  ;;  %vm3499_vm5 = vmor %vm666_vm7, %vm667_vm8 }
  0x18   : > { %v563_v30 = vsel %vm542_vm2, %v487_v28, 0.0  ;;  %v3471_v31 = vpack.c.bf16 %v561_v29, %v561_v29  ;;  %v3473_v32 = vpack.c.bf16 %v486_v27, %v486_v27  ;;  %vm389_vm14 = vcmp.lt.f32.partialorder %v281_v18, 0.0 }
  0x19   : > { %v3475_v33 = vpack.c.bf16 %v563_v30, %v563_v30  ;;  %vm390_vm15 = vcmp.lt.f32.partialorder %v282_v19, 0.0  ;;  %vm391_vm3 = vcmp.lt.f32.partialorder %v283_v20, 0.0  ;;  %v443_v34 = vsel %vm389_vm14, -1.0, %v4996_v22 }
  0x1a   : > { %v766_v35 = vshrl.u32 %v3471_v31, 16  ;;  %v769_v36 = vshll.u32 %v3471_v31, 16  ;;  %v775_v37 = vshll.u32 %v3473_v32, 16  ;;  %v779_v38 = vshrl.u32 %v3473_v32, 16 }
  0x1b   : > { %v785_v39 = vshll.u32 %v3475_v33, 16  ;;  %v444_v40 = vsel %vm390_vm15, -1.0, %v4996_v22  ;;  %v445_v41 = vsel %vm391_vm3, -1.0, %v4996_v22  ;;  %v497_v42 = vsel %vm335_vm11, 1.0, %v443_v34 }
  0x1c   : > { %v768_v43 = vrot.slane %v766_v35, 4  ;;  %v771_v44 = vrot.slane %v769_v36, 5  ;;  %v777_v45 = vrot.slane %v775_v37, 5  ;;  %v781_v46 = vrot.slane %v779_v38, 4  ;;  %v659_v35 = vld [vmem:[%s4992_s1 + $0x4] sm:$0x3] }
  0x1d   : > { %vm1101_vm4 = vcmask 31744   ;;  %v787_v49 = vrot.slane %v785_v39, 5  ;;  %v498_v50 = vsel %vm336_vm12, 1.0, %v444_v40  ;;  %v499_v51 = vsel %vm337_vm13, 1.0, %v445_v41  ;;  %v660_v40 = vld [vmem:[%s4992_s1 + $0x6] sm:$0x3] }
  0x1e   : > { %v573_v52 = vsel %vm531_vm1, %v497_v42, 0.0  ;;  %v772_v53 = vor.u32 %v771_v44, %v768_v43  ;;  %v782_v54 = vor.u32 %v781_v46, %v777_v45  ;;  %v575_v55 = vsel %vm542_vm2, %v499_v51, 0.0 }
  0x1f   : > { %v3494_v56 = vpack.c.bf16 %v573_v52, %v573_v52  ;;  %v3503_v59 = vpack.c.bf16 %v498_v50, %v498_v50  ;;  %v3505_v60 = vpack.c.bf16 %v575_v55, %v575_v55  ;;  %v293_v61 = vadd.f32 %v3434_v4, %v235_v47 }
  0x20   : > { %v294_v62 = vadd.f32 %v3434_v4, %v236_v48  ;;  %v773_v63 = vrot.slane %v772_v53, 4  ;;  %v783_v0 = vrot.slane %v782_v54, 4  ;;  %v295_v11 = vadd.f32 %v3434_v4, %v237_v57  ;;  %v214_v54 = vld [vmem:[%s3442_s24 + $0x78] sm:$0xff] }
  0x21   : > { %v862_v1 = vshrl.u32 %v3494_v56, 16  ;;  %v865_v2 = vshll.u32 %v3494_v56, 16  ;;  %v871_v6 = vshll.u32 %v3503_v59, 16  ;;  %v875_v9 = vshrl.u32 %v3503_v59, 16 }
  0x22   : > { %v881_v10 = vshll.u32 %v3505_v60, 16  ;;  %v778_v12 = vsel %vm3499_vm5, %v773_v63, %v777_v45  ;;  %v788_v13 = vsel %vm3499_vm5, %v783_v0, %v787_v49  ;;  %vm347_vm6 = vcmp.gt.f32.partialorder %v293_v61, 0.0  ;;  %v657_v49 = vld [vmem:[%s4992_s1] sm:$0x3]  ;;  %v661_v63 = vld [vmem:[%s4992_s1 + $0x8] sm:$0x3] }
  0x23   : > { %v864_v14 = vrot.slane %v862_v1, 4  ;;  %v867_v15 = vrot.slane %v865_v2, 5  ;;  %v1061_v16 = vunpack.c.l.b16 %v778_v12  ;;  %v1062_v17 = vunpack.c.l.b16 %v788_v13  ;;  %v215_v0 = vld [vmem:[%s3442_s24 + $0x80] sm:$0xff] }
  0x24   : > { %v873_v18 = vrot.slane %v871_v6, 5  ;;  %v877_v19 = vrot.slane %v875_v9, 4  ;;  %v883_v23 = vrot.slane %v881_v10, 5  ;;  %vm348_vm7 = vcmp.gt.f32.partialorder %v294_v62, 0.0  ;;  %v216_v6 = vld [vmem:[%s3442_s24 + $0x88] sm:$0x3] }
  0x25   : > { %v868_v20 = vor.u32 %v867_v15, %v864_v14  ;;  %v3519_v24 = vpack.c.b16 %v1062_v17, %v1061_v16  ;;  %vm349_vm8 = vcmp.gt.f32.partialorder %v295_v11, 0.0  ;;  %vm401_vm9 = vcmp.lt.f32.partialorder %v293_v61, 0.0  ;;  %v226_v9 = vld [vmem:[%s3442_s24 + $0xd8] sm:$0xff] }
  0x26   : > { %v878_v25 = vor.u32 %v877_v19, %v873_v18  ;;  %vm402_vm10 = vcmp.lt.f32.partialorder %v294_v62, 0.0  ;;  %vm403_vm11 = vcmp.lt.f32.partialorder %v295_v11, 0.0  ;;  %v455_v27 = vsel %vm401_vm9, -1.0, %v4996_v22 }
  0x27   : > { %v869_v26 = vrot.slane %v868_v20, 4  ;;  %3151 = vmatmul.msk.bf16.vlgmr.msra.gmra.mxu1 %vm1101_vm4, %v3519_v24  ;;  %v456_v29 = vsel %vm402_vm10, -1.0, %v4996_v22  ;;  %v457_v30 = vsel %vm403_vm11, -1.0, %v4996_v22  ;;  %v509_v34 = vsel %vm347_vm6, 1.0, %v455_v27 }
  0x28   : > { %v879_v28 = vrot.slane %v878_v25, 4  ;;  %v510_v37 = vsel %vm348_vm7, 1.0, %v456_v29  ;;  %v511_v38 = vsel %vm349_vm8, 1.0, %v457_v30  ;;  %v585_v39 = vsel %vm531_vm1, %v509_v34, 0.0  ;;  %v227_v30 = vld [vmem:[%s3442_s24 + $0xe0] sm:$0xff] }
  0x29   : > { %v874_v36 = vsel %vm3499_vm5, %v869_v26, %v873_v18  ;;  %v587_v43 = vsel %vm542_vm2, %v511_v38, 0.0  ;;  %v3541_v44 = vpack.c.bf16 %v585_v39, %v585_v39  ;;  %v3543_v46 = vpack.c.bf16 %v510_v37, %v510_v37  ;;  %v228_v34 = vld [vmem:[%s3442_s24 + $0xe8] sm:$0x3] }
  0x2a   : > { %v884_v41 = vsel %vm3499_vm5, %v879_v28, %v883_v23  ;;  %v1069_v42 = vunpack.c.l.b16 %v874_v36  ;;  %v3545_v47 = vpack.c.bf16 %v587_v43, %v587_v43  ;;  %v1691_v48 = vsel %vm1150_vm0, %v659_v35, 0 }
  0x2b   : > { %5064 = vst [vmem:[#allocation4_spill] sm:$0xff] %v3541_v44  ;;  %v1070_v45 = vunpack.c.l.b16 %v884_v41  ;;  %v958_v50 = vshrl.u32 %v3541_v44, 16  ;;  %v961_v51 = vshll.u32 %v3541_v44, 16  ;;  %1700 = vmatpush.bf16.msrb.mxu2 %v1691_v48  ;;  %v677_v52 = vrot.slane %v676_v21, 4  ;;  %v209_v44 = vld [vmem:[%s3442_s24 + $0x50] sm:$0xff] }
  0x2c   : > { %5065 = vst [vmem:[#allocation5_spill] sm:$0xff] %v3543_v46  ;;  %v1823_v53 = vsel %vm1150_vm0, %v660_v40, 0  ;;  %v967_v57 = vshll.u32 %v3543_v46, 16  ;;  %v971_v61 = vshrl.u32 %v3543_v46, 16  ;;  %v977_v62 = vshll.u32 %v3545_v47, 16 }
  0x2d   : > { %5066 = vst [vmem:[#allocation6_spill] sm:$0xff] %v3545_v47  ;;  %v3558_v55 = vpack.c.b16 %v1070_v45, %v1069_v42  ;;  %1832 = vmatpush.bf16.msrb.mxu3 %v1823_v53  ;;  %v960_v7 = vrot.slane %v958_v50, 4  ;;  %v963_v1 = vrot.slane %v961_v51, 5  ;;  %v682_v21 = vsel %vm3499_vm5, %v677_v52, %v3446_v8 }
  0x2e   : > { %v1372_v2 = vsel %vm1150_vm0, %v657_v49, 0  ;;  %v969_v10 = vrot.slane %v967_v57, 5  ;;  %v973_v11 = vrot.slane %v971_v61, 4  ;;  %v979_v12 = vrot.slane %v977_v62, 5 }
  0x2f   : > { %5067 = vst [vmem:[#allocation7_spill] sm:$0xff] %v3558_v55  ;;  %3155 = vmatmul.msk.bf16.vlgmr.msra.gmra.mxu2 %vm1101_vm4, %v3558_v55  ;;  %v1053_v13 = vunpack.c.l.b16 %v682_v21  ;;  %1381 = vmatpush.bf16.msrb.mxu1 %v1372_v2  ;;  %v964_v14 = vor.u32 %v963_v1, %v960_v7  ;;  %v1977_v15 = vsel %vm1150_vm0, %v661_v63, 0  ;;  %v272_v16 = vadd.f32 %v3434_v4, %v214_v54 }
  0x30   : > { %v273_v17 = vadd.f32 %v3434_v4, %v215_v0  ;;  %v974_v8 = vor.u32 %v973_v11, %v969_v10  ;;  %1986 = vmatpush.bf16.msrb.mxu0 %v1977_v15  ;;  %v274_v19 = vadd.f32 %v3434_v4, %v216_v6  ;;  %v284_v20 = vadd.f32 %v3434_v4, %v226_v9 }
  0x31   : > { %v3578_v18 = vpack.c.b16 %v1053_v13, %v1053_v13  ;;  %v965_v23 = vrot.slane %v964_v14, 4  ;;  %vm326_vm12 = vcmp.gt.f32.partialorder %v272_v16, 0.0  ;;  %vm380_vm14 = vcmp.lt.f32.partialorder %v272_v16, 0.0  ;;  %v239_v13 = vld [vmem:[%s3442_s24 + $0x140] sm:$0xff] }
  0x32   : > { %vm327_vm13 = vcmp.gt.f32.partialorder %v273_v17, 0.0  ;;  %v975_v25 = vrot.slane %v974_v8, 4  ;;  %vm328_vm15 = vcmp.gt.f32.partialorder %v274_v19, 0.0  ;;  %vm381_vm3 = vcmp.lt.f32.partialorder %v273_v17, 0.0 }
  0x33   : > { %5068 = vst [vmem:[#allocation8_spill] sm:$0xff] %v3578_v18  ;;  %3147 = vmatmul.msk.bf16.vlgmr.msra.gmra.mxu0 %vm1101_vm4, %v3578_v18  ;;  %vm382_vm6 = vcmp.lt.f32.partialorder %v274_v19, 0.0  ;;  %v970_v26 = vsel %vm3499_vm5, %v965_v23, %v969_v10  ;;  %v434_v27 = vsel %vm380_vm14, -1.0, %v4996_v22  ;;  %v435_v28 = vsel %vm381_vm3, -1.0, %v4996_v22 }
  0x34   : > { %v436_v29 = vsel %vm382_vm6, -1.0, %v4996_v22  ;;  %v980_v35 = vsel %vm3499_vm5, %v975_v25, %v979_v12  ;;  %v1077_v36 = vunpack.c.l.b16 %v970_v26  ;;  %v488_v37 = vsel %vm326_vm12, 1.0, %v434_v27  ;;  %v238_v12 = vld [vmem:[%s3442_s24 + $0x138] sm:$0xff]  ;;  %v240_v27 = vld [vmem:[%s3442_s24 + $0x148] sm:$0x3] }
  0x35   : > { %v489_v38 = vsel %vm327_vm13, 1.0, %v435_v28  ;;  %v1078_v39 = vunpack.c.l.b16 %v980_v35  ;;  %v490_v40 = vsel %vm328_vm15, 1.0, %v436_v29  ;;  %v564_v41 = vsel %vm531_vm1, %v488_v37, 0.0 }
  0x36   : > { %v3597_v42 = vpack.c.bf16 %v489_v38, %v489_v38  ;;  %v566_v43 = vsel %vm542_vm2, %v490_v40, 0.0  ;;  %v3601_v45 = vpack.c.bf16 %v564_v41, %v564_v41  ;;  %v285_v48 = vadd.f32 %v3434_v4, %v227_v30 }
  0x37   : > { %v286_v49 = vadd.f32 %v3434_v4, %v228_v34  ;;  %v3605_v50 = vpack.c.b16 %v1078_v39, %v1077_v36  ;;  %v3607_v51 = vpack.c.bf16 %v566_v43, %v566_v43  ;;  %vm338_vm7 = vcmp.gt.f32.partialorder %v284_v20, 0.0 }
  0x38   : > { %v799_v52 = vshll.u32 %v3597_v42, 16  ;;  %v803_v53 = vshrl.u32 %v3597_v42, 16  ;;  %v790_v54 = vshrl.u32 %v3601_v45, 16  ;;  %v793_v57 = vshll.u32 %v3601_v45, 16 }
  0x39   : > { %5069 = vst [vmem:[#allocation9_spill] sm:$0xff] %v3605_v50  ;;  %vm339_vm8 = vcmp.gt.f32.partialorder %v285_v48, 0.0  ;;  %3159 = vmatmul.msk.bf16.vlgmr.msra.gmra.mxu3 %vm1101_vm4, %v3605_v50  ;;  %v809_v63 = vshll.u32 %v3607_v51, 16  ;;  %vm340_vm9 = vcmp.gt.f32.partialorder %v286_v49, 0.0  ;;  %vm392_vm10 = vcmp.lt.f32.partialorder %v284_v20, 0.0  ;;  %v245_v50 = vld [vmem:[%s3442_s24 + $0x170] sm:$0xff] }
  0x3a   : > { %v801_v61 = vrot.slane %v799_v52, 5  ;;  %v805_v62 = vrot.slane %v803_v53, 4  ;;  %v792_v0 = vrot.slane %v790_v54, 4  ;;  %v795_v7 = vrot.slane %v793_v57, 5 }
  0x3b   : > { %vm393_vm11 = vcmp.lt.f32.partialorder %v285_v48, 0.0  ;;  %v811_v21 = vrot.slane %v809_v63, 5  ;;  %vm394_vm12 = vcmp.lt.f32.partialorder %v286_v49, 0.0  ;;  %v446_v2 = vsel %vm392_vm10, -1.0, %v4996_v22 }
  0x3c   : > { %v806_v1 = vor.u32 %v805_v62, %v801_v61  ;;  %v796_v6 = vor.u32 %v795_v7, %v792_v0  ;;  %v447_v9 = vsel %vm393_vm11, -1.0, %v4996_v22  ;;  %v448_v10 = vsel %vm394_vm12, -1.0, %v4996_v22 }
  0x3d   : > { %v500_v11 = vsel %vm338_vm7, 1.0, %v446_v2  ;;  %v501_v15 = vsel %vm339_vm8, 1.0, %v447_v9  ;;  %v502_v16 = vsel %vm340_vm9, 1.0, %v448_v10  ;;  %v296_v28 = vadd.f32 %v3434_v4, %v238_v12 }
  0x3e   : > { %v807_v14 = vrot.slane %v806_v1, 4  ;;  %v576_v17 = vsel %vm531_vm1, %v500_v11, 0.0  ;;  %v797_v8 = vrot.slane %v796_v6, 4  ;;  %v578_v19 = vsel %vm542_vm2, %v502_v16, 0.0  ;;  %v204_v16 = vld [vmem:[%s3442_s24 + $0x28] sm:$0x3] }
  0x3f   : > { %v3628_v23 = vpack.c.bf16 %v576_v17, %v576_v17  ;;  %v3630_v25 = vpack.c.bf16 %v501_v15, %v501_v15  ;;  %v3634_v26 = vpack.c.bf16 %v578_v19, %v578_v19  ;;  %v297_v29 = vadd.f32 %v3434_v4, %v239_v13  ;;  %v203_v15 = vld [vmem:[%s3442_s24 + $0x20] sm:$0xff] }
  0x40   : > { %v812_v20 = vsel %vm3499_vm5, %v807_v14, %v811_v21  ;;  %v802_v30 = vsel %vm3499_vm5, %v797_v8, %v801_v61  ;;  %v298_v48 = vadd.f32 %v3434_v4, %v240_v27  ;;  %vm350_vm13 = vcmp.gt.f32.partialorder %v296_v28, 0.0  ;;  %v202_v21 = vld [vmem:[%s3442_s24 + $0x18] sm:$0xff] }
  0x41   : > { %v1064_v34 = vunpack.c.l.b16 %v812_v20  ;;  %v886_v35 = vshrl.u32 %v3628_v23, 16  ;;  %v889_v36 = vshll.u32 %v3628_v23, 16  ;;  %v1063_v37 = vunpack.c.l.b16 %v802_v30 }
  0x42   : > { %v895_v38 = vshll.u32 %v3630_v25, 16  ;;  %v899_v39 = vshrl.u32 %v3630_v25, 16  ;;  %v905_v40 = vshll.u32 %v3634_v26, 16  ;;  %vm351_vm14 = vcmp.gt.f32.partialorder %v297_v29, 0.0 }
  0x43   : > { %v888_v41 = vrot.slane %v886_v35, 4  ;;  %v891_v43 = vrot.slane %v889_v36, 5  ;;  %v3647_v49 = vpack.c.b16 %v1064_v34, %v1063_v37  ;;  %vm352_vm15 = vcmp.gt.f32.partialorder %v298_v48, 0.0 }
  0x44   : > { %v897_v52 = vrot.slane %v895_v38, 5  ;;  %v901_v53 = vrot.slane %v899_v39, 4  ;;  %v907_v54 = vrot.slane %v905_v40, 5  ;;  %vm404_vm3 = vcmp.lt.f32.partialorder %v296_v28, 0.0 }
  0x45   : > { %v892_v57 = vor.u32 %v891_v43, %v888_v41  ;;  %3152 = vmatmul.msk.bf16.gmra.mxu1 %vm1101_vm4, %v3647_v49  ;;  %vm405_vm6 = vcmp.lt.f32.partialorder %v297_v29, 0.0  ;;  %vm406_vm7 = vcmp.lt.f32.partialorder %v298_v48, 0.0  ;;  %v458_v62 = vsel %vm404_vm3, -1.0, %v4996_v22 }
  0x46   : > { %v902_v61 = vor.u32 %v901_v53, %v897_v52  ;;  %v459_v0 = vsel %vm405_vm6, -1.0, %v4996_v22  ;;  %v460_v7 = vsel %vm406_vm7, -1.0, %v4996_v22  ;;  %v512_v1 = vsel %vm350_vm13, 1.0, %v458_v62 }
  0x47   : > { %v893_v63 = vrot.slane %v892_v57, 4  ;;  %v513_v6 = vsel %vm351_vm14, 1.0, %v459_v0  ;;  %v514_v9 = vsel %vm352_vm15, 1.0, %v460_v7  ;;  %v588_v10 = vsel %vm531_vm1, %v512_v1, 0.0 }
  0x48   : > { %v903_v2 = vrot.slane %v902_v61, 4  ;;  %v590_v12 = vsel %vm542_vm2, %v514_v9, 0.0  ;;  %v3662_v13 = vpack.c.bf16 %v588_v10, %v588_v10  ;;  %v3664_v14 = vpack.c.bf16 %v513_v6, %v513_v6  ;;  %v217_v61 = vld [vmem:[%s3442_s24 + $0x90] sm:$0xff] }
  0x49   : > { %v898_v11 = vsel %vm3499_vm5, %v893_v63, %v897_v52  ;;  %v3670_v19 = vpack.c.bf16 %v590_v12, %v590_v12  ;;  %v260_v20 = vadd.f32 %v3434_v4, %v202_v21  ;;  %v261_v36 = vadd.f32 %v3434_v4, %v203_v15  ;;  %v218_v12 = vld [vmem:[%s3442_s24 + $0x98] sm:$0xff]  ;;  %v219_v15 = vld [vmem:[%s3442_s24 + $0xa0] sm:$0x3] }
  0x4a   : > { %5070 = vst [vmem:[#allocation10_spill] sm:$0xff] %v3662_v13  ;;  %v908_v17 = vsel %vm3499_vm5, %v903_v2, %v907_v54  ;;  %v1071_v8 = vunpack.c.l.b16 %v898_v11  ;;  %v982_v28 = vshrl.u32 %v3662_v13, 16  ;;  %v985_v29 = vshll.u32 %v3662_v13, 16 }
  0x4b   : > { %5071 = vst [vmem:[#allocation11_spill] sm:$0xff] %v3664_v14  ;;  %v1072_v27 = vunpack.c.l.b16 %v908_v17  ;;  %v991_v30 = vshll.u32 %v3664_v14, 16  ;;  %v995_v34 = vshrl.u32 %v3664_v14, 16  ;;  %v1001_v35 = vshll.u32 %v3670_v19, 16 }
  0x4c   : > { %5072 = vst [vmem:[#allocation12_spill] sm:$0xff] %v3670_v19  ;;  %v262_v37 = vadd.f32 %v3434_v4, %v204_v16  ;;  %v984_v39 = vrot.slane %v982_v28, 4  ;;  %v987_v40 = vrot.slane %v985_v29, 5  ;;  %vm314_vm8 = vcmp.gt.f32.partialorder %v260_v20, 0.0 }
  0x4d   : > { %v3680_v38 = vpack.c.b16 %v1072_v27, %v1071_v8  ;;  %v993_v41 = vrot.slane %v991_v30, 5  ;;  %v997_v43 = vrot.slane %v995_v34, 4  ;;  %v1003_v48 = vrot.slane %v1001_v35, 5 }
  0x4e   : > { %vm315_vm9 = vcmp.gt.f32.partialorder %v261_v36, 0.0  ;;  %v988_v52 = vor.u32 %v987_v40, %v984_v39  ;;  %vm316_vm10 = vcmp.gt.f32.partialorder %v262_v37, 0.0  ;;  %vm368_vm11 = vcmp.lt.f32.partialorder %v260_v20, 0.0 }
  0x4f   : > { %5073 = vst [vmem:[#allocation13_spill] sm:$0xff] %v3680_v38  ;;  %3156 = vmatmul.msk.bf16.gmra.mxu2 %vm1101_vm4, %v3680_v38  ;;  %vm369_vm12 = vcmp.lt.f32.partialorder %v261_v36, 0.0  ;;  %v998_v53 = vor.u32 %v997_v43, %v993_v41  ;;  %vm370_vm13 = vcmp.lt.f32.partialorder %v262_v37, 0.0  ;;  %v422_v54 = vsel %vm368_vm11, -1.0, %v4996_v22 }
  0x50   : > { %v423_v57 = vsel %vm369_vm12, -1.0, %v4996_v22  ;;  %v989_v62 = vrot.slane %v988_v52, 4  ;;  %v424_v63 = vsel %vm370_vm13, -1.0, %v4996_v22  ;;  %v476_v0 = vsel %vm314_vm8, 1.0, %v422_v54  ;;  %v229_v52 = vld [vmem:[%s3442_s24 + $0xf0] sm:$0xff] }
  0x51   : > { %v477_v7 = vsel %vm315_vm9, 1.0, %v423_v57  ;;  %v999_v1 = vrot.slane %v998_v53, 4  ;;  %v478_v21 = vsel %vm316_vm10, 1.0, %v424_v63  ;;  %v552_v2 = vsel %vm531_vm1, %v476_v0, 0.0 }
  0x52   : > { %v3690_v6 = vpack.c.bf16 %v477_v7, %v477_v7  ;;  %v994_v9 = vsel %vm3499_vm5, %v989_v62, %v993_v41  ;;  %v554_v10 = vsel %vm542_vm2, %v478_v21, 0.0  ;;  %v3696_v11 = vpack.c.bf16 %v552_v2, %v552_v2 }
  0x53   : > { %v275_v16 = vadd.f32 %v3434_v4, %v217_v61  ;;  %v1004_v17 = vsel %vm3499_vm5, %v999_v1, %v1003_v48  ;;  %v1079_v8 = vunpack.c.l.b16 %v994_v9  ;;  %v3703_v20 = vpack.c.bf16 %v554_v10, %v554_v10  ;;  %v230_v61 = vld [vmem:[%s3442_s24 + $0xf8] sm:$0xff] }
  0x54   : > { %v703_v27 = vshll.u32 %v3690_v6, 16  ;;  %v1080_v28 = vunpack.c.l.b16 %v1004_v17  ;;  %v694_v29 = vshrl.u32 %v3696_v11, 16  ;;  %v697_v30 = vshll.u32 %v3696_v11, 16 }
  0x55   : > { %v707_v34 = vshrl.u32 %v3690_v6, 16  ;;  %v713_v36 = vshll.u32 %v3703_v20, 16  ;;  %v276_v37 = vadd.f32 %v3434_v4, %v218_v12  ;;  %v277_v39 = vadd.f32 %v3434_v4, %v219_v15  ;;  %v231_v15 = vld [vmem:[%s3442_s24 + $0x100] sm:$0x3] }
  0x56   : > { %v705_v35 = vrot.slane %v703_v27, 5  ;;  %v3712_v40 = vpack.c.b16 %v1080_v28, %v1079_v8  ;;  %v696_v41 = vrot.slane %v694_v29, 4  ;;  %v699_v43 = vrot.slane %v697_v30, 5 }
  0x57   : > { %v709_v48 = vrot.slane %v707_v34, 4  ;;  %v715_v53 = vrot.slane %v713_v36, 5  ;;  %vm329_vm14 = vcmp.gt.f32.partialorder %v275_v16, 0.0  ;;  %vm330_vm15 = vcmp.gt.f32.partialorder %v276_v37, 0.0 }
  0x58   : > { %5074 = vst [vmem:[#allocation14_spill] sm:$0xff] %v3712_v40  ;;  %vm331_vm3 = vcmp.gt.f32.partialorder %v277_v39, 0.0  ;;  %3160 = vmatmul.msk.bf16.gmra.mxu3 %vm1101_vm4, %v3712_v40  ;;  %v700_v54 = vor.u32 %v699_v43, %v696_v41  ;;  %vm383_vm6 = vcmp.lt.f32.partialorder %v275_v16, 0.0  ;;  %vm384_vm7 = vcmp.lt.f32.partialorder %v276_v37, 0.0 }
  0x59   : > { %v710_v57 = vor.u32 %v709_v48, %v705_v35  ;;  %vm385_vm8 = vcmp.lt.f32.partialorder %v277_v39, 0.0  ;;  %v437_v62 = vsel %vm383_vm6, -1.0, %v4996_v22  ;;  %v438_v63 = vsel %vm384_vm7, -1.0, %v4996_v22 }
  0x5a   : > { %v287_v0 = vadd.f32 %v3434_v4, %v229_v52  ;;  %v701_v7 = vrot.slane %v700_v54, 4  ;;  %v439_v21 = vsel %vm385_vm8, -1.0, %v4996_v22  ;;  %v491_v2 = vsel %vm329_vm14, 1.0, %v437_v62 }
  0x5b   : > { %v711_v1 = vrot.slane %v710_v57, 4  ;;  %v492_v9 = vsel %vm330_vm15, 1.0, %v438_v63  ;;  %v493_v10 = vsel %vm331_vm3, 1.0, %v439_v21  ;;  %v567_v12 = vsel %vm531_vm1, %v491_v2, 0.0 }
  0x5c   : > { %v288_v17 = vadd.f32 %v3434_v4, %v230_v61  ;;  %v706_v8 = vsel %vm3499_vm5, %v701_v7, %v705_v35  ;;  %v569_v16 = vsel %vm542_vm2, %v493_v10, 0.0  ;;  %v3735_v28 = vpack.c.bf16 %v567_v12, %v567_v12  ;;  %v241_v10 = vld [vmem:[%s3442_s24 + $0x150] sm:$0xff]  ;;  %v242_v12 = vld [vmem:[%s3442_s24 + $0x158] sm:$0xff] }
  0x5d   : > { %v716_v27 = vsel %vm3499_vm5, %v711_v1, %v715_v53  ;;  %v1055_v29 = vunpack.c.l.b16 %v706_v8  ;;  %v3737_v34 = vpack.c.bf16 %v492_v9, %v492_v9  ;;  %v3739_v36 = vpack.c.bf16 %v569_v16, %v569_v16 }
  0x5e   : > { %v1056_v30 = vunpack.c.l.b16 %v716_v27  ;;  %v814_v37 = vshrl.u32 %v3735_v28, 16  ;;  %v817_v39 = vshll.u32 %v3735_v28, 16  ;;  %v289_v35 = vadd.f32 %v3434_v4, %v231_v15 }
  0x5f   : > { %vm341_vm9 = vcmp.gt.f32.partialorder %v287_v0, 0.0  ;;  %v823_v43 = vshll.u32 %v3737_v34, 16  ;;  %v827_v48 = vshrl.u32 %v3737_v34, 16  ;;  %v833_v52 = vshll.u32 %v3739_v36, 16 }
  0x60   : > { %v3744_v41 = vpack.c.b16 %v1056_v30, %v1055_v29  ;;  %v816_v53 = vrot.slane %v814_v37, 4  ;;  %v819_v54 = vrot.slane %v817_v39, 5  ;;  %vm342_vm10 = vcmp.gt.f32.partialorder %v288_v17, 0.0 }
  0x61   : > { %vm343_vm11 = vcmp.gt.f32.partialorder %v289_v35, 0.0  ;;  %v825_v57 = vrot.slane %v823_v43, 5  ;;  %v829_v61 = vrot.slane %v827_v48, 4  ;;  %v835_v62 = vrot.slane %v833_v52, 5 }
  0x62   : > { %3148 = vmatmul.msk.bf16.gmra.mxu0 %vm1101_vm4, %v3744_v41  ;;  %vm395_vm12 = vcmp.lt.f32.partialorder %v287_v0, 0.0  ;;  %v820_v63 = vor.u32 %v819_v54, %v816_v53  ;;  %vm396_vm13 = vcmp.lt.f32.partialorder %v288_v17, 0.0  ;;  %vm397_vm14 = vcmp.lt.f32.partialorder %v289_v35, 0.0  ;;  %v243_v17 = vld [vmem:[%s3442_s24 + $0x160] sm:$0x3] }
  0x63   : > { %v449_v7 = vsel %vm395_vm12, -1.0, %v4996_v22  ;;  %v830_v1 = vor.u32 %v829_v61, %v825_v57  ;;  %v450_v21 = vsel %vm396_vm13, -1.0, %v4996_v22  ;;  %v451_v2 = vsel %vm397_vm14, -1.0, %v4996_v22 }
  0x64   : > { %v503_v9 = vsel %vm341_vm9, 1.0, %v449_v7  ;;  %v821_v15 = vrot.slane %v820_v63, 4  ;;  %v504_v8 = vsel %vm342_vm10, 1.0, %v450_v21  ;;  %v505_v27 = vsel %vm343_vm11, 1.0, %v451_v2 }
  0x65   : > { %v579_v16 = vsel %vm531_vm1, %v503_v9, 0.0  ;;  %v831_v29 = vrot.slane %v830_v1, 4  ;;  %v581_v30 = vsel %vm542_vm2, %v505_v27, 0.0  ;;  %v3765_v39 = vpack.c.bf16 %v504_v8, %v504_v8 }
  0x66   : > { %v3763_v37 = vpack.c.bf16 %v579_v16, %v579_v16  ;;  %v826_v0 = vsel %vm3499_vm5, %v821_v15, %v825_v57  ;;  %v3769_v43 = vpack.c.bf16 %v581_v30, %v581_v30  ;;  %v299_v35 = vadd.f32 %v3434_v4, %v241_v10 }
  0x67   : > { %v300_v48 = vadd.f32 %v3434_v4, %v242_v12  ;;  %v836_v52 = vsel %vm3499_vm5, %v831_v29, %v835_v62  ;;  %v1065_v53 = vunpack.c.l.b16 %v826_v0  ;;  %v919_v7 = vshll.u32 %v3765_v39, 16 }
  0x68   : > { %v910_v54 = vshrl.u32 %v3763_v37, 16  ;;  %v913_v61 = vshll.u32 %v3763_v37, 16  ;;  %v1066_v63 = vunpack.c.l.b16 %v836_v52  ;;  %v923_v57 = vshrl.u32 %v3765_v39, 16  ;;  %v205_v52 = vld [vmem:[%s3442_s24 + $0x30] sm:$0xff] }
  0x69   : > { %v929_v1 = vshll.u32 %v3769_v43, 16  ;;  %v301_v9 = vadd.f32 %v3434_v4, %v243_v17  ;;  %vm353_vm15 = vcmp.gt.f32.partialorder %v299_v35, 0.0  ;;  %v921_v62 = vrot.slane %v919_v7, 5 }
  0x6a   : > { %v912_v21 = vrot.slane %v910_v54, 4  ;;  %v915_v2 = vrot.slane %v913_v61, 5  ;;  %v3782_v10 = vpack.c.b16 %v1066_v63, %v1065_v53  ;;  %v925_v12 = vrot.slane %v923_v57, 4 }
  0x6b   : > { %v931_v15 = vrot.slane %v929_v1, 5  ;;  %vm354_vm3 = vcmp.gt.f32.partialorder %v300_v48, 0.0  ;;  %vm355_vm6 = vcmp.gt.f32.partialorder %v301_v9, 0.0  ;;  %vm407_vm7 = vcmp.lt.f32.partialorder %v299_v35, 0.0  ;;  %v207_v35 = vld [vmem:[%s3442_s24 + $0x40] sm:$0x3] }
  0x6c   : > { %5075 = vst [vmem:[#allocation15_spill] sm:$0xff] %v3782_v10  ;;  %v916_v8 = vor.u32 %v915_v2, %v912_v21  ;;  %3153 = vmatmul.msk.bf16.gmra.mxu1 %vm1101_vm4, %v3782_v10  ;;  %v926_v27 = vor.u32 %v925_v12, %v921_v62  ;;  %vm408_vm8 = vcmp.lt.f32.partialorder %v300_v48, 0.0  ;;  %vm409_vm9 = vcmp.lt.f32.partialorder %v301_v9, 0.0  ;;  %v206_v21 = vld [vmem:[%s3442_s24 + $0x38] sm:$0xff] }
  0x6d   : > { %v461_v16 = vsel %vm407_vm7, -1.0, %v4996_v22  ;;  %v462_v30 = vsel %vm408_vm8, -1.0, %v4996_v22  ;;  %v463_v0 = vsel %vm409_vm9, -1.0, %v4996_v22 }
  0x6e   : > { %v917_v29 = vrot.slane %v916_v8, 4  ;;  %v515_v17 = vsel %vm353_vm15, 1.0, %v461_v16  ;;  %v927_v53 = vrot.slane %v926_v27, 4  ;;  %v516_v54 = vsel %vm354_vm3, 1.0, %v462_v30 }
  0x6f   : > { %v517_v61 = vsel %vm355_vm6, 1.0, %v463_v0  ;;  %v591_v63 = vsel %vm531_vm1, %v515_v17, 0.0  ;;  %v3799_v1 = vpack.c.bf16 %v516_v54, %v516_v54  ;;  %v263_v8 = vadd.f32 %v3434_v4, %v205_v52 }
  0x70   : > { %v922_v48 = vsel %vm3499_vm5, %v917_v29, %v921_v62  ;;  %v593_v7 = vsel %vm542_vm2, %v517_v61, 0.0  ;;  %v3797_v57 = vpack.c.bf16 %v591_v63, %v591_v63  ;;  %v932_v2 = vsel %vm3499_vm5, %v927_v53, %v931_v15 }
  0x71   : > { %5077 = vst [vmem:[#allocation17_spill] sm:$0xff] %v3799_v1  ;;  %v1073_v9 = vunpack.c.l.b16 %v922_v48  ;;  %v3805_v12 = vpack.c.bf16 %v593_v7, %v593_v7  ;;  %v1074_v27 = vunpack.c.l.b16 %v932_v2  ;;  %v1015_v29 = vshll.u32 %v3799_v1, 16 }
  0x72   : > { %5076 = vst [vmem:[#allocation16_spill] sm:$0xff] %v3797_v57  ;;  %v1006_v62 = vshrl.u32 %v3797_v57, 16  ;;  %v1009_v16 = vshll.u32 %v3797_v57, 16  ;;  %v1019_v30 = vshrl.u32 %v3799_v1, 16  ;;  %v264_v17 = vadd.f32 %v3434_v4, %v206_v21  ;;  %v234_v57 = vld [vmem:[%s3442_s24 + $0x118] sm:$0x3] }
  0x73   : > { %5078 = vst [vmem:[#allocation18_spill] sm:$0xff] %v3805_v12  ;;  %v1025_v0 = vshll.u32 %v3805_v12, 16  ;;  %v265_v15 = vadd.f32 %v3434_v4, %v207_v35  ;;  %v3815_v53 = vpack.c.b16 %v1074_v27, %v1073_v9  ;;  %v1017_v61 = vrot.slane %v1015_v29, 5  ;;  %v220_v9 = vld [vmem:[%s3442_s24 + $0xa8] sm:$0xff] }
  0x74   : > { %v1008_v54 = vrot.slane %v1006_v62, 4  ;;  %v1011_v52 = vrot.slane %v1009_v16, 5  ;;  %v1021_v63 = vrot.slane %v1019_v30, 4  ;;  %vm317_vm10 = vcmp.gt.f32.partialorder %v263_v8, 0.0 }
  0x75   : > { %v1027_v48 = vrot.slane %v1025_v0, 5  ;;  %vm318_vm11 = vcmp.gt.f32.partialorder %v264_v17, 0.0  ;;  %3157 = vmatmul.msk.bf16.gmra.mxu2 %vm1101_vm4, %v3815_v53  ;;  %vm319_vm12 = vcmp.gt.f32.partialorder %v265_v15, 0.0  ;;  %vm371_vm13 = vcmp.lt.f32.partialorder %v263_v8, 0.0 }
  0x76   : > { %v1012_v7 = vor.u32 %v1011_v52, %v1008_v54  ;;  %vm372_vm14 = vcmp.lt.f32.partialorder %v264_v17, 0.0  ;;  %v1022_v21 = vor.u32 %v1021_v63, %v1017_v61  ;;  %vm373_vm15 = vcmp.lt.f32.partialorder %v265_v15, 0.0  ;;  %v221_v63 = vld [vmem:[%s3442_s24 + $0xb0] sm:$0xff] }
  0x77   : > { %v425_v35 = vsel %vm371_vm13, -1.0, %v4996_v22  ;;  %v426_v2 = vsel %vm372_vm14, -1.0, %v4996_v22  ;;  %v427_v62 = vsel %vm373_vm15, -1.0, %v4996_v22 }
  0x78   : > { %v1013_v27 = vrot.slane %v1012_v7, 4  ;;  %v479_v16 = vsel %vm317_vm10, 1.0, %v425_v35  ;;  %v480_v29 = vsel %vm318_vm11, 1.0, %v426_v2  ;;  %v1023_v30 = vrot.slane %v1022_v21, 4  ;;  %v222_v7 = vld [vmem:[%s3442_s24 + $0xb8] sm:$0x3] }
  0x79   : > { %v481_v0 = vsel %vm319_vm12, 1.0, %v427_v62  ;;  %v555_v8 = vsel %vm531_vm1, %v479_v16, 0.0  ;;  %v3825_v17 = vpack.c.bf16 %v480_v29, %v480_v29  ;;  %v278_v35 = vadd.f32 %v3434_v4, %v220_v9 }
  0x7a   : > { %v1018_v15 = vsel %vm3499_vm5, %v1013_v27, %v1017_v61  ;;  %v557_v54 = vsel %vm542_vm2, %v481_v0, 0.0  ;;  %v3831_v52 = vpack.c.bf16 %v555_v8, %v555_v8  ;;  %v1028_v21 = vsel %vm3499_vm5, %v1023_v30, %v1027_v48 }
  0x7b   : > { %v1081_v2 = vunpack.c.l.b16 %v1018_v15  ;;  %v3838_v62 = vpack.c.bf16 %v557_v54, %v557_v54  ;;  %v727_v16 = vshll.u32 %v3825_v17, 16  ;;  %v1082_v29 = vunpack.c.l.b16 %v1028_v21  ;;  %v232_v21 = vld [vmem:[%s3442_s24 + $0x108] sm:$0xff] }
  0x7c   : > { %v718_v61 = vshrl.u32 %v3831_v52, 16  ;;  %v721_v27 = vshll.u32 %v3831_v52, 16  ;;  %v731_v0 = vshrl.u32 %v3825_v17, 16  ;;  %v279_v9 = vadd.f32 %v3434_v4, %v221_v63  ;;  %v233_v63 = vld [vmem:[%s3442_s24 + $0x110] sm:$0xff] }
  0x7d   : > { %v729_v8 = vrot.slane %v727_v16, 5  ;;  %v737_v22 = vshll.u32 %v3838_v62, 16  ;;  %v280_v48 = vadd.f32 %v3434_v4, %v222_v7  ;;  %v3847_v30 = vpack.c.b16 %v1082_v29, %v1081_v2 }
  0x7e   : > { %v720_v15 = vrot.slane %v718_v61, 4  ;;  %v723_v54 = vrot.slane %v721_v27, 5  ;;  %v733_v18 = vrot.slane %v731_v0, 4  ;;  %vm332_vm3 = vcmp.gt.f32.partialorder %v278_v35, 0.0 }
  0x7f   : > { %5079 = vst [vmem:[#allocation19_spill] sm:$0xff] %v3847_v30  ;;  %v739_v40 = vrot.slane %v737_v22, 5  ;;  %vm333_vm6 = vcmp.gt.f32.partialorder %v279_v9, 0.0  ;;  %vm334_vm7 = vcmp.gt.f32.partialorder %v280_v48, 0.0  ;;  %3161 = vmatmul.msk.bf16.gmra.mxu3 %vm1101_vm4, %v3847_v30  ;;  %vm386_vm8 = vcmp.lt.f32.partialorder %v278_v35, 0.0 }
  0x80   : > { %v724_v16 = vor.u32 %v723_v54, %v720_v15  ;;  %v734_v12 = vor.u32 %v733_v18, %v729_v8  ;;  %vm387_vm9 = vcmp.lt.f32.partialorder %v279_v9, 0.0  ;;  %vm388_vm10 = vcmp.lt.f32.partialorder %v280_v48, 0.0  ;;  %v3858_v22 = vld [vmem:[%s4993_s2] ss:$0 sm:$0xff] }
  0x81   : > { %v5080_v4 = vmov 0.0   ;;  %v290_v29 = vadd.f32 %v3858_v22, %v232_v21  ;;  %v291_v1 = vadd.f32 %v3858_v22, %v233_v63  ;;  %v267_v46 = vadd.f32 %v3858_v22, %v209_v44 }
  0x82   : > { %v440_v7 = vsel %vm386_vm8, -1.0, %v5080_v4  ;;  %v441_v2 = vsel %vm387_vm9, -1.0, %v5080_v4  ;;  %v725_v61 = vrot.slane %v724_v16, 4  ;;  %v735_v27 = vrot.slane %v734_v12, 4 }
  0x83   : > { %v442_v18 = vsel %vm388_vm10, -1.0, %v5080_v4  ;;  %v494_v0 = vsel %vm332_vm3, 1.0, %v440_v7  ;;  %v495_v15 = vsel %vm333_vm6, 1.0, %v441_v2  ;;  %vm344_vm11 = vcmp.gt.f32.partialorder %v290_v29, 0.0 }
  0x84   : > { %v496_v54 = vsel %vm334_vm7, 1.0, %v442_v18  ;;  %v570_v30 = vsel %vm531_vm1, %v494_v0, 0.0  ;;  %v730_v19 = vsel %vm3499_vm5, %v725_v61, %v729_v8  ;;  %v740_v12 = vsel %vm3499_vm5, %v735_v27, %v739_v40 }
  0x85   : > { %v572_v35 = vsel %vm542_vm2, %v496_v54, 0.0  ;;  %v3875_v21 = vpack.c.bf16 %v570_v30, %v570_v30  ;;  %v1057_v9 = vunpack.c.l.b16 %v730_v19  ;;  %v1058_v48 = vunpack.c.l.b16 %v740_v12 }
  0x86   : > { %v3877_v16 = vpack.c.bf16 %v495_v15, %v495_v15  ;;  %v3879_v7 = vpack.c.bf16 %v572_v35, %v572_v35  ;;  %v292_v8 = vadd.f32 %v3858_v22, %v234_v57  ;;  %vm345_vm12 = vcmp.gt.f32.partialorder %v291_v1, 0.0 }
  0x87   : > { %v838_v2 = vshrl.u32 %v3875_v21, 16  ;;  %v841_v63 = vshll.u32 %v3875_v21, 16  ;;  %v3884_v61 = vpack.c.b16 %v1058_v48, %v1057_v9  ;;  %vm398_vm14 = vcmp.lt.f32.partialorder %v290_v29, 0.0 }
  0x88   : > { %v847_v40 = vshll.u32 %v3877_v16, 16  ;;  %v851_v30 = vshrl.u32 %v3877_v16, 16  ;;  %v857_v19 = vshll.u32 %v3879_v7, 16  ;;  %vm346_vm13 = vcmp.gt.f32.partialorder %v292_v8, 0.0 }
  0x89   : > { %v840_v27 = vrot.slane %v838_v2, 4  ;;  %v843_v18 = vrot.slane %v841_v63, 5  ;;  %3149 = vmatmul.msk.bf16.gmra.mxu0 %vm1101_vm4, %v3884_v61  ;;  %vm399_vm15 = vcmp.lt.f32.partialorder %v291_v1, 0.0  ;;  %vm400_vm3 = vcmp.lt.f32.partialorder %v292_v8, 0.0  ;;  %v244_v63 = vld [vmem:[%s3442_s24 + $0x168] sm:$0xff] }
  0x8a   : > { %v849_v0 = vrot.slane %v847_v40, 5  ;;  %v853_v57 = vrot.slane %v851_v30, 4  ;;  %v859_v15 = vrot.slane %v857_v19, 5  ;;  %v452_v12 = vsel %vm398_vm14, -1.0, %v5080_v4  ;;  %v246_v1 = vld [vmem:[%s3442_s24 + $0x178] sm:$0x3] }
  0x8b   : > { %v844_v54 = vor.u32 %v843_v18, %v840_v27  ;;  %v453_v9 = vsel %vm399_vm15, -1.0, %v5080_v4  ;;  %v454_v48 = vsel %vm400_vm3, -1.0, %v5080_v4  ;;  %v506_v2 = vsel %vm344_vm11, 1.0, %v452_v12 }
  0x8c   : > { %v854_v35 = vor.u32 %v853_v57, %v849_v0  ;;  %v507_v40 = vsel %vm345_vm12, 1.0, %v453_v9  ;;  %v508_v30 = vsel %vm346_vm13, 1.0, %v454_v48  ;;  %v582_v19 = vsel %vm531_vm1, %v506_v2, 0.0 }
  0x8d   : > { %v845_v13 = vrot.slane %v844_v54, 4  ;;  %v584_v18 = vsel %vm542_vm2, %v508_v30, 0.0  ;;  %v3903_v57 = vpack.c.bf16 %v582_v19, %v582_v19  ;;  %v3905_v14 = vpack.c.bf16 %v507_v40, %v507_v40 }
  0x8e   : > { %v855_v27 = vrot.slane %v854_v35, 4  ;;  %v3909_v12 = vpack.c.bf16 %v584_v18, %v584_v18  ;;  %v302_v8 = vadd.f32 %v3858_v22, %v244_v63  ;;  %v303_v54 = vadd.f32 %v3858_v22, %v245_v50 }
  0x8f   : > { %v850_v29 = vsel %vm3499_vm5, %v845_v13, %v849_v0  ;;  %v934_v48 = vshrl.u32 %v3903_v57, 16  ;;  %v937_v2 = vshll.u32 %v3903_v57, 16  ;;  %v943_v30 = vshll.u32 %v3905_v14, 16 }
  0x90   : > { %5081 = vst [vmem:[#allocation20_spill] sm:$0xff] %v3909_v12  ;;  %v860_v35 = vsel %vm3499_vm5, %v855_v27, %v859_v15  ;;  %v1067_v9 = vunpack.c.l.b16 %v850_v29  ;;  %v947_v13 = vshrl.u32 %v3905_v14, 16  ;;  %v953_v0 = vshll.u32 %v3909_v12, 16 }
  0x91   : > { %v1068_v40 = vunpack.c.l.b16 %v860_v35  ;;  %v936_v19 = vrot.slane %v934_v48, 4  ;;  %v939_v18 = vrot.slane %v937_v2, 5  ;;  %v304_v63 = vadd.f32 %v3858_v22, %v246_v1 }
  0x92   : > { %vm356_vm6 = vcmp.gt.f32.partialorder %v302_v8, 0.0  ;;  %v945_v15 = vrot.slane %v943_v30, 5  ;;  %v949_v27 = vrot.slane %v947_v13, 4  ;;  %v955_v29 = vrot.slane %v953_v0, 5  ;;  %v208_v30 = vld [vmem:[%s3442_s24 + $0x48] sm:$0xff] }
  0x93   : > { %v3922_v50 = vpack.c.b16 %v1068_v40, %v1067_v9  ;;  %v940_v47 = vor.u32 %v939_v18, %v936_v19  ;;  %vm357_vm7 = vcmp.gt.f32.partialorder %v303_v54, 0.0  ;;  %vm358_vm8 = vcmp.gt.f32.partialorder %v304_v63, 0.0 }
  0x94   : > { %vm410_vm9 = vcmp.lt.f32.partialorder %v302_v8, 0.0  ;;  %v950_v35 = vor.u32 %v949_v27, %v945_v15  ;;  %vm411_vm10 = vcmp.lt.f32.partialorder %v303_v54, 0.0  ;;  %vm412_vm11 = vcmp.lt.f32.partialorder %v304_v63, 0.0  ;;  %v210_v8 = vld [vmem:[%s3442_s24 + $0x58] sm:$0x3] }
  0x95   : > { %5082 = vst [vmem:[#allocation21_spill] sm:$0xff] %v3922_v50  ;;  %3154 = vmatmul.msk.bf16.gmra.mxu1 %vm1101_vm4, %v3922_v50  ;;  %v464_v1 = vsel %vm410_vm9, -1.0, %v5080_v4  ;;  %v941_v9 = vrot.slane %v940_v47, 4  ;;  %v465_v48 = vsel %vm411_vm10, -1.0, %v5080_v4  ;;  %v466_v2 = vsel %vm412_vm11, -1.0, %v5080_v4 }
  0x96   : > { %v518_v40 = vsel %vm356_vm6, 1.0, %v464_v1  ;;  %v951_v13 = vrot.slane %v950_v35, 4  ;;  %v519_v0 = vsel %vm357_vm7, 1.0, %v465_v48  ;;  %v520_v19 = vsel %vm358_vm8, 1.0, %v466_v2 }
  0x97   : > { %v594_v18 = vsel %vm531_vm1, %v518_v40, 0.0  ;;  %v946_v54 = vsel %vm3499_vm5, %v941_v9, %v945_v15  ;;  %v596_v63 = vsel %vm542_vm2, %v520_v19, 0.0  ;;  %v3939_v27 = vpack.c.bf16 %v519_v0, %v519_v0 }
  0x98   : > { %v3937_v47 = vpack.c.bf16 %v594_v18, %v594_v18  ;;  %v956_v35 = vsel %vm3499_vm5, %v951_v13, %v955_v29  ;;  %v1075_v1 = vunpack.c.l.b16 %v946_v54  ;;  %v3945_v48 = vpack.c.bf16 %v596_v63, %v596_v63 }
  0x99   : > { %5084 = vst [vmem:[#allocation23_spill] sm:$0xff] %v3939_v27  ;;  %v266_v2 = vadd.f32 %v3858_v22, %v208_v30  ;;  %v1076_v40 = vunpack.c.l.b16 %v956_v35  ;;  %v1039_v19 = vshll.u32 %v3939_v27, 16  ;;  %v1043_v0 = vshrl.u32 %v3939_v27, 16 }
  0x9a   : > { %5083 = vst [vmem:[#allocation22_spill] sm:$0xff] %v3937_v47  ;;  %v1030_v15 = vshrl.u32 %v3937_v47, 16  ;;  %v1033_v9 = vshll.u32 %v3937_v47, 16  ;;  %v1049_v18 = vshll.u32 %v3945_v48, 16  ;;  %v268_v29 = vadd.f32 %v3858_v22, %v210_v8 }
  0x9b   : > { %5085 = vst [vmem:[#allocation24_spill] sm:$0xff] %v3945_v48  ;;  %v3955_v13 = vpack.c.b16 %v1076_v40, %v1075_v1  ;;  %v1041_v30 = vrot.slane %v1039_v19, 5  ;;  %v1045_v35 = vrot.slane %v1043_v0, 4  ;;  %vm320_vm12 = vcmp.gt.f32.partialorder %v266_v2, 0.0 }
  0x9c   : > { %v1032_v54 = vrot.slane %v1030_v15, 4  ;;  %v1035_v63 = vrot.slane %v1033_v9, 5  ;;  %v1051_v12 = vrot.slane %v1049_v18, 5  ;;  %vm321_vm13 = vcmp.gt.f32.partialorder %v267_v46, 0.0 }
  0x9d   : > { %3158 = vmatmul.msk.bf16.gmra.mxu2 %vm1101_vm4, %v3955_v13  ;;  %vm322_vm14 = vcmp.gt.f32.partialorder %v268_v29, 0.0  ;;  %vm374_vm15 = vcmp.lt.f32.partialorder %v266_v2, 0.0  ;;  %vm375_vm3 = vcmp.lt.f32.partialorder %v267_v46, 0.0  ;;  %v1046_v48 = vor.u32 %v1045_v35, %v1041_v30 }
  0x9e   : > { %v1036_v47 = vor.u32 %v1035_v63, %v1032_v54  ;;  %vm376_vm6 = vcmp.lt.f32.partialorder %v268_v29, 0.0  ;;  %v428_v44 = vsel %vm374_vm15, -1.0, %v5080_v4  ;;  %v429_v22 = vsel %vm375_vm3, -1.0, %v5080_v4 }
  0x9f   : > { %v430_v1 = vsel %vm376_vm6, -1.0, %v5080_v4  ;;  %v482_v40 = vsel %vm320_vm12, 1.0, %v428_v44  ;;  %v483_v15 = vsel %vm321_vm13, 1.0, %v429_v22  ;;  %v1047_v9 = vrot.slane %v1046_v48, 4 }
  0xa0   : > { %v1037_v8 = vrot.slane %v1036_v47, 4  ;;  %v484_v19 = vsel %vm322_vm14, 1.0, %v430_v1  ;;  %v558_v0 = vsel %vm531_vm1, %v482_v40, 0.0  ;;  %v3964_v18 = vpack.c.bf16 %v483_v15, %v483_v15 }
  0xa1   : > { %v560_v2 = vsel %vm542_vm2, %v484_v19, 0.0  ;;  %v3970_v29 = vpack.c.bf16 %v558_v0, %v558_v0  ;;  %v1052_v47 = vsel %vm3499_vm5, %v1047_v9, %v1051_v12  ;;  %v3388_v40 = vmov 0.0|0.0   ;;  %v663_v12 = vld [vmem:[%s4992_s1 + $0xc] sm:$0x3] }
  0xa2   : > { %v1042_v46 = vsel %vm3499_vm5, %v1037_v8, %v1041_v30  ;;  %v3974_v63 = vpack.c.bf16 %v560_v2, %v560_v2  ;;  %v751_v48 = vshll.u32 %v3964_v18, 16  ;;  %v1084_v35 = vunpack.c.l.b16 %v1052_v47  ;;  %v664_v47 = vld [vmem:[%s4992_s1 + $0xe] sm:$0x3] }
  0xa3   : > { %v1083_v54 = vunpack.c.l.b16 %v1042_v46  ;;  %v742_v44 = vshrl.u32 %v3970_v29, 16  ;;  %v745_v22 = vshll.u32 %v3970_v29, 16  ;;  %v755_v30 = vshrl.u32 %v3964_v18, 16 }
  0xa4   : > { %v753_v8 = vrot.slane %v751_v48, 5  ;;  %v761_v1 = vshll.u32 %v3974_v63, 16  ;;  %v1275_v15 = vunpack.c.l.b16 %v3388_v40  ;;  %v3179_v19 = vrot.slane %v3388_v40, 9 }
  0xa5   : > { %v3984_v9 = vpack.c.b16 %v1084_v35, %v1083_v54  ;;  %v744_v0 = vrot.slane %v742_v44, 4  ;;  %v747_v46 = vrot.slane %v745_v22, 5  ;;  %v757_v2 = vrot.slane %v755_v30, 4  ;;  %v665_v22 = vld [vmem:[%s4992_s1 + $0x10] sm:$0x3] }
  0xa6   : > { %v3989_v5 = vpack.c.b16 %v1275_v15, %v1275_v15  ;;  %v1484_v48 = vrot.slane %v3388_v40, 5  ;;  %vm1479_vm7 = vcmask 1042432   ;;  %v763_v44 = vrot.slane %v761_v1, 5 }
  0xa7   : > { %5086 = vst [vmem:[#allocation25_spill] sm:$0xff] %v3984_v9  ;;  %3162 = vmatmul.msk.bf16.gmra.mxu3 %vm1101_vm4, %v3984_v9  ;;  %v748_v54 = vor.u32 %v747_v46, %v744_v0  ;;  %v758_v35 = vor.u32 %v757_v2, %v753_v8  ;;  %vm1480_vm8 = vcmask 1046532   ;;  %v5088_v30 = vmov 0 }
  0xa8   : > { %5087 = vst [vmem:[#allocation26_spill] sm:$0xff] %v3989_v5  ;;  %3163 = vmatmul.msk.bf16.vlgmr.msrb.gmra.mxu1 %vm1101_vm4, %v3989_v5  ;;  %vm4001_vm9 = vmor %vm1479_vm7, %vm1480_vm8  ;;  %v1486_v40 = vrot.slane %v1484_v48, 4  ;;  %v2247_v15 = vsel %vm1150_vm0, %v663_v12, 0  ;;  %v2401_v9 = vsel %vm1150_vm0, %v664_v47, 0  ;;  %v2115_v2 = vsel %vm1150_vm0, %v662_v3, 0 }
  0xa9   : > { %v5089_v30 = vsel %vm4001_vm9, 4294967295, %v5088_v30  ;;  %v749_v0 = vrot.slane %v748_v54, 4  ;;  %v759_v46 = vrot.slane %v758_v35, 4  ;;  %v1485_v1 = vsel %vm4001_vm9, %v3179_v19, %v1484_v48  ;;  %2256 = vmatpush.bf16.msra.mxu2 %v2247_v15  ;;  %2410 = vmatpush.bf16.msra.mxu3 %v2401_v9 }
  0xaa   : > { %5090 = vst [vmem:[#allocation27_spill] sm:$0xff] %v5089_v30  ;;  %v1488_v5 = vsel %vm4001_vm9, %v1486_v40, %v1484_v48  ;;  %v1594_v27 = vunpack.c.l.b16 %v1485_v1  ;;  %2124 = vmatpush.bf16.msra.mxu1 %v2115_v2  ;;  %v2539_v4 = vsel %vm1150_vm0, %v665_v22, 0  ;;  %v1491_v9 = vrot.slane %v3690_v6, 5 }
  0xab   : > { %v754_v12 = vsel %vm3499_vm5, %v749_v0, %v753_v8  ;;  %v764_v47 = vsel %vm3499_vm5, %v759_v46, %v763_v44  ;;  %v1595_v54 = vunpack.c.l.b16 %v1488_v5  ;;  %2548 = vmatpush.bf16.msra.mxu0 %v2539_v4  ;;  %v1279_v48 = vunpack.c.l.b16 %v3831_v52 }
  0xac   : > { %v1059_v19 = vunpack.c.l.b16 %v754_v12  ;;  %v1060_v35 = vunpack.c.l.b16 %v764_v47  ;;  %v1280_v40 = vunpack.c.l.b16 %v3825_v17  ;;  %v1277_v22 = vunpack.c.l.b16 %v3696_v11 }
  0xad   : > { %v4018_v3 = vpack.c.b16 %v1595_v54, %v1594_v27  ;;  %v1278_v5 = vunpack.c.l.b16 %v3690_v6  ;;  %v3180_v4 = vrot.slane %v3696_v11, 9  ;;  %v1494_v8 = vrot.slane %v3703_v20, 5 }
  0xae   : > { %v4022_v15 = vpack.c.b16 %v1060_v35, %v1059_v19  ;;  %v4030_v44 = vpack.c.b16 %v1280_v40, %v1279_v48  ;;  %v1493_v27 = vrot.slane %v1491_v9, 4  ;;  %v3181_v0 = vrot.slane %v3831_v52, 9 }
  0xaf   : > { %5091 = vst [vmem:[#allocation28_spill] sm:$0xff] %v4018_v3  ;;  %3195 = vmatmul.msk.bf16.vlgmr.msrb.gmra.mxu2 %vm1101_vm4, %v4018_v3  ;;  %v1498_v46 = vrot.slane %v3825_v17, 5  ;;  %v1501_v1 = vrot.slane %v3838_v62, 5  ;;  %v1308_v12 = vpack.c.b16 %v1278_v5, %v1277_v22  ;;  %v1492_v20 = vsel %vm4001_vm9, %v3180_v4, %v1491_v9 }
  0xb0   : > { %3150 = vmatmul.msk.bf16.gmra.mxu0 %vm1101_vm4, %v4022_v15  ;;  %v1495_v47 = vsel %vm4001_vm9, %v1493_v27, %v1494_v8  ;;  %v1596_v17 = vunpack.c.l.b16 %v1492_v20  ;;  %v1505_v9 = vrot.slane %v3964_v18, 5  ;;  %v1281_v48 = vunpack.c.l.b16 %v3970_v29 }
  0xb1   : > { %v1499_v2 = vsel %vm4001_vm9, %v3181_v0, %v1498_v46  ;;  %v1500_v6 = vrot.slane %v1498_v46, 4  ;;  %v1597_v62 = vunpack.c.l.b16 %v1495_v47  ;;  %v1282_v40 = vunpack.c.l.b16 %v3964_v18  ;;  %v4076_v46 = vpop.f32.mrf.mxu1 }
  0xb2   : > { %v1598_v11 = vunpack.c.l.b16 %v1499_v2  ;;  %v1507_v22 = vrot.slane %v1505_v9, 4  ;;  %v1508_v5 = vrot.slane %v3974_v63, 5  ;;  %v1512_v63 = vrot.slane %v3473_v32, 5 }
  0xb3   : > { %v1502_v54 = vsel %vm4001_vm9, %v1500_v6, %v1501_v1  ;;  %v4049_v35 = vpack.c.b16 %v1597_v62, %v1596_v17  ;;  %v4068_v4 = vpack.c.b16 %v1282_v40, %v1281_v48  ;;  %v1283_v1 = vunpack.c.l.b16 %v3471_v31  ;;  %v4099_v17 = vpop.f32.mrf.mxu2 }
  0xb4   : > { %v1599_v52 = vunpack.c.l.b16 %v1502_v54  ;;  %v1509_v27 = vsel %vm4001_vm9, %v1507_v22, %v1508_v5  ;;  %v1284_v2 = vunpack.c.l.b16 %v3473_v32  ;;  %v3183_v6 = vrot.slane %v3471_v31, 9 }
  0xb5   : > { %v1601_v0 = vunpack.c.l.b16 %v1509_v27  ;;  %v1286_v22 = vunpack.c.l.b16 %v3597_v42  ;;  %v3184_v5 = vrot.slane %v3601_v45, 9  ;;  %v1522_v27 = vrot.slane %v3607_v51, 5 }
  0xb6   : > { %v4046_v19 = vpack.c.b16 %v1599_v52, %v1598_v11  ;;  %v1515_v11 = vrot.slane %v3475_v33, 5  ;;  %v4093_v47 = vpack.c.b16 %v1284_v2, %v1283_v1  ;;  %v1513_v54 = vsel %vm4001_vm9, %v3183_v6, %v1512_v63 }
  0xb7   : > { %3211 = vmatmul.msk.bf16.vlgmr.msrb.gmra.mxu3 %vm1101_vm4, %v1308_v12  ;;  %v1602_v32 = vunpack.c.l.b16 %v1513_v54  ;;  %v1526_v54 = vrot.slane %v3737_v34, 5 }
  0xb8   : > { %3164 = vmatmul.msk.bf16.gmra.mxu1 %vm1101_vm4, %v1308_v12  ;;  %v1514_v12 = vrot.slane %v1512_v63, 4 }
  0xb9   : > { %v4091_v20 = vpop.f32.mrf.mxu1 }
  0xba   : > { %v1516_v52 = vsel %vm4001_vm9, %v1514_v12, %v1515_v11 }
  0xbb   : > { %v1603_v31 = vunpack.c.l.b16 %v1516_v52  ;;  %v4112_v40 = vpop.f32.mrf.mxu2 }
  0xbc   : > { %v4110_v48 = vpop.f32.mrf.mxu3 }
  0xbd   : > { %v4107_v62 = vpack.c.b16 %v1603_v31, %v1602_v32  ;;  %5092 = vst [vmem:[#allocation29_spill] sm:$0xff] %v4110_v48  ;;  %v1287_v32 = vunpack.c.l.b16 %v3735_v28  ;;  %v1288_v31 = vunpack.c.l.b16 %v3737_v34 }
  0xbf   : > { %3196 = vmatmul.msk.bf16.gmra.mxu2 %vm1101_vm4, %v4049_v35 }
  0xc0   : > { %3227 = vmatmul.msk.bf16.vlgmr.msrb.gmra.mxu0 %vm1101_vm4, %v3744_v41  ;;  %v3182_v41 = vrot.slane %v3970_v29, 9 }
  0xc2   : > { %v1506_v8 = vsel %vm4001_vm9, %v3182_v41, %v1505_v9  ;;  %v4105_v33 = vpop.f32.mrf.mxu1  ;;  %v1519_v9 = vrot.slane %v3597_v42, 5  ;;  %v1285_v41 = vunpack.c.l.b16 %v3601_v45 }
  0xc3   : > { %v1600_v18 = vunpack.c.l.b16 %v1506_v8 }
  0xc4   : > { %v1521_v8 = vrot.slane %v1519_v9, 4  ;;  %v1520_v1 = vsel %vm4001_vm9, %v3184_v5, %v1519_v9  ;;  %v4134_v6 = vpop.f32.mrf.mxu3  ;;  %v3185_v9 = vrot.slane %v3735_v28, 9 }
  0xc5   : > { %v4080_v29 = vpack.c.b16 %v1601_v0, %v1600_v18  ;;  %v4122_v18 = vpop.f32.mrf.mxu0  ;;  %v4124_v0 = vpack.c.b16 %v1286_v22, %v1285_v41  ;;  %v1604_v2 = vunpack.c.l.b16 %v1520_v1  ;;  %5093 = vst [vmem:[#allocation30_spill] sm:$0xff] %v4134_v6  ;;  %v1528_v41 = vrot.slane %v1526_v54, 4 }
  0xc6   : > { %v1523_v42 = vsel %vm4001_vm9, %v1521_v8, %v1522_v27  ;;  %v1529_v22 = vrot.slane %v3739_v36, 5  ;;  %v4159_v27 = vpack.c.b16 %v1288_v31, %v1287_v32  ;;  %v1527_v1 = vsel %vm4001_vm9, %v3185_v9, %v1526_v54 }
  0xc7   : > { %3212 = vmatmul.msk.bf16.gmra.mxu3 %vm1101_vm4, %v4030_v44  ;;  %v1605_v45 = vunpack.c.l.b16 %v1523_v42  ;;  %v1606_v28 = vunpack.c.l.b16 %v1527_v1  ;;  %v1533_v31 = vrot.slane %v3877_v16, 5  ;;  %v3186_v1 = vrot.slane %v3875_v21, 9 }
  0xc8   : > { %3165 = vmatmul.msk.bf16.gmra.mxu1 %vm1101_vm4, %v4030_v44  ;;  %5095 = vst [vmem:[#allocation32_spill] sm:$0xff] %v4159_v27  ;;  %v1530_v34 = vsel %vm4001_vm9, %v1528_v41, %v1529_v22  ;;  %v1289_v41 = vunpack.c.l.b16 %v3875_v21  ;;  %v1290_v22 = vunpack.c.l.b16 %v3877_v16 }
  0xc9   : > { %v4142_v11 = vpack.c.b16 %v1605_v45, %v1604_v2  ;;  %v1607_v2 = vunpack.c.l.b16 %v1530_v34  ;;  %v1535_v34 = vrot.slane %v1533_v31, 4 }
  0xca   : > { %v4126_v63 = vpop.f32.mrf.mxu1  ;;  %v4192_v3 = vpack.c.b16 %v1290_v22, %v1289_v41  ;;  %v1540_v22 = vrot.slane %v3503_v59, 5 }
  0xcb   : > { %v4173_v45 = vpack.c.b16 %v1607_v2, %v1606_v28  ;;  %v1536_v28 = vrot.slane %v3879_v7, 5 }
  0xcc   : > { %5098 = vst [vmem:[#allocation35_spill] sm:$0xff] %v4192_v3 }
  0xcd   : > { %v4140_v12 = vpop.f32.mrf.mxu0  ;;  %5096 = vst [vmem:[#allocation33_spill] sm:$0xff] %v4173_v45 }
  0xcf   : > { %3197 = vmatmul.msk.bf16.gmra.mxu2 %vm1101_vm4, %v4046_v19 }
  0xd0   : > { %3228 = vmatmul.msk.bf16.gmra.mxu0 %vm1101_vm4, %v3884_v61 }
  0xd2   : > { %v4138_v51 = vpop.f32.mrf.mxu2 }
  0xd7   : > { %3213 = vmatmul.msk.bf16.gmra.mxu3 %vm1101_vm4, %v4068_v4 }
  0xd8   : > { %3166 = vmatmul.msk.bf16.gmra.mxu1 %vm1101_vm4, %v4068_v4 }
  0xda   : > { %v4157_v8 = vpop.f32.mrf.mxu2 }
  0xdb   : > { %v4155_v5 = vpop.f32.mrf.mxu3 }
  0xdc   : > { %5094 = vst [vmem:[#allocation31_spill] sm:$0xff] %v4155_v5  ;;  %v1537_v5 = vsel %vm4001_vm9, %v1535_v34, %v1536_v28  ;;  %v1292_v34 = vunpack.c.l.b16 %v3503_v59  ;;  %v1542_v28 = vrot.slane %v1540_v22, 4 }
  0xdf   : > { %3198 = vmatmul.msk.bf16.gmra.mxu2 %vm1101_vm4, %v4080_v29  ;;  %v4165_v42 = vpop.f32.mrf.mxu0 }
  0xe0   : > { %3229 = vmatmul.msk.bf16.gmra.mxu0 %vm1101_vm4, %v4022_v15 }
  0xe3   : > { %v4175_v32 = vpop.f32.mrf.mxu3 }
  0xe4   : > { %5097 = vst [vmem:[#allocation34_spill] sm:$0xff] %v4175_v32  ;;  %v1534_v32 = vsel %vm4001_vm9, %v3186_v1, %v1533_v31  ;;  %v1291_v1 = vunpack.c.l.b16 %v3494_v56 }
  0xe5   : > { %v1608_v21 = vunpack.c.l.b16 %v1534_v32 }
  0xe7   : > { %3214 = vmatmul.msk.bf16.gmra.mxu3 %vm1101_vm4, %v4093_v47  ;;  %v4180_v9 = vpop.f32.mrf.mxu0 }
  0xe8   : > { %3167 = vmatmul.msk.bf16.gmra.mxu1 %vm1101_vm4, %v4093_v47 }
  0xe9   : > { %v4145_v52 = vpop.f32.mrf.mxu1 }
  0xef   : > { %3199 = vmatmul.msk.bf16.gmra.mxu2 %vm1101_vm4, %v4107_v62 }
  0xf0   : > { %3230 = vmatmul.msk.bf16.gmra.mxu0 %vm1101_vm4, %v3519_v24 }
  0xf1   : > { %v4169_v36 = vpop.f32.mrf.mxu1 }
  0xf7   : > { %3215 = vmatmul.msk.bf16.gmra.mxu3 %vm1101_vm4, %v4124_v0 }
  0xf8   : > { %3168 = vmatmul.msk.bf16.gmra.mxu1 %vm1101_vm4, %v4124_v0  ;;  %v4177_v54 = vpop.f32.mrf.mxu2 }
  0xff   : > { %3200 = vmatmul.msk.bf16.gmra.mxu2 %vm1101_vm4, %v4142_v11 }
 0x100   : > { %3231 = vmatmul.msk.bf16.gmra.mxu0 %vm1101_vm4, %v3647_v49  ;;  %v4200_v16 = vpop.f32.mrf.mxu2 }
 0x102   : > { %v4198_v6 = vpop.f32.mrf.mxu3 }
 0x103   : > { %5099 = vst [vmem:[#allocation36_spill] sm:$0xff] %v4198_v6 }
 0x106   : > { %v4206_v7 = vpop.f32.mrf.mxu0 }
 0x107   : > { %3216 = vmatmul.msk.bf16.gmra.mxu3 %vm1101_vm4, %v4159_v27 }
 0x108   : > { %3169 = vmatmul.msk.bf16.gmra.mxu1 %vm1101_vm4, %v4159_v27 }
 0x10e   : > { %v4225_v6 = vpop.f32.mrf.mxu0 }
 0x10f   : > { %3201 = vmatmul.msk.bf16.gmra.mxu2 %vm1101_vm4, %v4173_v45  ;;  %v1609_v45 = vunpack.c.l.b16 %v1537_v5  ;;  %v4219_v5 = vpop.f32.mrf.mxu3 }
 0x110   : > { %3232 = vmatmul.msk.bf16.gmra.mxu0 %vm1101_vm4, %v3782_v10  ;;  %5101 = vst [vmem:[#allocation38_spill] sm:$0xff] %v4219_v5 }
 0x111   : > { %v4208_v41 = vpack.c.b16 %v1609_v45, %v1608_v21  ;;  %v3187_v45 = vrot.slane %v3494_v56, 9  ;;  %v1543_v21 = vrot.slane %v3505_v60, 5 }
 0x112   : > { %v4190_v2 = vpop.f32.mrf.mxu1 }
 0x113   : > { %5100 = vst [vmem:[#allocation37_spill] sm:$0xff] %v4208_v41  ;;  %v1544_v59 = vsel %vm4001_vm9, %v1542_v28, %v1543_v21  ;;  %v1294_v28 = vunpack.c.l.b16 %v3630_v25  ;;  %v3188_v21 = vrot.slane %v3628_v23, 9 }
 0x114   : > { %v1611_v10 = vunpack.c.l.b16 %v1544_v59 }
 0x117   : > { %3217 = vmatmul.msk.bf16.gmra.mxu3 %vm1101_vm4, %v4192_v3 }
 0x118   : > { %3170 = vmatmul.msk.bf16.gmra.mxu1 %vm1101_vm4, %v4192_v3  ;;  %v4227_v3 = vpack.c.b16 %v1292_v34, %v1291_v1 }
 0x11a   : > { %v4210_v31 = vpop.f32.mrf.mxu1  ;;  %5102 = vst [vmem:[#allocation39_spill] sm:$0xff] %v4227_v3 }
 0x11f   : > { %3202 = vmatmul.msk.bf16.gmra.mxu2 %vm1101_vm4, %v4208_v41  ;;  %v1541_v41 = vsel %vm4001_vm9, %v3187_v45, %v1540_v22  ;;  %v1547_v22 = vrot.slane %v3630_v25, 5 }
 0x120   : > { %3233 = vmatmul.msk.bf16.gmra.mxu0 %vm1101_vm4, %v3922_v50  ;;  %v4221_v32 = vpop.f32.mrf.mxu2  ;;  %v1610_v5 = vunpack.c.l.b16 %v1541_v41  ;;  %v1293_v41 = vunpack.c.l.b16 %v3628_v23 }
 0x121   : > { %v1549_v59 = vrot.slane %v1547_v22, 4  ;;  %v1548_v27 = vsel %vm4001_vm9, %v3188_v21, %v1547_v22 }
 0x122   : > { %v4241_v1 = vpack.c.b16 %v1611_v10, %v1610_v5  ;;  %v1550_v10 = vrot.slane %v3634_v26, 5  ;;  %v4257_v48 = vpack.c.b16 %v1294_v28, %v1293_v41  ;;  %v1612_v26 = vunpack.c.l.b16 %v1548_v27 }
 0x123   : > { %v1295_v27 = vunpack.c.l.b16 %v3763_v37 }
 0x124   : > { %5104 = vst [vmem:[#allocation41_spill] sm:$0xff] %v4241_v1  ;;  %v1551_v25 = vsel %vm4001_vm9, %v1549_v59, %v1550_v10  ;;  %v1554_v59 = vrot.slane %v3765_v39, 5 }
 0x125   : > { %v1383_v50 = vpop.f32.mrf.mxu1 }
 0x126   : > { %v1384_v5 = vadd.f32 %v1383_v50, %v4122_v18  ;;  %v1613_v50 = vunpack.c.l.b16 %v1551_v25  ;;  %v1296_v25 = vunpack.c.l.b16 %v3765_v39 }
 0x127   : > { %3218 = vmatmul.msk.bf16.gmra.mxu3 %vm1101_vm4, %v4227_v3 }
 0x128   : > { %v4235_v56 = vpop.f32.mrf.mxu2  ;;  %3171 = vmatmul.msk.bf16.gmra.mxu1 %vm1101_vm4, %v4227_v3  ;;  %v4270_v21 = vpack.c.b16 %v1613_v50, %v1612_v26 }
 0x12a   : > { %v4239_v60 = vpop.f32.mrf.mxu3  ;;  %5106 = vst [vmem:[#allocation43_spill] sm:$0xff] %v4270_v21 }
 0x12b   : > { %5103 = vst [vmem:[#allocation40_spill] sm:$0xff] %v4239_v60 }
 0x12d   : > { %v4244_v34 = vpop.f32.mrf.mxu0  ;;  %v1385_v45 = vpop.f32.mrf.mxu1 }
 0x12e   : > { %v1386_v18 = vadd.f32 %v1385_v45, %v4140_v12  ;;  %v3189_v12 = vrot.slane %v3763_v37, 9  ;;  %v1557_v45 = vrot.slane %v3769_v43, 5 }
 0x12f   : > { %3203 = vmatmul.msk.bf16.gmra.mxu2 %vm1101_vm4, %v4241_v1 }
 0x130   : > { %3234 = vmatmul.msk.bf16.gmra.mxu0 %vm1101_vm4, %v3558_v55 }
 0x132   : > { %v4255_v60 = vpop.f32.mrf.mxu3  ;;  %v1702_v3 = vpop.f32.mrf.mxu2 }
 0x133   : > { %5105 = vst [vmem:[#allocation42_spill] sm:$0xff] %v4255_v60  ;;  %v1782_v1 = vadd.f32 %v1702_v3, %v1384_v5 }
 0x135   : > { %v4263_v55 = vpop.f32.mrf.mxu0  ;;  %v1388_v23 = vpop.f32.mrf.mxu1 }
 0x136   : > { %v1389_v26 = vadd.f32 %v1388_v23, %v4165_v42 }
 0x137   : > { %3219 = vmatmul.msk.bf16.gmra.mxu3 %vm1101_vm4, %v4257_v48 }
 0x138   : > { %3172 = vmatmul.msk.bf16.gmra.mxu1 %vm1101_vm4, %v4257_v48 }
 0x13a   : > { %v1834_v3 = vpop.f32.mrf.mxu3  ;;  %v1704_v41 = vpop.f32.mrf.mxu2 }
 0x13b   : > { %v1914_v28 = vadd.f32 %v1834_v3, %v1782_v1  ;;  %v1783_v22 = vadd.f32 %v1704_v41, %v1386_v18  ;;  %v1556_v1 = vrot.slane %v1554_v59, 4  ;;  %v4284_v41 = vpack.c.b16 %v1296_v25, %v1295_v27 }
 0x13d   : > { %v1988_v10 = vpop.f32.mrf.mxu0  ;;  %v1390_v5 = vpop.f32.mrf.mxu1  ;;  %v1558_v39 = vsel %vm4001_vm9, %v1556_v1, %v1557_v45 }
 0x13e   : > { %v4273_v60 = vadd.f32 %v1988_v10, %v1914_v28  ;;  %v1555_v10 = vsel %vm4001_vm9, %v3189_v12, %v1554_v59  ;;  %v1615_v42 = vunpack.c.l.b16 %v1558_v39  ;;  %v1391_v23 = vadd.f32 %v1390_v5, %v4180_v9 }
 0x13f   : > { %3204 = vmatmul.msk.bf16.gmra.mxu2 %vm1101_vm4, %v4270_v21  ;;  %v1614_v43 = vunpack.c.l.b16 %v1555_v10  ;;  %v1298_v9 = vunpack.c.l.b16 %v3905_v14  ;;  %v3190_v5 = vrot.slane %v3903_v57, 9 }
 0x140   : > { %5107 = vst [vmem:[#allocation44_spill] sm:$0xff] %v4273_v60  ;;  %3235 = vmatmul.msk.bf16.gmra.mxu0 %vm1101_vm4, %v3680_v38 }
 0x141   : > { %v4298_v12 = vpack.c.b16 %v1615_v42, %v1614_v43 }
 0x142   : > { %v1836_v50 = vpop.f32.mrf.mxu3  ;;  %v1707_v18 = vpop.f32.mrf.mxu2 }
 0x143   : > { %v1915_v3 = vadd.f32 %v1836_v50, %v1783_v22  ;;  %v1784_v28 = vadd.f32 %v1707_v18, %v1389_v26  ;;  %v1297_v26 = vunpack.c.l.b16 %v3903_v57  ;;  %v5108_v18 = vld [vmem:[#allocation20_spill] sm:$0xff] }
 0x145   : > { %v1990_v60 = vpop.f32.mrf.mxu0  ;;  %v1393_v21 = vpop.f32.mrf.mxu1  ;;  %v4312_v39 = vpack.c.b16 %v1298_v9, %v1297_v26  ;;  %v5109_v9 = vld [vmem:[#allocation5_spill] sm:$0xff] }
 0x146   : > { %v1394_v37 = vadd.f32 %v1393_v21, %v4206_v7  ;;  %v4291_v38 = vadd.f32 %v1990_v60, %v1915_v3  ;;  %v1561_v7 = vrot.slane %v3905_v14, 5  ;;  %v1564_v3 = vrot.slane %v5108_v18, 5 }
 0x147   : > { %3220 = vmatmul.msk.bf16.gmra.mxu3 %vm1101_vm4, %v4284_v41 }
 0x148   : > { %3173 = vmatmul.msk.bf16.gmra.mxu1 %vm1101_vm4, %v4284_v41  ;;  %v1563_v50 = vrot.slane %v1561_v7, 4  ;;  %v1562_v42 = vsel %vm4001_vm9, %v3190_v5, %v1561_v7  ;;  %v1568_v5 = vrot.slane %v5109_v9, 5 }
 0x14a   : > { %v1839_v22 = vpop.f32.mrf.mxu3  ;;  %v1709_v59 = vpop.f32.mrf.mxu2  ;;  %v1565_v14 = vsel %vm4001_vm9, %v1563_v50, %v1564_v3 }
 0x14b   : > { %v1916_v27 = vadd.f32 %v1839_v22, %v1784_v28  ;;  %v1785_v25 = vadd.f32 %v1709_v59, %v1391_v23 }
 0x14d   : > { %v1993_v60 = vpop.f32.mrf.mxu0  ;;  %v1395_v21 = vpop.f32.mrf.mxu1 }
 0x14e   : > { %v1396_v1 = vadd.f32 %v1395_v21, %v4225_v6  ;;  %v4302_v45 = vadd.f32 %v1993_v60, %v1916_v27  ;;  %v1616_v27 = vunpack.c.l.b16 %v1562_v42  ;;  %v5112_v42 = vld [vmem:[#allocation6_spill] sm:$0xff] }
 0x14f   : > { %3205 = vmatmul.msk.bf16.gmra.mxu2 %vm1101_vm4, %v4298_v12 }
 0x150   : > { %3236 = vmatmul.msk.bf16.gmra.mxu0 %vm1101_vm4, %v3815_v53 }
 0x152   : > { %v1841_v28 = vpop.f32.mrf.mxu3  ;;  %v1712_v10 = vpop.f32.mrf.mxu2 }
 0x153   : > { %v1917_v6 = vadd.f32 %v1841_v28, %v1785_v25  ;;  %v1786_v43 = vadd.f32 %v1712_v10, %v1394_v37  ;;  %v1617_v25 = vunpack.c.l.b16 %v1565_v14  ;;  %v5111_v28 = vld [vmem:[#allocation4_spill] sm:$0xff]  ;;  %v1571_v14 = vrot.slane %v5112_v42, 5 }
 0x154   : > { %v1299_v10 = vunpack.c.l.b16 %v5111_v28 }
 0x155   : > { %v1995_v23 = vpop.f32.mrf.mxu0  ;;  %v1398_v22 = vpop.f32.mrf.mxu1  ;;  %v4325_v26 = vpack.c.b16 %v1617_v25, %v1616_v27 }
 0x156   : > { %v1399_v59 = vadd.f32 %v1398_v22, %v4244_v34  ;;  %v4319_v57 = vadd.f32 %v1995_v23, %v1917_v6  ;;  %v1300_v6 = vunpack.c.l.b16 %v5109_v9 }
 0x157   : > { %3221 = vmatmul.msk.bf16.gmra.mxu3 %vm1101_vm4, %v4312_v39 }
 0x158   : > { %3174 = vmatmul.msk.bf16.gmra.mxu1 %vm1101_vm4, %v4312_v39  ;;  %v4339_v27 = vpack.c.b16 %v1300_v6, %v1299_v10 }
 0x15a   : > { %v1844_v37 = vpop.f32.mrf.mxu3  ;;  %v1714_v60 = vpop.f32.mrf.mxu2  ;;  %5113 = vst [vmem:[#allocation5_spill] sm:$0xff] %v4339_v27 }
 0x15b   : > { %v1918_v7 = vadd.f32 %v1844_v37, %v1786_v43  ;;  %v1787_v21 = vadd.f32 %v1714_v60, %v1396_v1  ;;  %v3191_v1 = vrot.slane %v5111_v28, 9  ;;  %v1570_v43 = vrot.slane %v1568_v5, 4 }
 0x15d   : > { %v1998_v50 = vpop.f32.mrf.mxu0  ;;  %v1400_v34 = vpop.f32.mrf.mxu1  ;;  %v1569_v37 = vsel %vm4001_vm9, %v3191_v1, %v1568_v5  ;;  %v1572_v60 = vsel %vm4001_vm9, %v1570_v43, %v1571_v14  ;;  %v5116_v1 = vld [vmem:[#allocation11_spill] sm:$0xff] }
 0x15e   : > { %v1401_v18 = vadd.f32 %v1400_v34, %v4263_v55  ;;  %v4329_v3 = vadd.f32 %v1998_v50, %v1918_v7  ;;  %v1618_v34 = vunpack.c.l.b16 %v1569_v37  ;;  %v1619_v28 = vunpack.c.l.b16 %v1572_v60  ;;  %v5119_v60 = vld [vmem:[#allocation9_spill] sm:$0xff] }
 0x15f   : > { %3206 = vmatmul.msk.bf16.gmra.mxu2 %vm1101_vm4, %v4325_v26  ;;  %v1575_v43 = vrot.slane %v5116_v1, 5  ;;  %v1302_v37 = vunpack.c.l.b16 %v5116_v1 }
 0x160   : > { %5110 = vst [vmem:[#allocation20_spill] sm:$0xff] %v4329_v3  ;;  %3237 = vmatmul.msk.bf16.gmra.mxu0 %vm1101_vm4, %v3955_v13  ;;  %v4351_v5 = vpack.c.b16 %v1619_v28, %v1618_v34 }
 0x162   : > { %v1846_v23 = vpop.f32.mrf.mxu3  ;;  %v1717_v22 = vpop.f32.mrf.mxu2  ;;  %5115 = vst [vmem:[#allocation6_spill] sm:$0xff] %v4351_v5 }
 0x163   : > { %v1919_v55 = vadd.f32 %v1846_v23, %v1787_v21  ;;  %v1788_v25 = vadd.f32 %v1717_v22, %v1399_v59  ;;  %v5118_v22 = vld [vmem:[#allocation10_spill] sm:$0xff] }
 0x165   : > { %v2000_v7 = vpop.f32.mrf.mxu0  ;;  %v1403_v9 = vpop.f32.mrf.mxu1 }
 0x166   : > { %v4345_v50 = vadd.f32 %v2000_v7, %v1919_v55  ;;  %v1301_v55 = vunpack.c.l.b16 %v5118_v22  ;;  %v5120_v7 = vld [vmem:[#allocation12_spill] sm:$0xff]  ;;  %v1404_v28 = vadd.f32 %v1403_v9, %v4076_v46 }
 0x167   : > { %3222 = vmatmul.msk.bf16.gmra.mxu3 %vm1101_vm4, %v4339_v27  ;;  %v1578_v34 = vrot.slane %v5120_v7, 5  ;;  %v5124_v7 = vld [vmem:[#allocation17_spill] sm:$0xff] }
 0x168   : > { %5114 = vst [vmem:[#allocation4_spill] sm:$0xff] %v4345_v50  ;;  %3175 = vmatmul.msk.bf16.gmra.mxu1 %vm1101_vm4, %v4339_v27 }
 0x16a   : > { %v1849_v21 = vpop.f32.mrf.mxu3  ;;  %v1719_v59 = vpop.f32.mrf.mxu2 }
 0x16b   : > { %v1920_v10 = vadd.f32 %v1849_v21, %v1788_v25  ;;  %v1789_v6 = vadd.f32 %v1719_v59, %v1401_v18  ;;  %v3192_v18 = vrot.slane %v5118_v22, 9  ;;  %v1577_v25 = vrot.slane %v1575_v43, 4 }
 0x16d   : > { %v2003_v42 = vpop.f32.mrf.mxu0  ;;  %v1405_v14 = vpop.f32.mrf.mxu1  ;;  %v1576_v50 = vsel %vm4001_vm9, %v3192_v18, %v1575_v43  ;;  %v1579_v1 = vsel %vm4001_vm9, %v1577_v25, %v1578_v34 }
 0x16e   : > { %v4354_v23 = vadd.f32 %v2003_v42, %v1920_v10  ;;  %v4365_v42 = vpack.c.b16 %v1302_v37, %v1301_v55  ;;  %v1620_v46 = vunpack.c.l.b16 %v1576_v50  ;;  %v1621_v9 = vunpack.c.l.b16 %v1579_v1 }
 0x16f   : > { %3207 = vmatmul.msk.bf16.gmra.mxu2 %vm1101_vm4, %v4351_v5 }
 0x170   : > { %5117 = vst [vmem:[#allocation11_spill] sm:$0xff] %v4354_v23  ;;  %3238 = vmatmul.msk.bf16.gmra.mxu0 %vm1101_vm4, %v5119_v60  ;;  %v4378_v25 = vpack.c.b16 %v1621_v9, %v1620_v46  ;;  %v5127_v46 = vld [vmem:[#allocation14_spill] sm:$0xff] }
 0x171   : > { %5121 = vst [vmem:[#allocation10_spill] sm:$0xff] %v4365_v42  ;;  %v3329_v9 = vld [vmem:[%s4993_s2] ss:$0 sm:$0xff] }
 0x172   : > { %v1851_v21 = vpop.f32.mrf.mxu3  ;;  %v1722_v59 = vpop.f32.mrf.mxu2  ;;  %5123 = vst [vmem:[#allocation45_spill] sm:$0xff] %v4378_v25 }
 0x173   : > { %v1921_v10 = vadd.f32 %v1851_v21, %v1789_v6  ;;  %v1790_v23 = vadd.f32 %v1722_v59, %v1404_v28  ;;  %v1406_v6 = vadd.f32 %v1405_v14, %v4091_v20  ;;  %v247_v21 = vld [vmem:[%s3442_s24 + $0x180] sm:$0xff]  ;;  %v5125_v59 = vld [vmem:[#allocation16_spill] sm:$0xff] }
 0x174   : > { %v1303_v50 = vunpack.c.l.b16 %v5125_v59  ;;  %v3193_v20 = vrot.slane %v5125_v59, 9 }
 0x175   : > { %v2005_v5 = vpop.f32.mrf.mxu0  ;;  %v1408_v22 = vpop.f32.mrf.mxu1 }
 0x176   : > { %v4371_v60 = vadd.f32 %v2005_v5, %v1921_v10  ;;  %v1582_v5 = vrot.slane %v5124_v7, 5  ;;  %v1304_v10 = vunpack.c.l.b16 %v5124_v7  ;;  %v248_v7 = vld [vmem:[%s3442_s24 + $0x188] sm:$0xff] }
 0x177   : > { %3223 = vmatmul.msk.bf16.gmra.mxu3 %vm1101_vm4, %v4365_v42  ;;  %v306_v27 = vadd.f32 %v3329_v9, %v248_v7 }
 0x178   : > { %5122 = vst [vmem:[#allocation12_spill] sm:$0xff] %v4371_v60  ;;  %3176 = vmatmul.msk.bf16.gmra.mxu1 %vm1101_vm4, %v4365_v42  ;;  %v1584_v14 = vrot.slane %v1582_v5, 4 }
 0x179   : > { %vm414_vm11 = vcmp.lt.f32.partialorder %v306_v27, 0.0  ;;  %vm360_vm12 = vcmp.gt.f32.partialorder %v306_v27, 0.0 }
 0x17a   : > { %v1854_v55 = vpop.f32.mrf.mxu3  ;;  %v1724_v43 = vpop.f32.mrf.mxu2 }
 0x17b   : > { %v1922_v37 = vadd.f32 %v1854_v55, %v1790_v23  ;;  %v1791_v18 = vadd.f32 %v1724_v43, %v1406_v6  ;;  %v5126_v23 = vld [vmem:[#allocation18_spill] sm:$0xff]  ;;  %v305_v6 = vadd.f32 %v3329_v9, %v247_v21  ;;  %v1409_v43 = vadd.f32 %v1408_v22, %v4105_v33 }
 0x17c   : > { %v1585_v1 = vrot.slane %v5126_v23, 5  ;;  %v5130_v22 = vmov 0.0  }
 0x17d   : > { %v2008_v34 = vpop.f32.mrf.mxu0  ;;  %v1410_v28 = vpop.f32.mrf.mxu1  ;;  %vm413_vm0 = vcmp.lt.f32.partialorder %v305_v6, 0.0  ;;  %vm359_vm10 = vcmp.gt.f32.partialorder %v305_v6, 0.0  ;;  %v468_v6 = vsel %vm414_vm11, -1.0, %v5130_v22 }
 0x17e   : > { %v4393_v55 = vadd.f32 %v2008_v34, %v1922_v37  ;;  %v1586_v3 = vsel %vm4001_vm9, %v1584_v14, %v1585_v1  ;;  %v249_v34 = vld [vmem:[%s3442_s24 + $0x190] sm:$0x3] }
 0x17f   : > { %3208 = vmatmul.msk.bf16.gmra.mxu2 %vm1101_vm4, %v4378_v25  ;;  %v4397_v25 = vpack.c.b16 %v1304_v10, %v1303_v50  ;;  %v1623_v33 = vunpack.c.l.b16 %v1586_v3  ;;  %v1411_v50 = vadd.f32 %v1410_v28, %v4126_v63  ;;  %v5136_v28 = vld [vmem:[#allocation22_spill] sm:$0xff] }
 0x180   : > { %3239 = vmatmul.msk.bf16.gmra.mxu0 %vm1101_vm4, %v5127_v46  ;;  %5128 = vst [vmem:[#allocation17_spill] sm:$0xff] %v4393_v55  ;;  %v1583_v46 = vsel %vm4001_vm9, %v3193_v20, %v1582_v5 }
 0x181   : > { %5129 = vst [vmem:[#allocation16_spill] sm:$0xff] %v4397_v25  ;;  %v1622_v55 = vunpack.c.l.b16 %v1583_v46 }
 0x182   : > { %v1856_v60 = vpop.f32.mrf.mxu3  ;;  %v1727_v59 = vpop.f32.mrf.mxu2 }
 0x183   : > { %v1923_v42 = vadd.f32 %v1856_v60, %v1791_v18  ;;  %v1792_v23 = vadd.f32 %v1727_v59, %v1409_v43  ;;  %v467_v60 = vsel %vm413_vm0, -1.0, %v5130_v22  ;;  %v307_v18 = vadd.f32 %v3329_v9, %v249_v34  ;;  %v5133_v43 = vld [vmem:[#allocation23_spill] sm:$0xff] }
 0x184   : > { %v4412_v14 = vpack.c.b16 %v1623_v33, %v1622_v55  ;;  %v521_v3 = vsel %vm359_vm10, 1.0, %v467_v60  ;;  %v1589_v7 = vrot.slane %v5133_v43, 5  ;;  %v1305_v55 = vunpack.c.l.b16 %v5136_v28  ;;  %v5137_v34 = vld [vmem:[#allocation19_spill] sm:$0xff] }
 0x185   : > { %v2010_v21 = vpop.f32.mrf.mxu0  ;;  %v1413_v37 = vpop.f32.mrf.mxu1  ;;  %vm415_vm13 = vcmp.lt.f32.partialorder %v307_v18, 0.0  ;;  %v1306_v27 = vunpack.c.l.b16 %v5133_v43  ;;  %vm361_vm14 = vcmp.gt.f32.partialorder %v307_v18, 0.0  ;;  %v3194_v33 = vrot.slane %v5136_v28, 9 }
 0x186   : > { %v4409_v5 = vadd.f32 %v2010_v21, %v1923_v42  ;;  %5132 = vst [vmem:[#allocation46_spill] sm:$0xff] %v4412_v14  ;;  %v597_v42 = vsel %vm531_vm1, %v521_v3, 0.0  ;;  %v522_v21 = vsel %vm360_vm12, 1.0, %v468_v6  ;;  %v1591_v60 = vrot.slane %v1589_v7, 4 }
 0x187   : > { %3224 = vmatmul.msk.bf16.gmra.mxu3 %vm1101_vm4, %v4397_v25  ;;  %v1414_v3 = vadd.f32 %v1413_v37, %v4145_v52  ;;  %v4434_v9 = vpack.c.b16 %v1306_v27, %v1305_v55  ;;  %vm2711_vm1 = vcmask 1046528  }
 0x188   : > { %3177 = vmatmul.msk.bf16.gmra.mxu1 %vm1101_vm4, %v4397_v25  ;;  %5131 = vst [vmem:[#allocation18_spill] sm:$0xff] %v4409_v5 }
 0x189   : > { %5139 = vst [vmem:[#allocation2_spill] sm:$0xff] %v4434_v9 }
 0x18a   : > { %v1859_v10 = vpop.f32.mrf.mxu3  ;;  %v1729_v20 = vpop.f32.mrf.mxu2 }
 0x18b   : > { %v1924_v1 = vadd.f32 %v1859_v10, %v1792_v23  ;;  %v1793_v46 = vadd.f32 %v1729_v20, %v1411_v50  ;;  %v469_v23 = vsel %vm415_vm13, -1.0, %v5130_v22  ;;  %v5138_v50 = vld [vmem:[#allocation24_spill] sm:$0xff]  ;;  %v4429_v20 = vpack.c.bf16 %v597_v42, %v597_v42 }
 0x18c   : > { %v1592_v10 = vrot.slane %v5138_v50, 5  ;;  %v523_v43 = vsel %vm361_vm14, 1.0, %v469_v23 }
 0x18d   : > { %v2013_v59 = vpop.f32.mrf.mxu0  ;;  %v1415_v25 = vpop.f32.mrf.mxu1  ;;  %v1947_v42 = vshrl.u32 %v4429_v20, 16  ;;  %v599_v37 = vsel %vm542_vm2, %v523_v43, 0.0 }
 0x18e   : > { %v4418_v63 = vadd.f32 %v2013_v59, %v1924_v1  ;;  %v4432_v1 = vpack.c.bf16 %v522_v21, %v522_v21  ;;  %v1593_v28 = vsel %vm4001_vm9, %v1591_v60, %v1592_v10  ;;  %v1950_v21 = vshll.u32 %v4429_v20, 16 }
 0x18f   : > { %3209 = vmatmul.msk.bf16.gmra.mxu2 %vm1101_vm4, %v4412_v14  ;;  %v1625_v23 = vunpack.c.l.b16 %v1593_v28  ;;  %v1949_v60 = vrot.slane %v1947_v42, 4  ;;  %v1416_v10 = vadd.f32 %v1415_v25, %v4169_v36  ;;  %v1816_v36 = vunpack.c.l.b16 %v4429_v20  ;;  %v5142_v42 = vld [vmem:[#allocation25_spill] sm:$0xff] }
 0x190   : > { %5135 = vst [vmem:[#allocation23_spill] sm:$0xff] %v4418_v63  ;;  %3240 = vmatmul.msk.bf16.gmra.mxu0 %vm1101_vm4, %v5137_v34  ;;  %v1590_v63 = vsel %vm4001_vm9, %v3194_v33, %v1589_v7  ;;  %v1960_v55 = vshrl.u32 %v4432_v1, 16  ;;  %v4452_v33 = vpack.c.bf16 %v599_v37, %v599_v37  ;;  %v1817_v25 = vunpack.c.l.b16 %v4432_v1 }
 0x191   : > { %v1624_v7 = vunpack.c.l.b16 %v1590_v63 }
 0x192   : > { %v1861_v6 = vpop.f32.mrf.mxu3  ;;  %v1732_v59 = vpop.f32.mrf.mxu2  ;;  %v1966_v14 = vshll.u32 %v4452_v33, 16 }
 0x193   : > { %v1925_v18 = vadd.f32 %v1861_v6, %v1793_v46  ;;  %v1794_v22 = vadd.f32 %v1732_v59, %v1414_v3  ;;  %v1956_v46 = vshll.u32 %v4432_v1, 16  ;;  %v1952_v3 = vrot.slane %v1950_v21, 5 }
 0x194   : > { %v1962_v59 = vrot.slane %v1960_v55, 4  ;;  %v4455_v30 = vpack.c.b16 %v1625_v23, %v1624_v7  ;;  %v1968_v55 = vrot.slane %v1966_v14, 5 }
 0x195   : > { %v2015_v50 = vpop.f32.mrf.mxu0  ;;  %v1418_v5 = vpop.f32.mrf.mxu1  ;;  %v1958_v6 = vrot.slane %v1956_v46, 5  ;;  %v1953_v63 = vor.u32 %v1952_v3, %v1949_v60 }
 0x196   : > { %v4446_v27 = vadd.f32 %v2015_v50, %v1925_v18 }
 0x197   : > { %3225 = vmatmul.msk.bf16.gmra.mxu3 %vm1101_vm4, %v4434_v9  ;;  %v1963_v28 = vor.u32 %v1962_v59, %v1958_v6  ;;  %v1954_v21 = vrot.slane %v1953_v63, 4 }
 0x198   : > { %5141 = vst [vmem:[#allocation22_spill] sm:$0xff] %v4446_v27  ;;  %3178 = vmatmul.msk.bf16.gmra.mxu1 %vm1101_vm4, %v4434_v9 }
 0x199   : > { %v1964_v46 = vrot.slane %v1963_v28, 4  ;;  %v1959_v59 = vsel %vm3499_vm5, %v1954_v21, %v1958_v6 }
 0x19a   : > { %v1864_v43 = vpop.f32.mrf.mxu3  ;;  %v1734_v52 = vpop.f32.mrf.mxu2 }
 0x19b   : > { %v1926_v18 = vadd.f32 %v1864_v43, %v1794_v22  ;;  %v1795_v50 = vadd.f32 %v1734_v52, %v1416_v10  ;;  %v1419_v22 = vadd.f32 %v1418_v5, %v4190_v2  ;;  %v1969_v43 = vsel %vm3499_vm5, %v1964_v46, %v1968_v55 }
 0x19c   : > { %v1970_v2 = vunpack.c.l.b16 %v1959_v59  ;;  %v1971_v5 = vunpack.c.l.b16 %v1969_v43 }
 0x19d   : > { %v2018_v27 = vpop.f32.mrf.mxu0  ;;  %v1420_v9 = vpop.f32.mrf.mxu1 }
 0x19e   : > { %v4458_v37 = vadd.f32 %v2018_v27, %v1926_v18  ;;  %v4467_v27 = vpack.c.b16 %v1817_v25, %v1816_v36  ;;  %v1421_v14 = vadd.f32 %v1420_v9, %v4210_v31  ;;  %v4480_v36 = vpack.c.b16 %v1971_v5, %v1970_v2 }
 0x19f   : > { %3210 = vmatmul.msk.bf16.gmra.mxu2 %vm1101_vm4, %v4455_v30 }
 0x1a0   : > { %3241 = vmatmul.msk.bf16.gmra.mxu0 %vm1101_vm4, %v5142_v42 }
 0x1a2   : > { %v1866_v7 = vpop.f32.mrf.mxu3  ;;  %v1737_v23 = vpop.f32.mrf.mxu2 }
 0x1a3   : > { %v1927_v60 = vadd.f32 %v1866_v7, %v1795_v50  ;;  %v1796_v10 = vadd.f32 %v1737_v23, %v1419_v22 }
 0x1a5   : > { %v2020_v3 = vpop.f32.mrf.mxu0  ;;  %v1423_v52 = vpop.f32.mrf.mxu1 }
 0x1a6   : > { %v4473_v18 = vadd.f32 %v2020_v3, %v1927_v60 }
 0x1a7   : > { %3226 = vmatmul.msk.bf16.gmra.mxu3 %vm1101_vm4, %v4467_v27 }
 0x1a8   : > { %3244 = vmatmul.msk.bf16.vlgmr.msra.gmra.mxu1 %vm1101_vm4, %v4049_v35  ;;  %v1424_v35 = vadd.f32 %v1423_v52, %v4099_v17 }
 0x1aa   : > { %v1869_v50 = vpop.f32.mrf.mxu3  ;;  %v1739_v63 = vpop.f32.mrf.mxu2 }
 0x1ab   : > { %v1928_v28 = vadd.f32 %v1869_v50, %v1796_v10  ;;  %v1797_v6 = vadd.f32 %v1739_v63, %v1421_v14 }
 0x1ad   : > { %v2023_v58 = vpop.f32.mrf.mxu0  ;;  %v1425_v25 = vpop.f32.mrf.mxu1 }
 0x1ae   : > { %v4482_v22 = vadd.f32 %v2023_v58, %v1928_v28 }
 0x1af   : > { %3260 = vmatmul.msk.bf16.vlgmr.msra.gmra.mxu2 %vm1101_vm4, %v4030_v44  ;;  %v1426_v44 = vadd.f32 %v1425_v25, %v4112_v40 }
 0x1b0   : > { %3242 = vmatmul.msk.bf16.gmra.mxu0 %vm1101_vm4, %v4480_v36 }
 0x1b2   : > { %v1871_v21 = vpop.f32.mrf.mxu3  ;;  %v1742_v31 = vpop.f32.mrf.mxu2 }
 0x1b3   : > { %v1929_v9 = vadd.f32 %v1871_v21, %v1797_v6  ;;  %v1798_v46 = vadd.f32 %v1742_v31, %v1424_v35 }
 0x1b5   : > { %v2025_v55 = vpop.f32.mrf.mxu0  ;;  %v1428_v7 = vpop.f32.mrf.mxu1 }
 0x1b6   : > { %v4489_v23 = vadd.f32 %v2025_v55, %v1929_v9 }
 0x1b7   : > { %3276 = vmatmul.msk.bf16.vlgmr.msra.gmra.mxu3 %vm1101_vm4, %v3884_v61  ;;  %v1429_v61 = vadd.f32 %v1428_v7, %v4138_v51 }
 0x1b8   : > { %3245 = vmatmul.msk.bf16.gmra.mxu1 %vm1101_vm4, %v4046_v19 }
 0x1ba   : > { %v1874_v60 = vpop.f32.mrf.mxu3  ;;  %v1744_v10 = vpop.f32.mrf.mxu2 }
 0x1bb   : > { %v1930_v3 = vadd.f32 %v1874_v60, %v1798_v46  ;;  %v1799_v17 = vadd.f32 %v1744_v10, %v1426_v44 }
 0x1bd   : > { %v2028_v59 = vpop.f32.mrf.mxu0  ;;  %v1430_v43 = vpop.f32.mrf.mxu1 }
 0x1be   : > { %v4496_v52 = vadd.f32 %v2028_v59, %v1930_v3 }
 0x1bf   : > { %3261 = vmatmul.msk.bf16.gmra.mxu2 %vm1101_vm4, %v4068_v4  ;;  %v1431_v4 = vadd.f32 %v1430_v43, %v4157_v8 }
 0x1c0   : > { %3293 = vmatmul.msk.bf16.vlgmr.msra.gmra.mxu0 %vm1101_vm4, %v4046_v19 }
 0x1c2   : > { %v1876_v2 = vpop.f32.mrf.mxu3  ;;  %v1747_v5 = vpop.f32.mrf.mxu2 }
 0x1c3   : > { %v1931_v14 = vadd.f32 %v1876_v2, %v1799_v17  ;;  %v1800_v40 = vadd.f32 %v1747_v5, %v1429_v61 }
 0x1c5   : > { %v2030_v50 = vpop.f32.mrf.mxu0  ;;  %v1433_v63 = vpop.f32.mrf.mxu1 }
 0x1c6   : > { %v4503_v28 = vadd.f32 %v2030_v50, %v1931_v14 }
 0x1c7   : > { %3277 = vmatmul.msk.bf16.gmra.mxu3 %vm1101_vm4, %v4022_v15  ;;  %v1434_v15 = vadd.f32 %v1433_v63, %v4177_v54 }
 0x1c8   : > { %3246 = vmatmul.msk.bf16.gmra.mxu1 %vm1101_vm4, %v4080_v29 }
 0x1ca   : > { %v1879_v6 = vpop.f32.mrf.mxu3  ;;  %v1749_v19 = vpop.f32.mrf.mxu2 }
 0x1cb   : > { %v1932_v58 = vadd.f32 %v1879_v6, %v1800_v40  ;;  %v1801_v51 = vadd.f32 %v1749_v19, %v1431_v4 }
 0x1cd   : > { %v2033_v25 = vpop.f32.mrf.mxu0  ;;  %v1435_v35 = vpop.f32.mrf.mxu1 }
 0x1ce   : > { %v4510_v21 = vadd.f32 %v2033_v25, %v1932_v58  ;;  %v5143_v58 = vld [vmem:[#allocation32_spill] sm:$0xff] }
 0x1cf   : > { %3262 = vmatmul.msk.bf16.gmra.mxu2 %vm1101_vm4, %v4093_v47  ;;  %v1436_v47 = vadd.f32 %v1435_v35, %v4200_v16 }
 0x1d0   : > { %3294 = vmatmul.msk.bf16.gmra.mxu0 %vm1101_vm4, %v4080_v29 }
 0x1d2   : > { %v1881_v31 = vpop.f32.mrf.mxu3  ;;  %v1752_v9 = vpop.f32.mrf.mxu2 }
 0x1d3   : > { %v1933_v46 = vadd.f32 %v1881_v31, %v1801_v51  ;;  %v1802_v8 = vadd.f32 %v1752_v9, %v1434_v15 }
 0x1d5   : > { %v2035_v55 = vpop.f32.mrf.mxu0  ;;  %v1438_v7 = vpop.f32.mrf.mxu1 }
 0x1d6   : > { %v4517_v44 = vadd.f32 %v2035_v55, %v1933_v46  ;;  %v5146_v55 = vld [vmem:[#allocation33_spill] sm:$0xff] }
 0x1d7   : > { %3278 = vmatmul.msk.bf16.gmra.mxu3 %vm1101_vm4, %v3519_v24  ;;  %v1439_v24 = vadd.f32 %v1438_v7, %v4221_v32  ;;  %v5147_v7 = vld [vmem:[#allocation30_spill] sm:$0xff] }
 0x1d8   : > { %3247 = vmatmul.msk.bf16.gmra.mxu1 %vm1101_vm4, %v4107_v62 }
 0x1da   : > { %v1884_v60 = vpop.f32.mrf.mxu3  ;;  %v1754_v29 = vpop.f32.mrf.mxu2 }
 0x1db   : > { %v1934_v10 = vadd.f32 %v1884_v60, %v1802_v8  ;;  %v1803_v54 = vadd.f32 %v1754_v29, %v1436_v47  ;;  %v5145_v8 = vld [vmem:[#allocation15_spill] sm:$0xff] }
 0x1dd   : > { %v2038_v3 = vpop.f32.mrf.mxu0  ;;  %v1440_v17 = vpop.f32.mrf.mxu1 }
 0x1de   : > { %v4524_v59 = vadd.f32 %v2038_v3, %v1934_v10 }
 0x1df   : > { %3263 = vmatmul.msk.bf16.gmra.mxu2 %vm1101_vm4, %v4124_v0  ;;  %v1441_v0 = vadd.f32 %v1440_v17, %v4235_v56 }
 0x1e0   : > { %3295 = vmatmul.msk.bf16.gmra.mxu0 %vm1101_vm4, %v4107_v62 }
 0x1e2   : > { %v1886_v43 = vpop.f32.mrf.mxu3  ;;  %v1757_v61 = vpop.f32.mrf.mxu2 }
 0x1e3   : > { %v1935_v2 = vadd.f32 %v1886_v43, %v1803_v54  ;;  %v1804_v16 = vadd.f32 %v1757_v61, %v1439_v24  ;;  %v5148_v24 = vld [vmem:[#allocation35_spill] sm:$0xff] }
 0x1e4   : > { %v5149_v43 = vld [vmem:[#allocation31_spill] sm:$0xff] }
 0x1e5   : > { %v2040_v5 = vpop.f32.mrf.mxu0  ;;  %v1443_v14 = vpop.f32.mrf.mxu1 }
 0x1e6   : > { %v4531_v40 = vadd.f32 %v2040_v5, %v1935_v2 }
 0x1e7   : > { %3279 = vmatmul.msk.bf16.gmra.mxu3 %vm1101_vm4, %v3647_v49  ;;  %v5144_v49 = vld [vmem:[#allocation29_spill] sm:$0xff] }
 0x1e8   : > { %3248 = vmatmul.msk.bf16.gmra.mxu1 %vm1101_vm4, %v4142_v11  ;;  %v1444_v51 = vadd.f32 %v1443_v14, %v5144_v49 }
 0x1ea   : > { %v1889_v50 = vpop.f32.mrf.mxu3  ;;  %v1759_v62 = vpop.f32.mrf.mxu2 }
 0x1eb   : > { %v1936_v63 = vadd.f32 %v1889_v50, %v1804_v16  ;;  %v1805_v32 = vadd.f32 %v1759_v62, %v1441_v0 }
 0x1ed   : > { %v2043_v4 = vpop.f32.mrf.mxu0  ;;  %v1445_v6 = vpop.f32.mrf.mxu1 }
 0x1ee   : > { %v4538_v19 = vadd.f32 %v2043_v4, %v1936_v63  ;;  %v1446_v47 = vadd.f32 %v1445_v6, %v5147_v7  ;;  %v5150_v63 = vld [vmem:[#allocation21_spill] sm:$0xff]  ;;  %v5152_v4 = vld [vmem:[#allocation34_spill] sm:$0xff] }
 0x1ef   : > { %3264 = vmatmul.msk.bf16.gmra.mxu2 %vm1101_vm4, %v5143_v58 }
 0x1f0   : > { %3296 = vmatmul.msk.bf16.gmra.mxu0 %vm1101_vm4, %v4142_v11 }
 0x1f2   : > { %v1891_v25 = vpop.f32.mrf.mxu3  ;;  %v1762_v35 = vpop.f32.mrf.mxu2 }
 0x1f3   : > { %v1937_v15 = vadd.f32 %v1891_v25, %v1805_v32  ;;  %v1806_v56 = vadd.f32 %v1762_v35, %v1444_v51  ;;  %v5151_v32 = vld [vmem:[#allocation37_spill] sm:$0xff] }
 0x1f5   : > { %v2045_v31 = vpop.f32.mrf.mxu0  ;;  %v1448_v9 = vpop.f32.mrf.mxu1 }
 0x1f6   : > { %v4545_v46 = vadd.f32 %v2045_v31, %v1937_v15  ;;  %v1449_v61 = vadd.f32 %v1448_v9, %v5149_v43  ;;  %v5153_v31 = vld [vmem:[#allocation39_spill] sm:$0xff]  ;;  %v5154_v9 = vld [vmem:[#allocation36_spill] sm:$0xff] }
 0x1f7   : > { %3280 = vmatmul.msk.bf16.gmra.mxu3 %vm1101_vm4, %v5145_v8 }
 0x1f8   : > { %3249 = vmatmul.msk.bf16.gmra.mxu1 %vm1101_vm4, %v5146_v55 }
 0x1fa   : > { %v1894_v60 = vpop.f32.mrf.mxu3  ;;  %v1764_v11 = vpop.f32.mrf.mxu2 }
 0x1fb   : > { %v1938_v29 = vadd.f32 %v1894_v60, %v1806_v56  ;;  %v1807_v10 = vadd.f32 %v1764_v11, %v1446_v47 }
 0x1fd   : > { %v2048_v54 = vpop.f32.mrf.mxu0  ;;  %v1450_v3 = vpop.f32.mrf.mxu1 }
 0x1fe   : > { %v4552_v17 = vadd.f32 %v2048_v54, %v1938_v29  ;;  %v1451_v6 = vadd.f32 %v1450_v3, %v5152_v4  ;;  %v5155_v54 = vld [vmem:[#allocation7_spill] sm:$0xff]  ;;  %v5156_v3 = vld [vmem:[#allocation41_spill] sm:$0xff] }
 0x1ff   : > { %3265 = vmatmul.msk.bf16.gmra.mxu2 %vm1101_vm4, %v5148_v24  ;;  %v5157_v24 = vld [vmem:[#allocation38_spill] sm:$0xff] }
 0x200   : > { %3297 = vmatmul.msk.bf16.gmra.mxu0 %vm1101_vm4, %v5146_v55 }
 0x202   : > { %v1896_v2 = vpop.f32.mrf.mxu3  ;;  %v1767_v16 = vpop.f32.mrf.mxu2 }
 0x203   : > { %v1939_v5 = vadd.f32 %v1896_v2, %v1807_v10  ;;  %v1808_v14 = vadd.f32 %v1767_v16, %v1449_v61 }
 0x205   : > { %v2050_v0 = vpop.f32.mrf.mxu0  ;;  %v1453_v50 = vpop.f32.mrf.mxu1 }
 0x206   : > { %v4559_v62 = vadd.f32 %v2050_v0, %v1939_v5  ;;  %v1454_v8 = vadd.f32 %v1453_v50, %v5154_v9 }
 0x207   : > { %3281 = vmatmul.msk.bf16.gmra.mxu3 %vm1101_vm4, %v5150_v63  ;;  %v5158_v63 = vld [vmem:[#allocation40_spill] sm:$0xff] }
 0x208   : > { %3250 = vmatmul.msk.bf16.gmra.mxu1 %vm1101_vm4, %v5151_v32 }
 0x20a   : > { %v1899_v58 = vpop.f32.mrf.mxu3  ;;  %v1769_v49 = vpop.f32.mrf.mxu2 }
 0x20b   : > { %v1940_v51 = vadd.f32 %v1899_v58, %v1808_v14  ;;  %v1809_v25 = vadd.f32 %v1769_v49, %v1451_v6 }
 0x20d   : > { %v2053_v35 = vpop.f32.mrf.mxu0  ;;  %v1455_v15 = vpop.f32.mrf.mxu1 }
 0x20e   : > { %v4566_v56 = vadd.f32 %v2053_v35, %v1940_v51  ;;  %v1456_v43 = vadd.f32 %v1455_v15, %v5157_v24  ;;  %v5159_v15 = vld [vmem:[#allocation13_spill] sm:$0xff] }
 0x20f   : > { %3266 = vmatmul.msk.bf16.gmra.mxu2 %vm1101_vm4, %v5153_v31  ;;  %v5160_v31 = vld [vmem:[#allocation43_spill] sm:$0xff] }
 0x210   : > { %3298 = vmatmul.msk.bf16.gmra.mxu0 %vm1101_vm4, %v5151_v32 }
 0x212   : > { %v1901_v55 = vpop.f32.mrf.mxu3  ;;  %v1772_v7 = vpop.f32.mrf.mxu2 }
 0x213   : > { %v1941_v47 = vadd.f32 %v1901_v55, %v1809_v25  ;;  %v1810_v60 = vadd.f32 %v1772_v7, %v1454_v8 }
 0x215   : > { %v2055_v11 = vpop.f32.mrf.mxu0  ;;  %v1458_v29 = vpop.f32.mrf.mxu1 }
 0x216   : > { %v4573_v10 = vadd.f32 %v2055_v11, %v1941_v47  ;;  %v1459_v32 = vadd.f32 %v1458_v29, %v5158_v63 }
 0x217   : > { %3282 = vmatmul.msk.bf16.gmra.mxu3 %vm1101_vm4, %v5155_v54 }
 0x218   : > { %3251 = vmatmul.msk.bf16.gmra.mxu1 %vm1101_vm4, %v5156_v3 }
 0x21a   : > { %v1904_v61 = vpop.f32.mrf.mxu3  ;;  %v1774_v2 = vpop.f32.mrf.mxu2 }
 0x21b   : > { %v1942_v16 = vadd.f32 %v1904_v61, %v1810_v60  ;;  %v1811_v5 = vadd.f32 %v1774_v2, %v1456_v43  ;;  %v5162_v61 = vld [vmem:[#allocation44_spill] sm:$0xff] }
 0x21d   : > { %v2058_v14 = vpop.f32.mrf.mxu0  ;;  %v1460_v0 = vpop.f32.mrf.mxu1 }
 0x21e   : > { %v4580_v50 = vadd.f32 %v2058_v14, %v1942_v16 }
 0x21f   : > { %3267 = vmatmul.msk.bf16.gmra.mxu2 %vm1101_vm4, %v4257_v48  ;;  %v5161_v48 = vld [vmem:[#allocation42_spill] sm:$0xff] }
 0x220   : > { %3299 = vmatmul.msk.bf16.gmra.mxu0 %vm1101_vm4, %v5156_v3  ;;  %v1461_v9 = vadd.f32 %v1460_v0, %v5161_v48 }
 0x222   : > { %v1906_v4 = vpop.f32.mrf.mxu3  ;;  %v1777_v6 = vpop.f32.mrf.mxu2 }
 0x223   : > { %v1943_v58 = vadd.f32 %v1906_v4, %v1811_v5  ;;  %v1812_v49 = vadd.f32 %v1777_v6, %v1459_v32 }
 0x225   : > { %v2060_v51 = vpop.f32.mrf.mxu0  ;;  %v2126_v25 = vpop.f32.mrf.mxu1 }
 0x226   : > { %v4587_v35 = vadd.f32 %v2060_v51, %v1943_v58  ;;  %v2206_v2 = vadd.f32 %v2126_v25, %v5162_v61  ;;  %v3330_v58 = vld [vmem:[%s3442_s24 + $0x18] sm:$0xff]  ;;  %v3331_v51 = vld [vmem:[%s3442_s24 + $0x20] sm:$0xff] }
 0x227   : > { %3283 = vmatmul.msk.bf16.gmra.mxu3 %vm1101_vm4, %v5159_v15  ;;  %v2713_v25 = vrot.slane %v3331_v51, 1 }
 0x228   : > { %3252 = vmatmul.msk.bf16.gmra.mxu1 %vm1101_vm4, %v5160_v31 }
 0x22a   : > { %v1909_v8 = vpop.f32.mrf.mxu3  ;;  %v1779_v55 = vpop.f32.mrf.mxu2 }
 0x22b   : > { %v1944_v7 = vadd.f32 %v1909_v8, %v1812_v49  ;;  %v1813_v47 = vadd.f32 %v1779_v55, %v1461_v9  ;;  %v2712_v49 = vrot.slane %v3330_v58, 1 }
 0x22d   : > { %v2063_v60 = vpop.f32.mrf.mxu0  ;;  %v2128_v11 = vpop.f32.mrf.mxu1  ;;  %v2714_v55 = vsel %vm2711_vm1, %v2712_v49, %v2713_v25 }
 0x22e   : > { %v4594_v29 = vadd.f32 %v2063_v60, %v1944_v7 }
 0x22f   : > { %3268 = vmatmul.msk.bf16.gmra.mxu2 %vm1101_vm4, %v4284_v41  ;;  %v2662_v41 = vld [vmem:[%s4994_s3] sm:$0xf] }
 0x230   : > { %3300 = vmatmul.msk.bf16.gmra.mxu0 %vm1101_vm4, %v5160_v31  ;;  %v4610_v4 = vperm.slane %v2662_v41, 0  ;;  %v4615_v48 = vperm.slane %v2662_v41, 1  ;;  %v4624_v7 = vperm.slane %v2662_v41, 2 }
 0x232   : > { %v1911_v54 = vpop.f32.mrf.mxu3  ;;  %v2258_v3 = vpop.f32.mrf.mxu2 }
 0x233   : > { %v1945_v24 = vadd.f32 %v1911_v54, %v1813_v47  ;;  %v2338_v14 = vadd.f32 %v2258_v3, %v2206_v2  ;;  %v4627_v3 = vperm.slane %v2662_v41, 3 }
 0x235   : > { %v2065_v43 = vpop.f32.mrf.mxu0  ;;  %v2131_v16 = vpop.f32.mrf.mxu1 }
 0x236   : > { %v4601_v5 = vadd.f32 %v2065_v43, %v1945_v24 }
 0x237   : > { %3284 = vmatmul.msk.bf16.gmra.mxu3 %vm1101_vm4, %v3815_v53  ;;  %v2207_v53 = vadd.f32 %v2128_v11, %v4291_v38 }
 0x238   : > { %3253 = vmatmul.msk.bf16.gmra.mxu1 %vm1101_vm4, %v4298_v12 }
 0x23a   : > { %v2412_v0 = vpop.f32.mrf.mxu3  ;;  %v2260_v63 = vpop.f32.mrf.mxu2 }
 0x23b   : > { %v2492_v32 = vadd.f32 %v2412_v0, %v2338_v14  ;;  %v2339_v9 = vadd.f32 %v2260_v63, %v2207_v53  ;;  %v3333_v53 = vld [vmem:[%s3442_s24 + $0x30] sm:$0xff] }
 0x23d   : > { %v2550_v6 = vpop.f32.mrf.mxu0  ;;  %v2133_v15 = vpop.f32.mrf.mxu1 }
 0x23e   : > { %v2630_v31 = vadd.f32 %v2550_v6, %v2492_v32 }
 0x23f   : > { %3269 = vmatmul.msk.bf16.gmra.mxu2 %vm1101_vm4, %v4312_v39  ;;  %v3332_v39 = vld [vmem:[%s3442_s24 + $0x28] sm:$0x3] }
 0x240   : > { %3301 = vmatmul.msk.bf16.gmra.mxu0 %vm1101_vm4, %v4298_v12  ;;  %v2825_v8 = vmul.f32 %v4610_v4, %v2630_v31  ;;  %v2715_v43 = vrot.slane %v3332_v39, 1  ;;  %v2208_v12 = vadd.f32 %v2131_v16, %v4302_v45  ;;  %v2717_v31 = vrot.slane %v3333_v53, 1  ;;  %v5166_v53 = vld [vmem:[#allocation6_spill] sm:$0xff] }
 0x242   : > { %v2858_v38 = vadd.f32 %v4615_v48, %v2825_v8  ;;  %v2414_v47 = vpop.f32.mrf.mxu3  ;;  %v2263_v60 = vpop.f32.mrf.mxu2  ;;  %v2716_v63 = vsel %vm2711_vm1, %v2713_v25, %v2715_v43 }
 0x243   : > { %v2493_v11 = vadd.f32 %v2414_v47, %v2339_v9  ;;  %v2340_v0 = vadd.f32 %v2263_v60, %v2208_v12  ;;  %v3334_v9 = vld [vmem:[%s3442_s24 + $0x38] sm:$0xff] }
 0x244   : > { %v2890_v54 = vadd.f32 %v2858_v38, %v2714_v55  ;;  %v2718_v8 = vrot.slane %v3334_v9, 1  ;;  %v2209_v55 = vadd.f32 %v2133_v15, %v4319_v57 }
 0x245   : > { %v2552_v24 = vpop.f32.mrf.mxu0  ;;  %v2136_v61 = vpop.f32.mrf.mxu1 }
 0x246   : > { %vm2922_vm2 = vcmp.gt.f32.partialorder %v2890_v54, 0.0  ;;  %v2955_v2 = vmul.f32 %v4624_v7, %v2890_v54  ;;  %v2631_v14 = vadd.f32 %v2552_v24, %v2493_v11  ;;  %v5163_v11 = vld [vmem:[#allocation5_spill] sm:$0xff]  ;;  %v2719_v57 = vsel %vm2711_vm1, %v2717_v31, %v2718_v8 }
 0x247   : > { %3285 = vmatmul.msk.bf16.gmra.mxu3 %vm1101_vm4, %v3955_v13 }
 0x248   : > { %v2987_v41 = vsel %vm2922_vm2, %v2890_v54, %v2955_v2  ;;  %v2826_v45 = vmul.f32 %v4610_v4, %v2631_v14  ;;  %3254 = vmatmul.msk.bf16.gmra.mxu1 %vm1101_vm4, %v4325_v26 }
 0x249   : > { %v3020_v16 = vadd.f32 %v4627_v3, %v2987_v41  ;;  %v3335_v41 = vld [vmem:[%s3442_s24 + $0x40] sm:$0x3] }
 0x24a   : > { %v2859_v13 = vadd.f32 %v4615_v48, %v2826_v45  ;;  %v2417_v32 = vpop.f32.mrf.mxu3  ;;  %v2265_v6 = vpop.f32.mrf.mxu2  ;;  %v2720_v45 = vrot.slane %v3335_v41, 1 }
 0x24b   : > { %3052 = vst.msk [vmem:[%s4637_s16] sm:$0xff] %vm1101_vm4, %v3020_v16  ;;  %v2494_v58 = vadd.f32 %v2417_v32, %v2340_v0  ;;  %v2341_v60 = vadd.f32 %v2265_v6, %v2209_v55  ;;  %v5164_v16 = vld [vmem:[#allocation20_spill] sm:$0xff]  ;;  %v5165_v6 = vld [vmem:[#allocation9_spill] sm:$0xff] }
 0x24c   : > { %v2891_v49 = vadd.f32 %v2859_v13, %v2716_v63 }
 0x24d   : > { %v2555_v51 = vpop.f32.mrf.mxu0  ;;  %v2138_v38 = vpop.f32.mrf.mxu1 }
 0x24e   : > { %vm2923_vm5 = vcmp.gt.f32.partialorder %v2891_v49, 0.0  ;;  %v2956_v25 = vmul.f32 %v4624_v7, %v2891_v49  ;;  %v2632_v47 = vadd.f32 %v2555_v51, %v2494_v58 }
 0x24f   : > { %3270 = vmatmul.msk.bf16.gmra.mxu2 %vm1101_vm4, %v5163_v11 }
 0x250   : > { %v2988_v54 = vsel %vm2923_vm5, %v2891_v49, %v2956_v25  ;;  %3302 = vmatmul.msk.bf16.gmra.mxu0 %vm1101_vm4, %v4325_v26  ;;  %v2827_v24 = vmul.f32 %v4610_v4, %v2632_v47  ;;  %v2210_v26 = vadd.f32 %v2136_v61, %v5164_v16  ;;  %v2721_v61 = vsel %vm2711_vm1, %v2718_v8, %v2720_v45 }
 0x251   : > { %v3021_v39 = vadd.f32 %v4627_v3, %v2988_v54  ;;  %v3336_v54 = vld [vmem:[%s3442_s24 + $0x48] sm:$0xff] }
 0x252   : > { %v2860_v15 = vadd.f32 %v4615_v48, %v2827_v24  ;;  %v2419_v43 = vpop.f32.mrf.mxu3  ;;  %v2268_v12 = vpop.f32.mrf.mxu2  ;;  %v2722_v24 = vrot.slane %v3336_v54, 1 }
 0x253   : > { %3053 = vst.msk [vmem:[%s4637_s16 + $0x8] sm:$0xff] %vm1101_vm4, %v3021_v39  ;;  %v2495_v2 = vadd.f32 %v2419_v43, %v2341_v60  ;;  %v2342_v58 = vadd.f32 %v2268_v12, %v2210_v26  ;;  %v3337_v39 = vld [vmem:[%s3442_s24 + $0x50] sm:$0xff] }
 0x254   : > { %v2892_v14 = vadd.f32 %v2860_v15, %v2719_v57  ;;  %v2723_v57 = vrot.slane %v3337_v39, 1  ;;  %v5167_v15 = vld [vmem:[#allocation4_spill] sm:$0xff] }
 0x255   : > { %v2557_v0 = vpop.f32.mrf.mxu0  ;;  %v2141_v63 = vpop.f32.mrf.mxu1  ;;  %v2211_v43 = vadd.f32 %v2138_v38, %v5167_v15 }
 0x256   : > { %vm2924_vm15 = vcmp.gt.f32.partialorder %v2892_v14, 0.0  ;;  %v2957_v13 = vmul.f32 %v4624_v7, %v2892_v14  ;;  %v2633_v32 = vadd.f32 %v2557_v0, %v2495_v2  ;;  %v5168_v0 = vld [vmem:[#allocation10_spill] sm:$0xff]  ;;  %v2724_v38 = vsel %vm2711_vm1, %v2722_v24, %v2723_v57  ;;  %v5171_v24 = vld [vmem:[#allocation45_spill] sm:$0xff] }
 0x257   : > { %3286 = vmatmul.msk.bf16.gmra.mxu3 %vm1101_vm4, %v5165_v6 }
 0x258   : > { %v2989_v49 = vsel %vm2924_vm15, %v2892_v14, %v2957_v13  ;;  %v2828_v51 = vmul.f32 %v4610_v4, %v2633_v32  ;;  %3255 = vmatmul.msk.bf16.gmra.mxu1 %vm1101_vm4, %v5166_v53 }
 0x259   : > { %v3022_v31 = vadd.f32 %v4627_v3, %v2989_v49 }
 0x25a   : > { %v2861_v9 = vadd.f32 %v4615_v48, %v2828_v51  ;;  %v2422_v55 = vpop.f32.mrf.mxu3  ;;  %v2270_v25 = vpop.f32.mrf.mxu2  ;;  %v3338_v51 = vld [vmem:[%s3442_s24 + $0x58] sm:$0x3] }
 0x25b   : > { %3054 = vst.msk [vmem:[%s4637_s16 + $0x10] sm:$0xff] %vm1101_vm4, %v3022_v31  ;;  %v2496_v47 = vadd.f32 %v2422_v55, %v2342_v58  ;;  %v2343_v14 = vadd.f32 %v2270_v25, %v2211_v43  ;;  %v2725_v31 = vrot.slane %v3338_v51, 1 }
 0x25c   : > { %v2893_v60 = vadd.f32 %v2861_v9, %v2721_v61  ;;  %v5169_v61 = vld [vmem:[#allocation11_spill] sm:$0xff] }
 0x25d   : > { %v2560_v11 = vpop.f32.mrf.mxu0  ;;  %v2143_v12 = vpop.f32.mrf.mxu1 }
 0x25e   : > { %vm2925_vm3 = vcmp.gt.f32.partialorder %v2893_v60, 0.0  ;;  %v2958_v8 = vmul.f32 %v4624_v7, %v2893_v60  ;;  %v2634_v2 = vadd.f32 %v2560_v11, %v2496_v47  ;;  %v5170_v47 = vld [vmem:[#allocation14_spill] sm:$0xff] }
 0x25f   : > { %3271 = vmatmul.msk.bf16.gmra.mxu2 %vm1101_vm4, %v5168_v0 }
 0x260   : > { %v2990_v41 = vsel %vm2925_vm3, %v2893_v60, %v2958_v8  ;;  %3303 = vmatmul.msk.bf16.gmra.mxu0 %vm1101_vm4, %v5166_v53  ;;  %v2829_v45 = vmul.f32 %v4610_v4, %v2634_v2  ;;  %v2212_v53 = vadd.f32 %v2141_v63, %v5169_v61  ;;  %v2726_v63 = vsel %vm2711_vm1, %v2723_v57, %v2725_v31 }
 0x261   : > { %v3023_v16 = vadd.f32 %v4627_v3, %v2990_v41  ;;  %v3339_v41 = vld [vmem:[%s3442_s24 + $0x60] sm:$0xff] }
 0x262   : > { %v2862_v26 = vadd.f32 %v4615_v48, %v2829_v45  ;;  %v2424_v13 = vpop.f32.mrf.mxu3  ;;  %v2273_v32 = vpop.f32.mrf.mxu2  ;;  %v2727_v45 = vrot.slane %v3339_v41, 1  ;;  %v5175_v41 = vld [vmem:[#allocation46_spill] sm:$0xff] }
 0x263   : > { %3055 = vst.msk [vmem:[%s4637_s16 + $0x18] sm:$0xff] %vm1101_vm4, %v3023_v16  ;;  %v2497_v6 = vadd.f32 %v2424_v13, %v2343_v14  ;;  %v2344_v60 = vadd.f32 %v2273_v32, %v2212_v53  ;;  %v3340_v16 = vld [vmem:[%s3442_s24 + $0x68] sm:$0xff] }
 0x264   : > { %v2894_v58 = vadd.f32 %v2862_v26, %v2724_v38  ;;  %v2728_v38 = vrot.slane %v3340_v16, 1  ;;  %v5172_v26 = vld [vmem:[#allocation12_spill] sm:$0xff] }
 0x265   : > { %v2562_v49 = vpop.f32.mrf.mxu0  ;;  %v2146_v9 = vpop.f32.mrf.mxu1  ;;  %v2213_v13 = vadd.f32 %v2143_v12, %v5172_v26 }
 0x266   : > { %vm2926_vm6 = vcmp.gt.f32.partialorder %v2894_v58, 0.0  ;;  %v2959_v55 = vmul.f32 %v4624_v7, %v2894_v58  ;;  %v2635_v25 = vadd.f32 %v2562_v49, %v2497_v6  ;;  %v5173_v49 = vld [vmem:[#allocation16_spill] sm:$0xff]  ;;  %v2729_v12 = vsel %vm2711_vm1, %v2727_v45, %v2728_v38 }
 0x267   : > { %3287 = vmatmul.msk.bf16.gmra.mxu3 %vm1101_vm4, %v5170_v47 }
 0x268   : > { %v2991_v11 = vsel %vm2926_vm6, %v2894_v58, %v2959_v55  ;;  %v2830_v54 = vmul.f32 %v4610_v4, %v2635_v25  ;;  %3256 = vmatmul.msk.bf16.gmra.mxu1 %vm1101_vm4, %v5171_v24 }
 0x269   : > { %v3024_v39 = vadd.f32 %v4627_v3, %v2991_v11 }
 0x26a   : > { %v2863_v15 = vadd.f32 %v4615_v48, %v2830_v54  ;;  %v2427_v43 = vpop.f32.mrf.mxu3  ;;  %v2275_v8 = vpop.f32.mrf.mxu2  ;;  %v3341_v54 = vld [vmem:[%s3442_s24 + $0x70] sm:$0x3] }
 0x26b   : > { %3056 = vst.msk [vmem:[%s4637_s16 + $0x20] sm:$0xff] %vm1101_vm4, %v3024_v39  ;;  %v2498_v2 = vadd.f32 %v2427_v43, %v2344_v60  ;;  %v2345_v58 = vadd.f32 %v2275_v8, %v2213_v13  ;;  %v2730_v39 = vrot.slane %v3341_v54, 1 }
 0x26c   : > { %v2895_v14 = vadd.f32 %v2863_v15, %v2726_v63  ;;  %v5174_v63 = vld [vmem:[#allocation17_spill] sm:$0xff] }
 0x26d   : > { %v2565_v0 = vpop.f32.mrf.mxu0  ;;  %v2148_v32 = vpop.f32.mrf.mxu1 }
 0x26e   : > { %vm2927_vm7 = vcmp.gt.f32.partialorder %v2895_v14, 0.0  ;;  %v2960_v57 = vmul.f32 %v4624_v7, %v2895_v14  ;;  %v2636_v6 = vadd.f32 %v2565_v0, %v2498_v2 }
 0x26f   : > { %3272 = vmatmul.msk.bf16.gmra.mxu2 %vm1101_vm4, %v5173_v49 }
 0x270   : > { %v2992_v51 = vsel %vm2927_vm7, %v2895_v14, %v2960_v57  ;;  %3304 = vmatmul.msk.bf16.gmra.mxu0 %vm1101_vm4, %v5171_v24  ;;  %v2831_v31 = vmul.f32 %v4610_v4, %v2636_v6  ;;  %v2214_v24 = vadd.f32 %v2146_v9, %v5174_v63  ;;  %v2731_v9 = vsel %vm2711_vm1, %v2728_v38, %v2730_v39 }
 0x271   : > { %v3025_v61 = vadd.f32 %v4627_v3, %v2992_v51  ;;  %v3343_v51 = vld [vmem:[%s3442_s24 + $0x80] sm:$0xff] }
 0x272   : > { %v2864_v53 = vadd.f32 %v4615_v48, %v2831_v31  ;;  %v2429_v55 = vpop.f32.mrf.mxu3  ;;  %v2278_v25 = vpop.f32.mrf.mxu2  ;;  %v2733_v31 = vrot.slane %v3343_v51, 1 }
 0x273   : > { %3057 = vst.msk [vmem:[%s4637_s16 + $0x28] sm:$0xff] %vm1101_vm4, %v3025_v61  ;;  %v2499_v47 = vadd.f32 %v2429_v55, %v2345_v58  ;;  %v2346_v2 = vadd.f32 %v2278_v25, %v2214_v24  ;;  %v3342_v58 = vld [vmem:[%s3442_s24 + $0x78] sm:$0xff]  ;;  %v5176_v61 = vld [vmem:[#allocation18_spill] sm:$0xff] }
 0x274   : > { %v2896_v60 = vadd.f32 %v2864_v53, %v2729_v12  ;;  %v2732_v49 = vrot.slane %v3342_v58, 1  ;;  %v2215_v12 = vadd.f32 %v2148_v32, %v5176_v61 }
 0x275   : > { %v2567_v11 = vpop.f32.mrf.mxu0  ;;  %v2151_v15 = vpop.f32.mrf.mxu1 }
 0x276   : > { %vm2928_vm8 = vcmp.gt.f32.partialorder %v2896_v60, 0.0  ;;  %v2961_v43 = vmul.f32 %v4624_v7, %v2896_v60  ;;  %v2637_v8 = vadd.f32 %v2567_v11, %v2499_v47  ;;  %v5177_v47 = vld [vmem:[#allocation2_spill] sm:$0xff]  ;;  %v2734_v32 = vsel %vm2711_vm1, %v2732_v49, %v2733_v31 }
 0x277   : > { %3288 = vmatmul.msk.bf16.gmra.mxu3 %vm1101_vm4, %v5137_v34 }
 0x278   : > { %v2993_v14 = vsel %vm2928_vm8, %v2896_v60, %v2961_v43  ;;  %v2832_v0 = vmul.f32 %v4610_v4, %v2637_v8  ;;  %3257 = vmatmul.msk.bf16.gmra.mxu1 %vm1101_vm4, %v5175_v41 }
 0x279   : > { %v3026_v45 = vadd.f32 %v4627_v3, %v2993_v14  ;;  %v3344_v14 = vld [vmem:[%s3442_s24 + $0x88] sm:$0x3] }
 0x27a   : > { %v2865_v16 = vadd.f32 %v4615_v48, %v2832_v0  ;;  %v2432_v26 = vpop.f32.mrf.mxu3  ;;  %v2280_v13 = vpop.f32.mrf.mxu2  ;;  %v2735_v0 = vrot.slane %v3344_v14, 1 }
 0x27b   : > { %3058 = vst.msk [vmem:[%s4637_s16 + $0x30] sm:$0xff] %vm1101_vm4, %v3026_v45  ;;  %v2500_v57 = vadd.f32 %v2432_v26, %v2346_v2  ;;  %v2347_v25 = vadd.f32 %v2280_v13, %v2215_v12  ;;  %v5178_v45 = vld [vmem:[#allocation23_spill] sm:$0xff] }
 0x27c   : > { %v2897_v34 = vadd.f32 %v2865_v16, %v2731_v9  ;;  %v2216_v9 = vadd.f32 %v2151_v15, %v5178_v45  ;;  %v2736_v58 = vsel %vm2711_vm1, %v2733_v31, %v2735_v0 }
 0x27d   : > { %v2570_v6 = vpop.f32.mrf.mxu0  ;;  %v2153_v53 = vpop.f32.mrf.mxu1 }
 0x27e   : > { %vm2929_vm0 = vcmp.gt.f32.partialorder %v2897_v34, 0.0  ;;  %v2962_v38 = vmul.f32 %v4624_v7, %v2897_v34  ;;  %v2638_v55 = vadd.f32 %v2570_v6, %v2500_v57  ;;  %v2103_v57 = vrot.slane %v4432_v1, 5 }
 0x27f   : > { %3273 = vmatmul.msk.bf16.gmra.mxu2 %vm1101_vm4, %v5177_v47  ;;  %v3243_v1 = vrot.slane %v4429_v20, 9  ;;  %v3345_v47 = vld [vmem:[%s3442_s24 + $0x90] sm:$0xff] }
 0x280   : > { %v2994_v60 = vsel %vm2929_vm0, %v2897_v34, %v2962_v38  ;;  %3305 = vmatmul.msk.bf16.gmra.mxu0 %vm1101_vm4, %v5175_v41  ;;  %v2833_v11 = vmul.f32 %v4610_v4, %v2638_v55  ;;  %v2105_v12 = vrot.slane %v2103_v57, 4  ;;  %v2106_v38 = vrot.slane %v4452_v33, 5 }
 0x281   : > { %v3027_v54 = vadd.f32 %v4627_v3, %v2994_v60  ;;  %v2737_v60 = vrot.slane %v3345_v47, 1  ;;  %v2104_v33 = vsel %vm4001_vm9, %v3243_v1, %v2103_v57 }
 0x282   : > { %v2866_v39 = vadd.f32 %v4615_v48, %v2833_v11  ;;  %v2434_v63 = vpop.f32.mrf.mxu3  ;;  %v2283_v24 = vpop.f32.mrf.mxu2  ;;  %v3346_v11 = vld [vmem:[%s3442_s24 + $0x98] sm:$0xff] }
 0x283   : > { %3059 = vst.msk [vmem:[%s4637_s16 + $0x38] sm:$0xff] %vm1101_vm4, %v3027_v54  ;;  %v2501_v43 = vadd.f32 %v2434_v63, %v2347_v25  ;;  %v2348_v13 = vadd.f32 %v2283_v24, %v2216_v9  ;;  %v2738_v54 = vrot.slane %v3346_v11, 1  ;;  %v2108_v9 = vunpack.c.l.b16 %v2104_v33  ;;  %v3348_v11 = vld [vmem:[%s3442_s24 + $0xa8] sm:$0xff] }
 0x284   : > { %v2898_v8 = vadd.f32 %v2866_v39, %v2734_v32  ;;  %v5179_v32 = vld [vmem:[#allocation22_spill] sm:$0xff] }
 0x285   : > { %v2572_v2 = vpop.f32.mrf.mxu0  ;;  %v2156_v41 = vpop.f32.mrf.mxu1  ;;  %v2217_v31 = vadd.f32 %v2153_v53, %v5179_v32  ;;  %v2739_v0 = vsel %vm2711_vm1, %v2737_v60, %v2738_v54  ;;  %v2742_v32 = vrot.slane %v3348_v11, 1 }
 0x286   : > { %vm2930_vm10 = vcmp.gt.f32.partialorder %v2898_v8, 0.0  ;;  %v2963_v16 = vmul.f32 %v4624_v7, %v2898_v8  ;;  %v2639_v26 = vadd.f32 %v2572_v2, %v2501_v43 }
 0x287   : > { %3289 = vmatmul.msk.bf16.gmra.mxu3 %vm1101_vm4, %v5142_v42 }
 0x288   : > { %v2995_v34 = vsel %vm2930_vm10, %v2898_v8, %v2963_v16  ;;  %v2834_v6 = vmul.f32 %v4610_v4, %v2639_v26  ;;  %3258 = vmatmul.msk.bf16.gmra.mxu1 %vm1101_vm4, %v4455_v30  ;;  %v2107_v8 = vsel %vm4001_vm9, %v2105_v12, %v2106_v38 }
 0x289   : > { %v3028_v15 = vadd.f32 %v4627_v3, %v2995_v34  ;;  %v2109_v16 = vunpack.c.l.b16 %v2107_v8  ;;  %v5181_v8 = vld [vmem:[#allocation26_spill] sm:$0xff] }
 0x28a   : > { %v2867_v49 = vadd.f32 %v4615_v48, %v2834_v6  ;;  %v2437_v51 = vpop.f32.mrf.mxu3  ;;  %v2285_v61 = vpop.f32.mrf.mxu2  ;;  %v3347_v6 = vld [vmem:[%s3442_s24 + $0xa0] sm:$0x3] }
 0x28b   : > { %3060 = vst.msk [vmem:[%s4637_s16 + $0x40] sm:$0xff] %vm1101_vm4, %v3028_v15  ;;  %v2502_v42 = vadd.f32 %v2437_v51, %v2348_v13  ;;  %v2349_v43 = vadd.f32 %v2285_v61, %v2217_v31  ;;  %v2740_v15 = vrot.slane %v3347_v6, 1  ;;  %v2110_v61 = vpack.c.b16 %v2109_v16, %v2108_v9  ;;  %v3349_v31 = vld [vmem:[%s3442_s24 + $0xb0] sm:$0xff] }
 0x28c   : > { %v2899_v55 = vadd.f32 %v2867_v49, %v2736_v58 }
 0x28d   : > { %v2575_v25 = vpop.f32.mrf.mxu0  ;;  %v2158_v39 = vpop.f32.mrf.mxu1 }
 0x28e   : > { %vm2931_vm11 = vcmp.gt.f32.partialorder %v2899_v55, 0.0  ;;  %v2964_v63 = vmul.f32 %v4624_v7, %v2899_v55  ;;  %v2640_v24 = vadd.f32 %v2575_v25, %v2502_v42 }
 0x28f   : > { %3274 = vmatmul.msk.bf16.gmra.mxu2 %vm1101_vm4, %v4467_v27 }
 0x290   : > { %v2996_v2 = vsel %vm2931_vm11, %v2899_v55, %v2964_v63  ;;  %3306 = vmatmul.msk.bf16.gmra.mxu0 %vm1101_vm4, %v4455_v30  ;;  %v2835_v53 = vmul.f32 %v4610_v4, %v2640_v24  ;;  %v2218_v30 = vadd.f32 %v2156_v41, %v4458_v37  ;;  %v2741_v41 = vsel %vm2711_vm1, %v2738_v54, %v2740_v15 }
 0x291   : > { %v3029_v14 = vadd.f32 %v4627_v3, %v2996_v2  ;;  %v2743_v63 = vrot.slane %v3349_v31, 1  ;;  %v2219_v24 = vadd.f32 %v2158_v39, %v4473_v18 }
 0x292   : > { %v2868_v45 = vadd.f32 %v4615_v48, %v2835_v53  ;;  %v2439_v27 = vpop.f32.mrf.mxu3  ;;  %v2288_v26 = vpop.f32.mrf.mxu2 }
 0x293   : > { %3061 = vst.msk [vmem:[%s4637_s16 + $0x48] sm:$0xff] %vm1101_vm4, %v3029_v14  ;;  %v2503_v13 = vadd.f32 %v2439_v27, %v2349_v43  ;;  %v2350_v42 = vadd.f32 %v2288_v26, %v2218_v30  ;;  %v3350_v26 = vld [vmem:[%s3442_s24 + $0xb8] sm:$0x3]  ;;  %v5182_v30 = vld [vmem:[#allocation8_spill] sm:$0xff] }
 0x294   : > { %v2900_v57 = vadd.f32 %v2868_v45, %v2739_v0  ;;  %v2744_v0 = vsel %vm2711_vm1, %v2742_v32, %v2743_v63 }
 0x295   : > { %v2577_v34 = vpop.f32.mrf.mxu0  ;;  %v2161_v58 = vpop.f32.mrf.mxu1 }
 0x296   : > { %vm2932_vm9 = vcmp.gt.f32.partialorder %v2900_v57, 0.0  ;;  %v2965_v49 = vmul.f32 %v4624_v7, %v2900_v57  ;;  %v2641_v51 = vadd.f32 %v2577_v34, %v2503_v13  ;;  %v2745_v13 = vrot.slane %v3350_v26, 1 }
 0x297   : > { %3290 = vmatmul.msk.bf16.gmra.mxu3 %vm1101_vm4, %v4480_v36 }
 0x298   : > { %v2997_v1 = vsel %vm2932_vm9, %v2900_v57, %v2965_v49  ;;  %v2836_v12 = vmul.f32 %v4610_v4, %v2641_v51  ;;  %3259 = vmatmul.msk.bf16.gmra.mxu1 %vm1101_vm4, %v2110_v61  ;;  %v2220_v57 = vadd.f32 %v2161_v58, %v4482_v22 }
 0x299   : > { %v3030_v37 = vadd.f32 %v4627_v3, %v2997_v1  ;;  %v2746_v1 = vsel %vm2711_vm1, %v2743_v63, %v2745_v13 }
 0x29a   : > { %v2869_v38 = vadd.f32 %v4615_v48, %v2836_v12  ;;  %v2442_v55 = vpop.f32.mrf.mxu3  ;;  %v2290_v25 = vpop.f32.mrf.mxu2 }
 0x29b   : > { %3062 = vst.msk [vmem:[%s4637_s16 + $0x50] sm:$0xff] %vm1101_vm4, %v3030_v37  ;;  %v2504_v47 = vadd.f32 %v2442_v55, %v2350_v42  ;;  %v2351_v33 = vadd.f32 %v2290_v25, %v2219_v24  ;;  %v3351_v55 = vld [vmem:[%s3442_s24 + $0xc0] sm:$0xff] }
 0x29c   : > { %v2901_v60 = vadd.f32 %v2869_v38, %v2741_v41  ;;  %v2747_v25 = vrot.slane %v3351_v55, 1 }
 0x29d   : > { %v2580_v36 = vpop.f32.mrf.mxu0  ;;  %v2163_v43 = vpop.f32.mrf.mxu1 }
 0x29e   : > { %vm2933_vm12 = vcmp.gt.f32.partialorder %v2901_v60, 0.0  ;;  %v2966_v54 = vmul.f32 %v4624_v7, %v2901_v60  ;;  %v2642_v20 = vadd.f32 %v2580_v36, %v2504_v47  ;;  %v3352_v47 = vld [vmem:[%s3442_s24 + $0xc8] sm:$0xff]  ;;  %v2221_v36 = vadd.f32 %v2163_v43, %v4489_v23 }
 0x29f   : > { %3275 = vmatmul.msk.bf16.gmra.mxu2 %vm1101_vm4, %v5181_v8 }
 0x2a0   : > { %v2998_v2 = vsel %vm2933_vm12, %v2901_v60, %v2966_v54  ;;  %3307 = vmatmul.msk.bf16.gmra.mxu0 %vm1101_vm4, %v2110_v61  ;;  %v2837_v53 = vmul.f32 %v4610_v4, %v2642_v20  ;;  %v2748_v60 = vrot.slane %v3352_v47, 1  ;;  %v5183_v54 = vld [vmem:[#allocation28_spill] sm:$0xff] }
 0x2a1   : > { %v3031_v14 = vadd.f32 %v4627_v3, %v2998_v2 }
 0x2a2   : > { %v2870_v18 = vadd.f32 %v4615_v48, %v2837_v53  ;;  %v2444_v39 = vpop.f32.mrf.mxu3  ;;  %v2293_v45 = vpop.f32.mrf.mxu2  ;;  %v2749_v8 = vsel %vm2711_vm1, %v2747_v25, %v2748_v60 }
 0x2a3   : > { %3063 = vst.msk [vmem:[%s4637_s16 + $0x58] sm:$0xff] %vm1101_vm4, %v3031_v14  ;;  %v2505_v27 = vadd.f32 %v2444_v39, %v2351_v33  ;;  %v2352_v49 = vadd.f32 %v2293_v45, %v2220_v57 }
 0x2a4   : > { %v2902_v9 = vadd.f32 %v2870_v18, %v2744_v0  ;;  %v3353_v18 = vld [vmem:[%s3442_s24 + $0xd0] sm:$0x3] }
 0x2a5   : > { %v2582_v16 = vpop.f32.mrf.mxu0  ;;  %v2166_v34 = vpop.f32.mrf.mxu1  ;;  %v2750_v39 = vrot.slane %v3353_v18, 1 }
 0x2a6   : > { %vm2934_vm13 = vcmp.gt.f32.partialorder %v2902_v9, 0.0  ;;  %v2967_v6 = vmul.f32 %v4624_v7, %v2902_v9  ;;  %v2643_v15 = vadd.f32 %v2582_v16, %v2505_v27  ;;  %v2222_v45 = vadd.f32 %v2166_v34, %v4496_v52 }
 0x2a7   : > { %3291 = vmatmul.msk.bf16.gmra.mxu3 %vm1101_vm4, %v5182_v30 }
 0x2a8   : > { %v2999_v51 = vsel %vm2934_vm13, %v2902_v9, %v2967_v6  ;;  %v2838_v61 = vmul.f32 %v4610_v4, %v2643_v15  ;;  %v2751_v15 = vsel %vm2711_vm1, %v2748_v60, %v2750_v39 }
 0x2a9   : > { %v3032_v42 = vadd.f32 %v4627_v3, %v2999_v51 }
 0x2aa   : > { %v2871_v22 = vadd.f32 %v4615_v48, %v2838_v61  ;;  %v2447_v58 = vpop.f32.mrf.mxu3  ;;  %v2295_v12 = vpop.f32.mrf.mxu2 }
 0x2ab   : > { %3064 = vst.msk [vmem:[%s4637_s16 + $0x60] sm:$0xff] %vm1101_vm4, %v3032_v42  ;;  %v2506_v37 = vadd.f32 %v2447_v58, %v2352_v49  ;;  %v2353_v63 = vadd.f32 %v2295_v12, %v2221_v36  ;;  %v3354_v42 = vld [vmem:[%s3442_s24 + $0xd8] sm:$0xff] }
 0x2ac   : > { %v2903_v41 = vadd.f32 %v2871_v22, %v2746_v1  ;;  %v2752_v1 = vrot.slane %v3354_v42, 1  ;;  %v3355_v22 = vld [vmem:[%s3442_s24 + $0xe0] sm:$0xff] }
 0x2ad   : > { %v2585_v38 = vpop.f32.mrf.mxu0  ;;  %v2168_v11 = vpop.f32.mrf.mxu1  ;;  %v2753_v58 = vrot.slane %v3355_v22, 1 }
 0x2ae   : > { %vm2935_vm14 = vcmp.gt.f32.partialorder %v2903_v41, 0.0  ;;  %v2968_v32 = vmul.f32 %v4624_v7, %v2903_v41  ;;  %v2644_v31 = vadd.f32 %v2585_v38, %v2506_v37  ;;  %v2223_v12 = vadd.f32 %v2168_v11, %v4503_v28 }
 0x2af   : > { %v2754_v36 = vsel %vm2711_vm1, %v2752_v1, %v2753_v58 }
 0x2b0   : > { %v3000_v24 = vsel %vm2935_vm14, %v2903_v41, %v2968_v32  ;;  %3308 = vmatmul.msk.bf16.gmra.mxu0 %vm1101_vm4, %v5183_v54  ;;  %v2839_v20 = vmul.f32 %v4610_v4, %v2644_v31  ;;  %v3356_v54 = vld [vmem:[%s3442_s24 + $0xe8] sm:$0x3] }
 0x2b1   : > { %v3033_v33 = vadd.f32 %v4627_v3, %v3000_v24 }
 0x2b2   : > { %v2872_v2 = vadd.f32 %v4615_v48, %v2839_v20  ;;  %v2449_v23 = vpop.f32.mrf.mxu3  ;;  %v2298_v43 = vpop.f32.mrf.mxu2  ;;  %v2755_v20 = vrot.slane %v3356_v54, 1 }
 0x2b3   : > { %3065 = vst.msk [vmem:[%s4637_s16 + $0x68] sm:$0xff] %vm1101_vm4, %v3033_v33  ;;  %v2507_v53 = vadd.f32 %v2449_v23, %v2353_v63  ;;  %v2354_v26 = vadd.f32 %v2298_v43, %v2222_v45 }
 0x2b4   : > { %v2904_v14 = vadd.f32 %v2872_v2, %v2749_v8  ;;  %v2756_v18 = vsel %vm2711_vm1, %v2753_v58, %v2755_v20 }
 0x2b5   : > { %v2587_v0 = vpop.f32.mrf.mxu0  ;;  %v2171_v27 = vpop.f32.mrf.mxu1 }
 0x2b6   : > { %vm2936_vm2 = vcmp.gt.f32.partialorder %v2904_v14, 0.0  ;;  %v2969_v9 = vmul.f32 %v4624_v7, %v2904_v14  ;;  %v2645_v16 = vadd.f32 %v2587_v0, %v2507_v53  ;;  %v2224_v33 = vadd.f32 %v2171_v27, %v4510_v21 }
 0x2b8   : > { %v3001_v13 = vsel %vm2936_vm2, %v2904_v14, %v2969_v9  ;;  %v2840_v57 = vmul.f32 %v4610_v4, %v2645_v16 }
 0x2b9   : > { %v3034_v6 = vadd.f32 %v4627_v3, %v3001_v13 }
 0x2ba   : > { %v2873_v30 = vadd.f32 %v4615_v48, %v2840_v57  ;;  %v2452_v49 = vpop.f32.mrf.mxu3  ;;  %v2300_v51 = vpop.f32.mrf.mxu2  ;;  %v3358_v57 = vld [vmem:[%s3442_s24 + $0xf8] sm:$0xff] }
 0x2bb   : > { %3066 = vst.msk [vmem:[%s4637_s16 + $0x70] sm:$0xff] %vm1101_vm4, %v3034_v6  ;;  %v2508_v52 = vadd.f32 %v2452_v49, %v2354_v26  ;;  %v2355_v55 = vadd.f32 %v2300_v51, %v2223_v12  ;;  %v3357_v26 = vld [vmem:[%s3442_s24 + $0xf0] sm:$0xff]  ;;  %v2758_v6 = vrot.slane %v3358_v57, 1 }
 0x2bc   : > { %v2905_v34 = vadd.f32 %v2873_v30, %v2751_v15  ;;  %v2757_v13 = vrot.slane %v3357_v26, 1 }
 0x2bd   : > { %v2590_v61 = vpop.f32.mrf.mxu0  ;;  %v2173_v37 = vpop.f32.mrf.mxu1 }
 0x2be   : > { %vm2937_vm5 = vcmp.gt.f32.partialorder %v2905_v34, 0.0  ;;  %v2970_v41 = vmul.f32 %v4624_v7, %v2905_v34  ;;  %v2646_v38 = vadd.f32 %v2590_v61, %v2508_v52  ;;  %v2225_v15 = vadd.f32 %v2173_v37, %v4517_v44 }
 0x2bf   : > { %v2759_v1 = vsel %vm2711_vm1, %v2757_v13, %v2758_v6 }
 0x2c0   : > { %v3002_v25 = vsel %vm2937_vm5, %v2905_v34, %v2970_v41  ;;  %v2841_v47 = vmul.f32 %v4610_v4, %v2646_v38  ;;  %v3359_v38 = vld [vmem:[%s3442_s24 + $0x100] sm:$0x3] }
 0x2c1   : > { %v3035_v60 = vadd.f32 %v4627_v3, %v3002_v25 }
 0x2c2   : > { %v2874_v32 = vadd.f32 %v4615_v48, %v2841_v47  ;;  %v2454_v31 = vpop.f32.mrf.mxu3  ;;  %v2303_v63 = vpop.f32.mrf.mxu2 }
 0x2c3   : > { %3067 = vst.msk [vmem:[%s4637_s16 + $0x78] sm:$0xff] %vm1101_vm4, %v3035_v60  ;;  %v2509_v28 = vadd.f32 %v2454_v31, %v2355_v55  ;;  %v2356_v43 = vadd.f32 %v2303_v63, %v2224_v33  ;;  %v2760_v55 = vrot.slane %v3359_v38, 1 }
 0x2c4   : > { %v2906_v11 = vadd.f32 %v2874_v32, %v2754_v36 }
 0x2c5   : > { %v2592_v24 = vpop.f32.mrf.mxu0  ;;  %v2176_v8 = vpop.f32.mrf.mxu1 }
 0x2c6   : > { %vm2938_vm15 = vcmp.gt.f32.partialorder %v2906_v11, 0.0  ;;  %v2971_v2 = vmul.f32 %v4624_v7, %v2906_v11  ;;  %v2647_v23 = vadd.f32 %v2592_v24, %v2509_v28  ;;  %v2226_v25 = vadd.f32 %v2176_v8, %v4524_v59 }
 0x2c8   : > { %v3003_v53 = vsel %vm2938_vm15, %v2906_v11, %v2971_v2  ;;  %v2842_v14 = vmul.f32 %v4610_v4, %v2647_v23  ;;  %v2761_v11 = vsel %vm2711_vm1, %v2758_v6, %v2760_v55  ;;  %v3360_v2 = vld [vmem:[%s3442_s24 + $0x108] sm:$0xff] }
 0x2c9   : > { %v3036_v0 = vadd.f32 %v4627_v3, %v3003_v53  ;;  %v2762_v23 = vrot.slane %v3360_v2, 1 }
 0x2ca   : > { %v2875_v39 = vadd.f32 %v4615_v48, %v2842_v14  ;;  %v2457_v45 = vpop.f32.mrf.mxu3  ;;  %v2305_v9 = vpop.f32.mrf.mxu2 }
 0x2cb   : > { %3068 = vst.msk [vmem:[%s4637_s16 + $0x80] sm:$0xff] %vm1101_vm4, %v3036_v0  ;;  %v2510_v21 = vadd.f32 %v2457_v45, %v2356_v43  ;;  %v2357_v52 = vadd.f32 %v2305_v9, %v2225_v15  ;;  %v3361_v43 = vld [vmem:[%s3442_s24 + $0x110] sm:$0xff] }
 0x2cc   : > { %v2907_v27 = vadd.f32 %v2875_v39, %v2756_v18  ;;  %v2763_v53 = vrot.slane %v3361_v43, 1 }
 0x2cd   : > { %v2595_v16 = vpop.f32.mrf.mxu0  ;;  %v2178_v30 = vpop.f32.mrf.mxu1 }
 0x2ce   : > { %vm2939_vm3 = vcmp.gt.f32.partialorder %v2907_v27, 0.0  ;;  %v2972_v49 = vmul.f32 %v4624_v7, %v2907_v27  ;;  %v2648_v51 = vadd.f32 %v2595_v16, %v2510_v21  ;;  %v2227_v14 = vadd.f32 %v2178_v30, %v4531_v40  ;;  %v3362_v30 = vld [vmem:[%s3442_s24 + $0x118] sm:$0x3] }
 0x2cf   : > { %v2764_v16 = vsel %vm2711_vm1, %v2762_v23, %v2763_v53 }
 0x2d0   : > { %v3004_v34 = vsel %vm2939_vm3, %v2907_v27, %v2972_v49  ;;  %v2843_v61 = vmul.f32 %v4610_v4, %v2648_v51  ;;  %v2765_v49 = vrot.slane %v3362_v30, 1  ;;  %v3366_v30 = vld [vmem:[%s3442_s24 + $0x138] sm:$0xff] }
 0x2d1   : > { %v3037_v42 = vadd.f32 %v4627_v3, %v3004_v34 }
 0x2d2   : > { %v2876_v22 = vadd.f32 %v4615_v48, %v2843_v61  ;;  %v2459_v58 = vpop.f32.mrf.mxu3  ;;  %v2308_v12 = vpop.f32.mrf.mxu2 }
 0x2d3   : > { %3069 = vst.msk [vmem:[%s4637_s16 + $0x88] sm:$0xff] %vm1101_vm4, %v3037_v42  ;;  %v2511_v44 = vadd.f32 %v2459_v58, %v2357_v52  ;;  %v2358_v32 = vadd.f32 %v2308_v12, %v2226_v25  ;;  %v2766_v12 = vsel %vm2711_vm1, %v2763_v53, %v2765_v49  ;;  %v3363_v25 = vld [vmem:[%s3442_s24 + $0x120] sm:$0xff]  ;;  %v3365_v53 = vld [vmem:[%s3442_s24 + $0x130] sm:$0x3]  ;;  %v2772_v49 = vrot.slane %v3366_v30, 1 }
 0x2d4   : > { %v2908_v37 = vadd.f32 %v2876_v22, %v2759_v1 }
 0x2d5   : > { %v2597_v41 = vpop.f32.mrf.mxu0  ;;  %v2181_v47 = vpop.f32.mrf.mxu1 }
 0x2d6   : > { %vm2940_vm6 = vcmp.gt.f32.partialorder %v2908_v37, 0.0  ;;  %v2973_v60 = vmul.f32 %v4624_v7, %v2908_v37  ;;  %v2649_v36 = vadd.f32 %v2597_v41, %v2511_v44  ;;  %v2228_v51 = vadd.f32 %v2181_v47, %v4538_v19 }
 0x2d7   : > { %v2767_v47 = vrot.slane %v3363_v25, 1 }
 0x2d8   : > { %v3005_v31 = vsel %vm2940_vm6, %v2908_v37, %v2973_v60  ;;  %v2844_v63 = vmul.f32 %v4610_v4, %v2649_v36  ;;  %v3364_v60 = vld [vmem:[%s3442_s24 + $0x128] sm:$0xff] }
 0x2d9   : > { %v3038_v28 = vadd.f32 %v4627_v3, %v3005_v31  ;;  %v2768_v36 = vrot.slane %v3364_v60, 1 }
 0x2da   : > { %v2877_v24 = vadd.f32 %v4615_v48, %v2844_v63  ;;  %v2462_v54 = vpop.f32.mrf.mxu3  ;;  %v2310_v20 = vpop.f32.mrf.mxu2 }
 0x2db   : > { %3070 = vst.msk [vmem:[%s4637_s16 + $0x90] sm:$0xff] %vm1101_vm4, %v3038_v28  ;;  %v2512_v59 = vadd.f32 %v2462_v54, %v2358_v32  ;;  %v2359_v45 = vadd.f32 %v2310_v20, %v2227_v14  ;;  %v2770_v14 = vrot.slane %v3365_v53, 1  ;;  %v3370_v53 = vld [vmem:[%s3442_s24 + $0x158] sm:$0xff] }
 0x2dc   : > { %v2909_v33 = vadd.f32 %v2877_v24, %v2761_v11 }
 0x2dd   : > { %v2600_v8 = vpop.f32.mrf.mxu0  ;;  %v2183_v0 = vpop.f32.mrf.mxu1 }
 0x2de   : > { %vm2941_vm7 = vcmp.gt.f32.partialorder %v2909_v33, 0.0  ;;  %v2974_v18 = vmul.f32 %v4624_v7, %v2909_v33  ;;  %v2650_v39 = vadd.f32 %v2600_v8, %v2512_v59  ;;  %v2229_v32 = vadd.f32 %v2183_v0, %v4545_v46 }
 0x2df   : > { %v2769_v59 = vsel %vm2711_vm1, %v2767_v47, %v2768_v36  ;;  %v3368_v47 = vld [vmem:[%s3442_s24 + $0x148] sm:$0x3] }
 0x2e0   : > { %v3006_v9 = vsel %vm2941_vm7, %v2909_v33, %v2974_v18  ;;  %v2845_v21 = vmul.f32 %v4610_v4, %v2650_v39  ;;  %v2775_v60 = vrot.slane %v3368_v47, 1 }
 0x2e1   : > { %v3039_v27 = vadd.f32 %v4627_v3, %v3006_v9 }
 0x2e2   : > { %v2878_v26 = vadd.f32 %v4615_v48, %v2845_v21  ;;  %v2464_v13 = vpop.f32.mrf.mxu3  ;;  %v2313_v57 = vpop.f32.mrf.mxu2 }
 0x2e3   : > { %3071 = vst.msk [vmem:[%s4637_s16 + $0x98] sm:$0xff] %vm1101_vm4, %v3039_v27  ;;  %v2513_v40 = vadd.f32 %v2464_v13, %v2359_v45  ;;  %v2360_v42 = vadd.f32 %v2313_v57, %v2228_v51  ;;  %v3367_v51 = vld [vmem:[%s3442_s24 + $0x140] sm:$0xff] }
 0x2e4   : > { %v2910_v6 = vadd.f32 %v2878_v26, %v2764_v16  ;;  %v2771_v26 = vsel %vm2711_vm1, %v2768_v36, %v2770_v14  ;;  %v2778_v14 = vrot.slane %v3370_v53, 1 }
 0x2e5   : > { %v2602_v15 = vpop.f32.mrf.mxu0  ;;  %v2186_v52 = vpop.f32.mrf.mxu1 }
 0x2e6   : > { %vm2942_vm8 = vcmp.gt.f32.partialorder %v2910_v6, 0.0  ;;  %v2975_v34 = vmul.f32 %v4624_v7, %v2910_v6  ;;  %v2651_v61 = vadd.f32 %v2602_v15, %v2513_v40  ;;  %v2230_v0 = vadd.f32 %v2186_v52, %v4552_v17 }
 0x2e7   : > { %v2773_v52 = vrot.slane %v3367_v51, 1 }
 0x2e8   : > { %v3007_v1 = vsel %vm2942_vm8, %v2910_v6, %v2975_v34  ;;  %v2846_v22 = vmul.f32 %v4610_v4, %v2651_v61 }
 0x2e9   : > { %v3040_v58 = vadd.f32 %v4627_v3, %v3007_v1 }
 0x2ea   : > { %v2879_v44 = vadd.f32 %v4615_v48, %v2846_v22  ;;  %v2467_v37 = vpop.f32.mrf.mxu3  ;;  %v2315_v41 = vpop.f32.mrf.mxu2 }
 0x2eb   : > { %3072 = vst.msk [vmem:[%s4637_s16 + $0xa0] sm:$0xff] %vm1101_vm4, %v3040_v58  ;;  %v2514_v19 = vadd.f32 %v2467_v37, %v2360_v42  ;;  %v2361_v11 = vadd.f32 %v2315_v41, %v2229_v32 }
 0x2ec   : > { %v2911_v38 = vadd.f32 %v2879_v44, %v2766_v12  ;;  %v2774_v44 = vsel %vm2711_vm1, %v2772_v49, %v2773_v52 }
 0x2ed   : > { %v2605_v55 = vpop.f32.mrf.mxu0  ;;  %v2188_v31 = vpop.f32.mrf.mxu1 }
 0x2ee   : > { %vm2943_vm0 = vcmp.gt.f32.partialorder %v2911_v38, 0.0  ;;  %v2976_v63 = vmul.f32 %v4624_v7, %v2911_v38  ;;  %v2652_v28 = vadd.f32 %v2605_v55, %v2514_v19  ;;  %v2231_v34 = vadd.f32 %v2188_v31, %v4559_v62 }
 0x2f0   : > { %v3008_v24 = vsel %vm2943_vm0, %v2911_v38, %v2976_v63  ;;  %v2847_v54 = vmul.f32 %v4610_v4, %v2652_v28 }
 0x2f1   : > { %v3041_v20 = vadd.f32 %v4627_v3, %v3008_v24 }
 0x2f2   : > { %v2880_v33 = vadd.f32 %v4615_v48, %v2847_v54  ;;  %v2469_v8 = vpop.f32.mrf.mxu3  ;;  %v2318_v2 = vpop.f32.mrf.mxu2  ;;  %v2776_v54 = vsel %vm2711_vm1, %v2773_v52, %v2775_v60 }
 0x2f3   : > { %3073 = vst.msk [vmem:[%s4637_s16 + $0xa8] sm:$0xff] %vm1101_vm4, %v3041_v20  ;;  %v2515_v46 = vadd.f32 %v2469_v8, %v2361_v11  ;;  %v2362_v45 = vadd.f32 %v2318_v2, %v2230_v0 }
 0x2f4   : > { %v2912_v23 = vadd.f32 %v2880_v33, %v2769_v59 }
 0x2f5   : > { %v2607_v43 = vpop.f32.mrf.mxu0  ;;  %v2191_v9 = vpop.f32.mrf.mxu1 }
 0x2f6   : > { %vm2944_vm10 = vcmp.gt.f32.partialorder %v2912_v23, 0.0  ;;  %v2977_v18 = vmul.f32 %v4624_v7, %v2912_v23  ;;  %v2653_v39 = vadd.f32 %v2607_v43, %v2515_v46  ;;  %v2232_v36 = vadd.f32 %v2191_v9, %v4566_v56 }
 0x2f8   : > { %v3009_v21 = vsel %vm2944_vm10, %v2912_v23, %v2977_v18  ;;  %v2848_v27 = vmul.f32 %v4610_v4, %v2653_v39  ;;  %v3369_v23 = vld [vmem:[%s3442_s24 + $0x150] sm:$0xff] }
 0x2f9   : > { %v3042_v16 = vadd.f32 %v4627_v3, %v3009_v21  ;;  %v2777_v43 = vrot.slane %v3369_v23, 1 }
 0x2fa   : > { %v2881_v13 = vadd.f32 %v4615_v48, %v2848_v27  ;;  %v2472_v57 = vpop.f32.mrf.mxu3  ;;  %v2320_v40 = vpop.f32.mrf.mxu2 }
 0x2fb   : > { %3074 = vst.msk [vmem:[%s4637_s16 + $0xb0] sm:$0xff] %vm1101_vm4, %v3042_v16  ;;  %v2516_v17 = vadd.f32 %v2472_v57, %v2362_v45  ;;  %v2363_v1 = vadd.f32 %v2320_v40, %v2231_v34  ;;  %v2779_v16 = vsel %vm2711_vm1, %v2777_v43, %v2778_v14 }
 0x2fc   : > { %v2913_v6 = vadd.f32 %v2881_v13, %v2771_v26 }
 0x2fd   : > { %v2610_v15 = vpop.f32.mrf.mxu0  ;;  %v2193_v37 = vpop.f32.mrf.mxu1 }
 0x2fe   : > { %vm2945_vm11 = vcmp.gt.f32.partialorder %v2913_v6, 0.0  ;;  %v2978_v61 = vmul.f32 %v4624_v7, %v2913_v6  ;;  %v2654_v42 = vadd.f32 %v2610_v15, %v2516_v17  ;;  %v2233_v0 = vadd.f32 %v2193_v37, %v4573_v10 }
 0x300   : > { %v3010_v22 = vsel %vm2945_vm11, %v2913_v6, %v2978_v61  ;;  %v2849_v58 = vmul.f32 %v4610_v4, %v2654_v42  ;;  %v3371_v6 = vld [vmem:[%s3442_s24 + $0x160] sm:$0x3] }
 0x301   : > { %v3043_v12 = vadd.f32 %v4627_v3, %v3010_v22  ;;  %v2780_v15 = vrot.slane %v3371_v6, 1 }
 0x302   : > { %v2882_v41 = vadd.f32 %v4615_v48, %v2849_v58  ;;  %v2474_v19 = vpop.f32.mrf.mxu3  ;;  %v2323_v38 = vpop.f32.mrf.mxu2 }
 0x303   : > { %3075 = vst.msk [vmem:[%s4637_s16 + $0xb8] sm:$0xff] %vm1101_vm4, %v3043_v12  ;;  %v2517_v62 = vadd.f32 %v2474_v19, %v2363_v1  ;;  %v2364_v63 = vadd.f32 %v2323_v38, %v2232_v36  ;;  %v2781_v22 = vsel %vm2711_vm1, %v2778_v14, %v2780_v15  ;;  %v3372_v19 = vld [vmem:[%s3442_s24 + $0x168] sm:$0xff] }
 0x304   : > { %v2914_v55 = vadd.f32 %v2882_v41, %v2774_v44  ;;  %v2782_v38 = vrot.slane %v3372_v19, 1 }
 0x305   : > { %v2612_v25 = vpop.f32.mrf.mxu0  ;;  %v2196_v2 = vpop.f32.mrf.mxu1 }
 0x306   : > { %vm2946_vm9 = vcmp.gt.f32.partialorder %v2914_v55, 0.0  ;;  %v2979_v32 = vmul.f32 %v4624_v7, %v2914_v55  ;;  %v2655_v31 = vadd.f32 %v2612_v25, %v2517_v62  ;;  %v2234_v30 = vadd.f32 %v2196_v2, %v4580_v50  ;;  %v3373_v62 = vld [vmem:[%s3442_s24 + $0x170] sm:$0xff] }
 0x308   : > { %v3011_v28 = vsel %vm2946_vm9, %v2914_v55, %v2979_v32  ;;  %v2850_v11 = vmul.f32 %v4610_v4, %v2655_v31  ;;  %v2783_v55 = vrot.slane %v3373_v62, 1 }
 0x309   : > { %v3044_v24 = vadd.f32 %v4627_v3, %v3011_v28 }
 0x30a   : > { %v2883_v20 = vadd.f32 %v4615_v48, %v2850_v11  ;;  %v2477_v59 = vpop.f32.mrf.mxu3  ;;  %v2325_v33 = vpop.f32.mrf.mxu2  ;;  %v2784_v11 = vsel %vm2711_vm1, %v2782_v38, %v2783_v55 }
 0x30b   : > { %3076 = vst.msk [vmem:[%s4637_s16 + $0xc0] sm:$0xff] %vm1101_vm4, %v3044_v24  ;;  %v2518_v56 = vadd.f32 %v2477_v59, %v2364_v63  ;;  %v2365_v45 = vadd.f32 %v2325_v33, %v2233_v0 }
 0x30c   : > { %v2915_v8 = vadd.f32 %v2883_v20, %v2776_v54 }
 0x30d   : > { %v2615_v46 = vpop.f32.mrf.mxu0  ;;  %v2198_v52 = vpop.f32.mrf.mxu1 }
 0x30e   : > { %vm2947_vm12 = vcmp.gt.f32.partialorder %v2915_v8, 0.0  ;;  %v2980_v18 = vmul.f32 %v4624_v7, %v2915_v8  ;;  %v2656_v39 = vadd.f32 %v2615_v46, %v2518_v56  ;;  %v2235_v25 = vadd.f32 %v2198_v52, %v4587_v35  ;;  %v3374_v56 = vld [vmem:[%s3442_s24 + $0x178] sm:$0x3] }
 0x310   : > { %v3012_v9 = vsel %vm2947_vm12, %v2915_v8, %v2980_v18  ;;  %v2851_v21 = vmul.f32 %v4610_v4, %v2656_v39  ;;  %v2785_v8 = vrot.slane %v3374_v56, 1 }
 0x311   : > { %v3045_v27 = vadd.f32 %v4627_v3, %v3012_v9 }
 0x312   : > { %v2884_v26 = vadd.f32 %v4615_v48, %v2851_v21  ;;  %v2479_v13 = vpop.f32.mrf.mxu3  ;;  %v2328_v57 = vpop.f32.mrf.mxu2  ;;  %v2786_v18 = vsel %vm2711_vm1, %v2783_v55, %v2785_v8 }
 0x313   : > { %3077 = vst.msk [vmem:[%s4637_s16 + $0xc8] sm:$0xff] %vm1101_vm4, %v3045_v27  ;;  %v2519_v10 = vadd.f32 %v2479_v13, %v2365_v45  ;;  %v2366_v34 = vadd.f32 %v2328_v57, %v2234_v30  ;;  %v3376_v57 = vld [vmem:[%s3442_s24 + $0x188] sm:$0xff] }
 0x314   : > { %v2916_v40 = vadd.f32 %v2884_v26, %v2779_v16  ;;  %v3375_v26 = vld [vmem:[%s3442_s24 + $0x180] sm:$0xff] }
 0x315   : > { %v2617_v17 = vpop.f32.mrf.mxu0  ;;  %v2201_v63 = vpop.f32.mrf.mxu1  ;;  %v2787_v13 = vrot.slane %v3375_v26, 1 }
 0x316   : > { %vm2948_vm13 = vcmp.gt.f32.partialorder %v2916_v40, 0.0  ;;  %v2981_v49 = vmul.f32 %v4624_v7, %v2916_v40  ;;  %v2657_v51 = vadd.f32 %v2617_v17, %v2519_v10  ;;  %v2236_v2 = vadd.f32 %v2201_v63, %v4594_v29 }
 0x317   : > { %v2788_v10 = vrot.slane %v3376_v57, 1 }
 0x318   : > { %v3013_v61 = vsel %vm2948_vm13, %v2916_v40, %v2981_v49  ;;  %v2852_v42 = vmul.f32 %v4610_v4, %v2657_v51 }
 0x319   : > { %v3046_v1 = vadd.f32 %v4627_v3, %v3013_v61  ;;  %v2789_v52 = vsel %vm2711_vm1, %v2787_v13, %v2788_v10 }
 0x31a   : > { %v2885_v58 = vadd.f32 %v4615_v48, %v2852_v42  ;;  %v2482_v12 = vpop.f32.mrf.mxu3  ;;  %v2330_v44 = vpop.f32.mrf.mxu2 }
 0x31b   : > { %3078 = vst.msk [vmem:[%s4637_s16 + $0xd0] sm:$0xff] %vm1101_vm4, %v3046_v1  ;;  %v2520_v50 = vadd.f32 %v2482_v12, %v2366_v34  ;;  %v2367_v36 = vadd.f32 %v2330_v44, %v2235_v25 }
 0x31c   : > { %v2917_v37 = vadd.f32 %v2885_v58, %v2781_v22  ;;  %v3377_v22 = vld [vmem:[%s3442_s24 + $0x190] sm:$0x3] }
 0x31d   : > { %v2620_v41 = vpop.f32.mrf.mxu0  ;;  %v2203_v9 = vpop.f32.mrf.mxu1  ;;  %v2790_v58 = vrot.slane %v3377_v22, 1 }
 0x31e   : > { %vm2949_vm14 = vcmp.gt.f32.partialorder %v2917_v37, 0.0  ;;  %v2982_v47 = vmul.f32 %v4624_v7, %v2917_v37  ;;  %v2658_v60 = vadd.f32 %v2620_v41, %v2520_v50  ;;  %v2237_v40 = vadd.f32 %v2203_v9, %v4601_v5 }
 0x31f   : > { %v2791_v19 = vsel %vm2711_vm1, %v2788_v10, %v2790_v58 }
 0x320   : > { %v3014_v32 = vsel %vm2949_vm14, %v2917_v37, %v2982_v47  ;;  %v2853_v31 = vmul.f32 %v4610_v4, %v2658_v60 }
 0x321   : > { %v3047_v28 = vadd.f32 %v4627_v3, %v3014_v32 }
 0x322   : > { %v2886_v24 = vadd.f32 %v4615_v48, %v2853_v31  ;;  %v2484_v54 = vpop.f32.mrf.mxu3  ;;  %v2333_v20 = vpop.f32.mrf.mxu2 }
 0x323   : > { %3079 = vst.msk [vmem:[%s4637_s16 + $0xd8] sm:$0xff] %vm1101_vm4, %v3047_v28  ;;  %v2521_v35 = vadd.f32 %v2484_v54, %v2367_v36  ;;  %v2368_v43 = vadd.f32 %v2333_v20, %v2236_v2 }
 0x324   : > { %v2918_v59 = vadd.f32 %v2886_v24, %v2784_v11 }
 0x325   : > { %v2622_v33 = vpop.f32.mrf.mxu0 }
 0x326   : > { %vm2950_vm2 = vcmp.gt.f32.partialorder %v2918_v59, 0.0  ;;  %v2983_v46 = vmul.f32 %v4624_v7, %v2918_v59  ;;  %v2659_v23 = vadd.f32 %v2622_v33, %v2521_v35 }
 0x328   : > { %v3015_v53 = vsel %vm2950_vm2, %v2918_v59, %v2983_v46  ;;  %v2854_v14 = vmul.f32 %v4610_v4, %v2659_v23 }
 0x329   : > { %v3048_v0 = vadd.f32 %v4627_v3, %v3015_v53 }
 0x32a   : > { %v2887_v39 = vadd.f32 %v4615_v48, %v2854_v14  ;;  %v2487_v45 = vpop.f32.mrf.mxu3  ;;  %v2335_v27 = vpop.f32.mrf.mxu2 }
 0x32b   : > { %3080 = vst.msk [vmem:[%s4637_s16 + $0xe0] sm:$0xff] %vm1101_vm4, %v3048_v0  ;;  %v2522_v29 = vadd.f32 %v2487_v45, %v2368_v43  ;;  %v2369_v15 = vadd.f32 %v2335_v27, %v2237_v40 }
 0x32c   : > { %v2919_v21 = vadd.f32 %v2887_v39, %v2786_v18 }
 0x32d   : > { %v2625_v16 = vpop.f32.mrf.mxu0 }
 0x32e   : > { %vm2951_vm5 = vcmp.gt.f32.partialorder %v2919_v21, 0.0  ;;  %v2984_v17 = vmul.f32 %v4624_v7, %v2919_v21  ;;  %v2660_v6 = vadd.f32 %v2625_v16, %v2522_v29 }
 0x330   : > { %v3016_v30 = vsel %vm2951_vm5, %v2919_v21, %v2984_v17  ;;  %v2855_v49 = vmul.f32 %v4610_v4, %v2660_v6 }
 0x331   : > { %v3049_v51 = vadd.f32 %v4627_v3, %v3016_v30 }
 0x332   : > { %v2888_v34 = vadd.f32 %v4615_v48, %v2855_v49  ;;  %v2489_v61 = vpop.f32.mrf.mxu3 }
 0x333   : > { %3081 = vst.msk [vmem:[%s4637_s16 + $0xe8] sm:$0xff] %vm1101_vm4, %v3049_v51  ;;  %v2523_v42 = vadd.f32 %v2489_v61, %v2369_v15 }
 0x334   : > { %v2920_v5 = vadd.f32 %v2888_v34, %v2789_v52 }
 0x335   : > { %v2627_v1 = vpop.f32.mrf.mxu0 }
 0x336   : > { %vm2952_vm15 = vcmp.gt.f32.partialorder %v2920_v5, 0.0  ;;  %v2985_v12 = vmul.f32 %v4624_v7, %v2920_v5  ;;  %v2661_v44 = vadd.f32 %v2627_v1, %v2523_v42 }
 0x338   : > { %v3017_v50 = vsel %vm2952_vm15, %v2920_v5, %v2985_v12  ;;  %v2856_v37 = vmul.f32 %v4610_v4, %v2661_v44 }
 0x339   : > { %v3050_v41 = vadd.f32 %v4627_v3, %v3017_v50 }
 0x33a   : > { %v2889_v38 = vadd.f32 %v4615_v48, %v2856_v37 }
 0x33b   : > { %3082 = vst.msk [vmem:[%s4637_s16 + $0xf0] sm:$0xff] %vm1101_vm4, %v3050_v41 }
 0x33c   : > { %v2921_v62 = vadd.f32 %v2889_v38, %v2791_v19 }
 0x33e   : > { %vm2953_vm3 = vcmp.gt.f32.partialorder %v2921_v62, 0.0  ;;  %v2986_v55 = vmul.f32 %v4624_v7, %v2921_v62 }
 0x340   : > { %v3018_v25 = vsel %vm2953_vm3, %v2921_v62, %v2986_v55 }
 0x341   : > { %v3051_v47 = vadd.f32 %v4627_v3, %v3018_v25 }
 0x343   : > { %3083 = vst.msk [vmem:[%s4637_s16 + $0xf8] sm:$0xff] %vm1101_vm4, %v3051_v47 }
 0x344 PF: > { %s14_s15 = sadd.s32 1, %s3384_s15  }
 0x345   : > { %p11_p4 = scmp.ge.s32.totalorder %s14_s15, 4  }
 0x347   :  { %13 = sbr.rel (!%p11_p4) target bundleno = 1 (0x1), region = 66 }

</bundles_post_ra>
